<compile_context>
chip_gen: v6e
topology: v6e:2x2x1
jax: 0.10.0
libtpu: 0.0.40
codegen_flags: <defaults>
</compile_context>

<pallas_src>
import functools
import math

import jax
import jax.numpy as jnp
from jax.experimental import pallas as pl
from jax.experimental.pallas import tpu as pltpu

# ----------------------------- small CCT config ------------------------------
IMG = 16              # img_size
C_IN = 3              # n_input_channels
EMBED = 32            # embedding_dim
KSIZE, STRIDE, PAD = 7, 2, 3           # tokenizer conv (bias=False)
POOL_K, POOL_S, POOL_P = 3, 2, 1       # tokenizer max-pool
N_LAYERS = 2          # num_layers
N_HEADS = 4           # num_heads
MLP_RATIO = 4.0
N_CLASSES = 10
LN_EPS = 1e-5

H_CONV = (IMG + 2 * PAD - KSIZE) // STRIDE + 1          # 8
H_POOL = (H_CONV + 2 * POOL_P - POOL_K) // POOL_S + 1   # 4
SEQ = H_POOL * H_POOL                                   # 16
FFN = int(EMBED * MLP_RATIO)                            # 128
HEAD_DIM = EMBED // N_HEADS                             # 8
KDIM = C_IN * KSIZE * KSIZE                             # 147
KPAD = 160                                              # 147 padded to 8-mult
BATCH_TILE = 8                                          # batch elems per grid step


# ------------------------------ in-kernel math --------------------------------
_GELU_C = math.sqrt(2.0 / math.pi)


def _gelu(x):
  # tanh-approx GELU (== jax.nn.gelu(approximate=True)); tanh runs on the EUP,
  # replacing the VALU-heavy erf polynomial (perf review, v6e/v7x).
  return 0.5 * x * (1.0 + jnp.tanh(_GELU_C * (x + 0.044715 * x * x * x)))


def _layernorm(x, g, b):
  mu = jnp.mean(x, axis=-1, keepdims=True)
  var = jnp.mean(jnp.square(x - mu), axis=-1, keepdims=True)
  return (x - mu) * jax.lax.rsqrt(var + LN_EPS) * g + b


def _bf16(x):
  return x.astype(jnp.bfloat16)


# ------------------------------ fused Pallas kernel ----------------------------
def cct_fused_kernel(patches_ref, convw_ref, posemb_ref,
                     ln1_g_ref, ln1_b_ref, wqkv_ref, wproj_ref, bproj_ref,
                     ln2_g_ref, ln2_b_ref, w1_ref, b1_ref, w2_ref, b2_ref,
                     norm_g_ref, norm_b_ref, pool_w_ref, pool_b_ref,
                     fc_w_ref, fc_b_ref, out_ref, *, tb, num_layers, num_heads):
  f32 = jnp.float32
  d = EMBED
  hd = d // num_heads
  bn = tb * SEQ

  # ------ tokenizer: conv (im2col matmul) + ReLU + VPU max-pool(3,2,1) --------
  conv = jnp.dot(patches_ref[...], convw_ref[...], preferred_element_type=f32)
  conv = jnp.maximum(conv, 0.0)                          # (tb*Hc*Wc, D), >= 0
  conv3 = conv.reshape(tb, H_CONV * H_CONV, d)
  tok_rows = []
  for oh in range(H_POOL):
    for ow in range(H_POOL):
      acc = None
      for kh in range(POOL_K):
        ih = oh * POOL_S + kh - POOL_P
        if ih < 0 or ih >= H_CONV:
          continue                                       # zero padding: values>=0
        for kw in range(POOL_K):
          iw = ow * POOL_S + kw - POOL_P
          if iw < 0 or iw >= H_CONV:
            continue
          r = conv3[:, ih * H_CONV + iw, :]              # (tb, D)
          acc = r if acc is None else jnp.maximum(acc, r)
      tok_rows.append(acc)
  tok = jnp.stack(tok_rows, axis=1)                      # (tb, SEQ, D)

  x = (tok + posemb_ref[...]).reshape(bn, d)             # (tb*SEQ, D) f32

  # ----------------------- transformer encoder layers --------------------------
  for l in range(num_layers):
    # pre-norm attention: fused QKV matmul (score scale folded into Wq),
    # per-batch-element heads -> O(B) score/prob memory, no batch mask.
    y = _layernorm(x, ln1_g_ref[l], ln1_b_ref[l])
    qkv = jnp.dot(_bf16(y), wqkv_ref[l], preferred_element_type=f32)   # (bn, 3D)
    ctx_heads = []
    for h in range(num_heads):
      q_h = _bf16(qkv[:, h * hd:(h + 1) * hd]).reshape(tb, SEQ, hd)
      k_h = _bf16(qkv[:, d + h * hd:d + (h + 1) * hd]).reshape(tb, SEQ, hd)
      v_h = _bf16(qkv[:, 2 * d + h * hd:2 * d + (h + 1) * hd]).reshape(tb, SEQ, hd)
      s = jnp.einsum('bik,bjk->bij', q_h, k_h,
                     preferred_element_type=f32)         # (tb, SEQ, SEQ)
      s = s - jnp.max(s, axis=-1, keepdims=True)
      p = jnp.exp(s)
      p = p / jnp.sum(p, axis=-1, keepdims=True)         # exact division
      ctx_heads.append(jnp.einsum('bij,bjk->bik', _bf16(p), v_h,
                                  preferred_element_type=f32))   # (tb, SEQ, hd)
    ctx = jnp.concatenate(ctx_heads, axis=-1).reshape(bn, d)
    x = x + jnp.dot(_bf16(ctx), wproj_ref[l],
                    preferred_element_type=f32) + bproj_ref[l]

    # MLP; residual taken from the post-norm value (CCT layer ordering)
    x = _layernorm(x, ln2_g_ref[l], ln2_b_ref[l])
    h1 = jnp.dot(_bf16(x), w1_ref[l], preferred_element_type=f32) + b1_ref[l]
    h1 = _gelu(h1)
    h2 = jnp.dot(_bf16(h1), w2_ref[l], preferred_element_type=f32) + b2_ref[l]
    x = x + h2

  # -------------------- head: final LN + seq-pool + fc -------------------------
  xn = _layernorm(x, norm_g_ref[...], norm_b_ref[...])   # (bn, D)
  xn3 = xn.reshape(tb, SEQ, d)
  sc = jnp.sum(xn3 * pool_w_ref[...], axis=-1, keepdims=True) + pool_b_ref[...]
  sc = sc - jnp.max(sc, axis=1, keepdims=True)
  a = jnp.exp(sc)
  a = a / jnp.sum(a, axis=1, keepdims=True)
  pooled = jnp.sum(a * xn3, axis=1)                      # (tb, D)
  out_ref[...] = jnp.dot(_bf16(pooled), fc_w_ref[...],
                         preferred_element_type=f32) + fc_b_ref[...]


# ------------------------------ host-side helpers -------------------------------
def _im2col_patches(x, bpad):
  """NCHW image -> (Bpad*Hc*Wc, KPAD) bf16 im2col patches for the tokenizer conv."""
  # TODO(synk): the strided window gather itself stays as XLA glue; it has no
  # clean in-kernel Pallas equivalent at these shapes.
  b = x.shape[0]
  xp = jnp.pad(x, ((0, bpad - b), (0, 0), (PAD, PAD), (PAD, PAD)))
  pieces = []
  for kh in range(KSIZE):
    for kw in range(KSIZE):
      pieces.append(xp[:, :, kh:kh + STRIDE * H_CONV:STRIDE,
                          kw:kw + STRIDE * H_CONV:STRIDE])          # (Bp,C,Hc,Wc)
  patches = jnp.stack(pieces, axis=2)                               # (Bp,C,K*K,Hc,Wc)
  patches = patches.transpose(0, 3, 4, 1, 2).reshape(bpad * H_CONV * H_CONV, KDIM)
  patches = jnp.pad(patches, ((0, 0), (0, KPAD - KDIM)))
  return patches.astype(jnp.bfloat16)


def _const_index_map(ndim):
  def imap(i):
    return (0,) * ndim
  return imap


def prepare_operands(params):
  """One-time restructuring of parameters into kernel-friendly layouts."""
  bf16 = jnp.bfloat16
  blocks = params["blocks"]
  qscale = 1.0 / math.sqrt(HEAD_DIM)

  def fused_qkv(bl):
    # Columns: [q (head-major) | k | v]; fold the 1/sqrt(head_dim) score scale
    # into the Q weights so no scaling is applied to the score tensor.
    return bl["wqkv"].at[:, :EMBED].multiply(qscale)

  return dict(
      convw=jnp.pad(params["conv_w"].reshape(EMBED, KDIM).T,
                    ((0, KPAD - KDIM), (0, 0))).astype(bf16),         # (KPAD, D)
      posemb=params["pos_emb"].reshape(SEQ, EMBED),                   # (SEQ, D)
      ln1_g=jnp.stack([bl["ln1_g"] for bl in blocks]),                # (L,1,D)
      ln1_b=jnp.stack([bl["ln1_b"] for bl in blocks]),
      wqkv=jnp.stack([fused_qkv(bl) for bl in blocks]).astype(bf16),  # (L,D,3D)
      wproj=jnp.stack([bl["wproj"] for bl in blocks]).astype(bf16),   # (L,D,D)
      bproj=jnp.stack([bl["bproj"] for bl in blocks]),
      ln2_g=jnp.stack([bl["ln2_g"] for bl in blocks]),
      ln2_b=jnp.stack([bl["ln2_b"] for bl in blocks]),
      w1=jnp.stack([bl["w1"] for bl in blocks]).astype(bf16),         # (L,D,FFN)
      b1=jnp.stack([bl["b1"] for bl in blocks]),
      w2=jnp.stack([bl["w2"] for bl in blocks]).astype(bf16),         # (L,FFN,D)
      b2=jnp.stack([bl["b2"] for bl in blocks]),
      norm_g=params["head"]["norm_g"],
      norm_b=params["head"]["norm_b"],
      pool_w=params["head"]["pool_w"].reshape(1, EMBED),              # f32 (1,D)
      pool_b=params["head"]["pool_b"],                                # (1,1)
      fc_w=params["head"]["fc_w"].astype(bf16),                       # (D, C)
      fc_b=params["head"]["fc_b"],                                    # (1, C)
  )


@jax.jit
def cct_forward(x, ops):
  batch = x.shape[0]
  tb = min(batch, BATCH_TILE)
  nb = pl.cdiv(batch, tb)
  bpad = nb * tb
  patches = _im2col_patches(x, bpad)                     # (bpad*64, KPAD) bf16

  weight_order = ("convw", "posemb", "ln1_g", "ln1_b", "wqkv", "wproj", "bproj",
                  "ln2_g", "ln2_b", "w1", "b1", "w2", "b2", "norm_g", "norm_b",
                  "pool_w", "pool_b", "fc_w", "fc_b")
  weights = [ops[name] for name in weight_order]

  in_specs = [pl.BlockSpec((tb * H_CONV * H_CONV, KPAD), lambda i: (i, 0))]
  in_specs += [pl.BlockSpec(w.shape, _const_index_map(w.ndim)) for w in weights]
  out_spec = pl.BlockSpec((tb, N_CLASSES), lambda i: (i, 0))

  flops_pe = (2 * H_CONV * H_CONV * KDIM * EMBED
              + N_LAYERS * (2 * SEQ * EMBED * 3 * EMBED
                            + 4 * N_HEADS * SEQ * SEQ * HEAD_DIM
                            + 2 * SEQ * EMBED * EMBED
                            + 4 * SEQ * EMBED * FFN)
              + 2 * SEQ * EMBED + 2 * EMBED * N_CLASSES)
  trans_pe = N_LAYERS * (N_HEADS * SEQ * SEQ + SEQ * FFN) + 6 * SEQ
  w_bytes = sum(int(w.size) * w.dtype.itemsize for w in weights)
  cost = pl.CostEstimate(
      flops=int(bpad) * flops_pe,
      transcendentals=int(bpad) * trans_pe,
      bytes_accessed=int(patches.size) * patches.dtype.itemsize
                     + int(bpad) * N_CLASSES * 4 + w_bytes)

  kern = functools.partial(cct_fused_kernel, tb=tb,
                           num_layers=N_LAYERS, num_heads=N_HEADS)
  out = pl.pallas_call(
      kern,
      grid=(nb,),
      in_specs=in_specs,
      out_specs=out_spec,
      out_shape=jax.ShapeDtypeStruct((bpad, N_CLASSES), jnp.float32),
      compiler_params=pltpu.CompilerParams(
          dimension_semantics=("parallel",),
          vmem_limit_bytes=32 * 1024 * 1024),
      cost_estimate=cost,
  )(patches, *weights)
  return out[:batch]


# ------------------------------ parameter init ----------------------------------
def init_params(key):
  ks = jax.random.split(key, 4 + N_LAYERS)
  params = {
      "conv_w": 0.05 * jax.random.normal(ks[0], (EMBED, C_IN, KSIZE, KSIZE), jnp.float32),
      "pos_emb": 0.2 * jax.random.normal(ks[1], (1, SEQ, EMBED), jnp.float32),
  }
  blocks = []
  for l in range(N_LAYERS):
    kk = jax.random.split(ks[2 + l], 8)
    blocks.append({
        "ln1_g": jnp.ones((1, EMBED), jnp.float32),
        "ln1_b": jnp.zeros((1, EMBED), jnp.float32),
        "wqkv": 0.05 * jax.random.normal(kk[0], (EMBED, 3 * EMBED), jnp.float32),
        "wproj": 0.05 * jax.random.normal(kk[1], (EMBED, EMBED), jnp.float32),
        "bproj": jnp.zeros((1, EMBED), jnp.float32),
        "ln2_g": jnp.ones((1, EMBED), jnp.float32),
        "ln2_b": jnp.zeros((1, EMBED), jnp.float32),
        "w1": 0.05 * jax.random.normal(kk[2], (EMBED, FFN), jnp.float32),
        "b1": jnp.zeros((1, FFN), jnp.float32),
        "w2": 0.05 * jax.random.normal(kk[3], (FFN, EMBED), jnp.float32),
        "b2": jnp.zeros((1, EMBED), jnp.float32),
    })
  params["blocks"] = blocks
  kh = jax.random.split(ks[2 + N_LAYERS], 2)
  params["head"] = {
      "norm_g": jnp.ones((1, EMBED), jnp.float32),
      "norm_b": jnp.zeros((1, EMBED), jnp.float32),
      "pool_w": 0.05 * jax.random.normal(kh[0], (EMBED, 1), jnp.float32),
      "pool_b": jnp.zeros((1, 1), jnp.float32),
      "fc_w": 0.05 * jax.random.normal(kh[1], (EMBED, N_CLASSES), jnp.float32),
      "fc_b": jnp.zeros((1, N_CLASSES), jnp.float32),
  }
  return params


if __name__ == "__main__":
  key = jax.random.PRNGKey(0)
  k_x, k_p = jax.random.split(key)
  x = jax.random.normal(k_x, (2, C_IN, IMG, IMG), jnp.float32)   # NCHW, like PyTorch
  params = init_params(k_p)
  ops = prepare_operands(params)

  out = cct_forward(x, ops)
  out = jax.block_until_ready(out)
  assert out.shape == (2, N_CLASSES) and out.dtype == jnp.float32
  assert bool(jnp.all(jnp.isfinite(out)))
  print("KERNEL_OK")
</pallas_src>

<mosaic_0001>
module attributes {stable_mosaic.version = 11 : i64} {
  func.func @cct_fused_kernel(%arg0: i32, %arg1: memref<128x160xbf16, #tpu.memory_space<vmem>>, %arg2: memref<160x32xbf16, #tpu.memory_space<vmem>>, %arg3: memref<16x32xf32, #tpu.memory_space<vmem>>, %arg4: memref<2x1x32xf32, #tpu.memory_space<vmem>>, %arg5: memref<2x1x32xf32, #tpu.memory_space<vmem>>, %arg6: memref<2x32x96xbf16, #tpu.memory_space<vmem>>, %arg7: memref<2x32x32xbf16, #tpu.memory_space<vmem>>, %arg8: memref<2x1x32xf32, #tpu.memory_space<vmem>>, %arg9: memref<2x1x32xf32, #tpu.memory_space<vmem>>, %arg10: memref<2x1x32xf32, #tpu.memory_space<vmem>>, %arg11: memref<2x32x128xbf16, #tpu.memory_space<vmem>>, %arg12: memref<2x1x128xf32, #tpu.memory_space<vmem>>, %arg13: memref<2x128x32xbf16, #tpu.memory_space<vmem>>, %arg14: memref<2x1x32xf32, #tpu.memory_space<vmem>>, %arg15: memref<1x32xf32, #tpu.memory_space<vmem>>, %arg16: memref<1x32xf32, #tpu.memory_space<vmem>>, %arg17: memref<1x32xf32, #tpu.memory_space<vmem>>, %arg18: memref<1x1xf32, #tpu.memory_space<vmem>>, %arg19: memref<32x10xbf16, #tpu.memory_space<vmem>>, %arg20: memref<1x10xf32, #tpu.memory_space<vmem>>, %arg21: memref<2x10xf32, #tpu.memory_space<vmem>>) attributes {dimension_semantics = [#tpu.dimension_semantics<parallel>], iteration_bounds = array<i64: 1>, scalar_prefetch = 0 : i64, scratch_operands = 0 : i64, tpu.core_type = #tpu.core_type<tc>, window_params = [{transform_indices = @transform_0, window_bounds = array<i64: 128, 160>}, {pipeline_mode = #tpu.pipeline_mode<synchronous>, transform_indices = @transform_1, window_bounds = array<i64: 160, 32>}, {pipeline_mode = #tpu.pipeline_mode<synchronous>, transform_indices = @transform_2, window_bounds = array<i64: 16, 32>}, {pipeline_mode = #tpu.pipeline_mode<synchronous>, transform_indices = @transform_3, window_bounds = array<i64: 2, 1, 32>}, {pipeline_mode = #tpu.pipeline_mode<synchronous>, transform_indices = @transform_4, window_bounds = array<i64: 2, 1, 32>}, {pipeline_mode = #tpu.pipeline_mode<synchronous>, transform_indices = @transform_5, window_bounds = array<i64: 2, 32, 96>}, {pipeline_mode = #tpu.pipeline_mode<synchronous>, transform_indices = @transform_6, window_bounds = array<i64: 2, 32, 32>}, {pipeline_mode = #tpu.pipeline_mode<synchronous>, transform_indices = @transform_7, window_bounds = array<i64: 2, 1, 32>}, {pipeline_mode = #tpu.pipeline_mode<synchronous>, transform_indices = @transform_8, window_bounds = array<i64: 2, 1, 32>}, {pipeline_mode = #tpu.pipeline_mode<synchronous>, transform_indices = @transform_9, window_bounds = array<i64: 2, 1, 32>}, {pipeline_mode = #tpu.pipeline_mode<synchronous>, transform_indices = @transform_10, window_bounds = array<i64: 2, 32, 128>}, {pipeline_mode = #tpu.pipeline_mode<synchronous>, transform_indices = @transform_11, window_bounds = array<i64: 2, 1, 128>}, {pipeline_mode = #tpu.pipeline_mode<synchronous>, transform_indices = @transform_12, window_bounds = array<i64: 2, 128, 32>}, {pipeline_mode = #tpu.pipeline_mode<synchronous>, transform_indices = @transform_13, window_bounds = array<i64: 2, 1, 32>}, {pipeline_mode = #tpu.pipeline_mode<synchronous>, transform_indices = @transform_14, window_bounds = array<i64: 1, 32>}, {pipeline_mode = #tpu.pipeline_mode<synchronous>, transform_indices = @transform_15, window_bounds = array<i64: 1, 32>}, {pipeline_mode = #tpu.pipeline_mode<synchronous>, transform_indices = @transform_16, window_bounds = array<i64: 1, 32>}, {pipeline_mode = #tpu.pipeline_mode<synchronous>, transform_indices = @transform_17, window_bounds = array<i64: 1, 1>}, {pipeline_mode = #tpu.pipeline_mode<synchronous>, transform_indices = @transform_18, window_bounds = array<i64: 32, 10>}, {pipeline_mode = #tpu.pipeline_mode<synchronous>, transform_indices = @transform_19, window_bounds = array<i64: 1, 10>}, {transform_indices = @transform_20, window_bounds = array<i64: 2, 10>}]} {
    %c0 = arith.constant 0 : index
    %c0_0 = arith.constant 0 : index
    %0 = vector.load %arg1[%c0, %c0_0] : memref<128x160xbf16, #tpu.memory_space<vmem>>, vector<128x160xbf16>
    %c0_1 = arith.constant 0 : index
    %c0_2 = arith.constant 0 : index
    %1 = vector.load %arg2[%c0_1, %c0_2] : memref<160x32xbf16, #tpu.memory_space<vmem>>, vector<160x32xbf16>
    %cst = arith.constant dense<0.000000e+00> : vector<128x32xf32>
    %2 = tpu.matmul %0, %1, %cst {dimension_numbers = #tpu.dot_dimension_numbers<[1], [0], [0], [1], [0, 0, 1, 1], [], []>} : vector<128x160xbf16>, vector<160x32xbf16>, vector<128x32xf32> -> vector<128x32xf32>
    %cst_3 = arith.constant 0.000000e+00 : f32
    %3 = vector.broadcast %cst_3 : f32 to vector<128x32xf32>
    %4 = arith.maximumf %2, %3 : vector<128x32xf32>
    %5 = vector.shape_cast %4 : vector<128x32xf32> to vector<2x64x32xf32>
    %6 = vector.extract_strided_slice %5 {offsets = [0, 0, 0], sizes = [2, 1, 32], strides = [1, 1, 1]} : vector<2x64x32xf32> to vector<2x1x32xf32>
    %7 = vector.shape_cast %6 : vector<2x1x32xf32> to vector<2x32xf32>
    %8 = vector.extract_strided_slice %5 {offsets = [0, 1, 0], sizes = [2, 1, 32], strides = [1, 1, 1]} : vector<2x64x32xf32> to vector<2x1x32xf32>
    %9 = vector.shape_cast %8 : vector<2x1x32xf32> to vector<2x32xf32>
    %10 = arith.maximumf %7, %9 : vector<2x32xf32>
    %11 = vector.extract_strided_slice %5 {offsets = [0, 8, 0], sizes = [2, 1, 32], strides = [1, 1, 1]} : vector<2x64x32xf32> to vector<2x1x32xf32>
    %12 = vector.shape_cast %11 : vector<2x1x32xf32> to vector<2x32xf32>
    %13 = arith.maximumf %10, %12 : vector<2x32xf32>
    %14 = vector.extract_strided_slice %5 {offsets = [0, 9, 0], sizes = [2, 1, 32], strides = [1, 1, 1]} : vector<2x64x32xf32> to vector<2x1x32xf32>
    %15 = vector.shape_cast %14 : vector<2x1x32xf32> to vector<2x32xf32>
    %16 = arith.maximumf %13, %15 : vector<2x32xf32>
    %17 = vector.extract_strided_slice %5 {offsets = [0, 1, 0], sizes = [2, 1, 32], strides = [1, 1, 1]} : vector<2x64x32xf32> to vector<2x1x32xf32>
    %18 = vector.shape_cast %17 : vector<2x1x32xf32> to vector<2x32xf32>
    %19 = vector.extract_strided_slice %5 {offsets = [0, 2, 0], sizes = [2, 1, 32], strides = [1, 1, 1]} : vector<2x64x32xf32> to vector<2x1x32xf32>
    %20 = vector.shape_cast %19 : vector<2x1x32xf32> to vector<2x32xf32>
    %21 = arith.maximumf %18, %20 : vector<2x32xf32>
    %22 = vector.extract_strided_slice %5 {offsets = [0, 3, 0], sizes = [2, 1, 32], strides = [1, 1, 1]} : vector<2x64x32xf32> to vector<2x1x32xf32>
    %23 = vector.shape_cast %22 : vector<2x1x32xf32> to vector<2x32xf32>
    %24 = arith.maximumf %21, %23 : vector<2x32xf32>
    %25 = vector.extract_strided_slice %5 {offsets = [0, 9, 0], sizes = [2, 1, 32], strides = [1, 1, 1]} : vector<2x64x32xf32> to vector<2x1x32xf32>
    %26 = vector.shape_cast %25 : vector<2x1x32xf32> to vector<2x32xf32>
    %27 = arith.maximumf %24, %26 : vector<2x32xf32>
    %28 = vector.extract_strided_slice %5 {offsets = [0, 10, 0], sizes = [2, 1, 32], strides = [1, 1, 1]} : vector<2x64x32xf32> to vector<2x1x32xf32>
    %29 = vector.shape_cast %28 : vector<2x1x32xf32> to vector<2x32xf32>
    %30 = arith.maximumf %27, %29 : vector<2x32xf32>
    %31 = vector.extract_strided_slice %5 {offsets = [0, 11, 0], sizes = [2, 1, 32], strides = [1, 1, 1]} : vector<2x64x32xf32> to vector<2x1x32xf32>
    %32 = vector.shape_cast %31 : vector<2x1x32xf32> to vector<2x32xf32>
    %33 = arith.maximumf %30, %32 : vector<2x32xf32>
    %34 = vector.extract_strided_slice %5 {offsets = [0, 3, 0], sizes = [2, 1, 32], strides = [1, 1, 1]} : vector<2x64x32xf32> to vector<2x1x32xf32>
    %35 = vector.shape_cast %34 : vector<2x1x32xf32> to vector<2x32xf32>
    %36 = vector.extract_strided_slice %5 {offsets = [0, 4, 0], sizes = [2, 1, 32], strides = [1, 1, 1]} : vector<2x64x32xf32> to vector<2x1x32xf32>
    %37 = vector.shape_cast %36 : vector<2x1x32xf32> to vector<2x32xf32>
    %38 = arith.maximumf %35, %37 : vector<2x32xf32>
    %39 = vector.extract_strided_slice %5 {offsets = [0, 5, 0], sizes = [2, 1, 32], strides = [1, 1, 1]} : vector<2x64x32xf32> to vector<2x1x32xf32>
    %40 = vector.shape_cast %39 : vector<2x1x32xf32> to vector<2x32xf32>
    %41 = arith.maximumf %38, %40 : vector<2x32xf32>
    %42 = vector.extract_strided_slice %5 {offsets = [0, 11, 0], sizes = [2, 1, 32], strides = [1, 1, 1]} : vector<2x64x32xf32> to vector<2x1x32xf32>
    %43 = vector.shape_cast %42 : vector<2x1x32xf32> to vector<2x32xf32>
    %44 = arith.maximumf %41, %43 : vector<2x32xf32>
    %45 = vector.extract_strided_slice %5 {offsets = [0, 12, 0], sizes = [2, 1, 32], strides = [1, 1, 1]} : vector<2x64x32xf32> to vector<2x1x32xf32>
    %46 = vector.shape_cast %45 : vector<2x1x32xf32> to vector<2x32xf32>
    %47 = arith.maximumf %44, %46 : vector<2x32xf32>
    %48 = vector.extract_strided_slice %5 {offsets = [0, 13, 0], sizes = [2, 1, 32], strides = [1, 1, 1]} : vector<2x64x32xf32> to vector<2x1x32xf32>
    %49 = vector.shape_cast %48 : vector<2x1x32xf32> to vector<2x32xf32>
    %50 = arith.maximumf %47, %49 : vector<2x32xf32>
    %51 = vector.extract_strided_slice %5 {offsets = [0, 5, 0], sizes = [2, 1, 32], strides = [1, 1, 1]} : vector<2x64x32xf32> to vector<2x1x32xf32>
    %52 = vector.shape_cast %51 : vector<2x1x32xf32> to vector<2x32xf32>
    %53 = vector.extract_strided_slice %5 {offsets = [0, 6, 0], sizes = [2, 1, 32], strides = [1, 1, 1]} : vector<2x64x32xf32> to vector<2x1x32xf32>
    %54 = vector.shape_cast %53 : vector<2x1x32xf32> to vector<2x32xf32>
    %55 = arith.maximumf %52, %54 : vector<2x32xf32>
    %56 = vector.extract_strided_slice %5 {offsets = [0, 7, 0], sizes = [2, 1, 32], strides = [1, 1, 1]} : vector<2x64x32xf32> to vector<2x1x32xf32>
    %57 = vector.shape_cast %56 : vector<2x1x32xf32> to vector<2x32xf32>
    %58 = arith.maximumf %55, %57 : vector<2x32xf32>
    %59 = vector.extract_strided_slice %5 {offsets = [0, 13, 0], sizes = [2, 1, 32], strides = [1, 1, 1]} : vector<2x64x32xf32> to vector<2x1x32xf32>
    %60 = vector.shape_cast %59 : vector<2x1x32xf32> to vector<2x32xf32>
    %61 = arith.maximumf %58, %60 : vector<2x32xf32>
    %62 = vector.extract_strided_slice %5 {offsets = [0, 14, 0], sizes = [2, 1, 32], strides = [1, 1, 1]} : vector<2x64x32xf32> to vector<2x1x32xf32>
    %63 = vector.shape_cast %62 : vector<2x1x32xf32> to vector<2x32xf32>
    %64 = arith.maximumf %61, %63 : vector<2x32xf32>
    %65 = vector.extract_strided_slice %5 {offsets = [0, 15, 0], sizes = [2, 1, 32], strides = [1, 1, 1]} : vector<2x64x32xf32> to vector<2x1x32xf32>
    %66 = vector.shape_cast %65 : vector<2x1x32xf32> to vector<2x32xf32>
    %67 = arith.maximumf %64, %66 : vector<2x32xf32>
    %68 = vector.extract_strided_slice %5 {offsets = [0, 8, 0], sizes = [2, 1, 32], strides = [1, 1, 1]} : vector<2x64x32xf32> to vector<2x1x32xf32>
    %69 = vector.shape_cast %68 : vector<2x1x32xf32> to vector<2x32xf32>
    %70 = vector.extract_strided_slice %5 {offsets = [0, 9, 0], sizes = [2, 1, 32], strides = [1, 1, 1]} : vector<2x64x32xf32> to vector<2x1x32xf32>
    %71 = vector.shape_cast %70 : vector<2x1x32xf32> to vector<2x32xf32>
    %72 = arith.maximumf %69, %71 : vector<2x32xf32>
    %73 = vector.extract_strided_slice %5 {offsets = [0, 16, 0], sizes = [2, 1, 32], strides = [1, 1, 1]} : vector<2x64x32xf32> to vector<2x1x32xf32>
    %74 = vector.shape_cast %73 : vector<2x1x32xf32> to vector<2x32xf32>
    %75 = arith.maximumf %72, %74 : vector<2x32xf32>
    %76 = vector.extract_strided_slice %5 {offsets = [0, 17, 0], sizes = [2, 1, 32], strides = [1, 1, 1]} : vector<2x64x32xf32> to vector<2x1x32xf32>
    %77 = vector.shape_cast %76 : vector<2x1x32xf32> to vector<2x32xf32>
    %78 = arith.maximumf %75, %77 : vector<2x32xf32>
    %79 = vector.extract_strided_slice %5 {offsets = [0, 24, 0], sizes = [2, 1, 32], strides = [1, 1, 1]} : vector<2x64x32xf32> to vector<2x1x32xf32>
    %80 = vector.shape_cast %79 : vector<2x1x32xf32> to vector<2x32xf32>
    %81 = arith.maximumf %78, %80 : vector<2x32xf32>
    %82 = vector.extract_strided_slice %5 {offsets = [0, 25, 0], sizes = [2, 1, 32], strides = [1, 1, 1]} : vector<2x64x32xf32> to vector<2x1x32xf32>
    %83 = vector.shape_cast %82 : vector<2x1x32xf32> to vector<2x32xf32>
    %84 = arith.maximumf %81, %83 : vector<2x32xf32>
    %85 = vector.extract_strided_slice %5 {offsets = [0, 9, 0], sizes = [2, 1, 32], strides = [1, 1, 1]} : vector<2x64x32xf32> to vector<2x1x32xf32>
    %86 = vector.shape_cast %85 : vector<2x1x32xf32> to vector<2x32xf32>
    %87 = vector.extract_strided_slice %5 {offsets = [0, 10, 0], sizes = [2, 1, 32], strides = [1, 1, 1]} : vector<2x64x32xf32> to vector<2x1x32xf32>
    %88 = vector.shape_cast %87 : vector<2x1x32xf32> to vector<2x32xf32>
    %89 = arith.maximumf %86, %88 : vector<2x32xf32>
    %90 = vector.extract_strided_slice %5 {offsets = [0, 11, 0], sizes = [2, 1, 32], strides = [1, 1, 1]} : vector<2x64x32xf32> to vector<2x1x32xf32>
    %91 = vector.shape_cast %90 : vector<2x1x32xf32> to vector<2x32xf32>
    %92 = arith.maximumf %89, %91 : vector<2x32xf32>
    %93 = vector.extract_strided_slice %5 {offsets = [0, 17, 0], sizes = [2, 1, 32], strides = [1, 1, 1]} : vector<2x64x32xf32> to vector<2x1x32xf32>
    %94 = vector.shape_cast %93 : vector<2x1x32xf32> to vector<2x32xf32>
    %95 = arith.maximumf %92, %94 : vector<2x32xf32>
    %96 = vector.extract_strided_slice %5 {offsets = [0, 18, 0], sizes = [2, 1, 32], strides = [1, 1, 1]} : vector<2x64x32xf32> to vector<2x1x32xf32>
    %97 = vector.shape_cast %96 : vector<2x1x32xf32> to vector<2x32xf32>
    %98 = arith.maximumf %95, %97 : vector<2x32xf32>
    %99 = vector.extract_strided_slice %5 {offsets = [0, 19, 0], sizes = [2, 1, 32], strides = [1, 1, 1]} : vector<2x64x32xf32> to vector<2x1x32xf32>
    %100 = vector.shape_cast %99 : vector<2x1x32xf32> to vector<2x32xf32>
    %101 = arith.maximumf %98, %100 : vector<2x32xf32>
    %102 = vector.extract_strided_slice %5 {offsets = [0, 25, 0], sizes = [2, 1, 32], strides = [1, 1, 1]} : vector<2x64x32xf32> to vector<2x1x32xf32>
    %103 = vector.shape_cast %102 : vector<2x1x32xf32> to vector<2x32xf32>
    %104 = arith.maximumf %101, %103 : vector<2x32xf32>
    %105 = vector.extract_strided_slice %5 {offsets = [0, 26, 0], sizes = [2, 1, 32], strides = [1, 1, 1]} : vector<2x64x32xf32> to vector<2x1x32xf32>
    %106 = vector.shape_cast %105 : vector<2x1x32xf32> to vector<2x32xf32>
    %107 = arith.maximumf %104, %106 : vector<2x32xf32>
    %108 = vector.extract_strided_slice %5 {offsets = [0, 27, 0], sizes = [2, 1, 32], strides = [1, 1, 1]} : vector<2x64x32xf32> to vector<2x1x32xf32>
    %109 = vector.shape_cast %108 : vector<2x1x32xf32> to vector<2x32xf32>
    %110 = arith.maximumf %107, %109 : vector<2x32xf32>
    %111 = vector.extract_strided_slice %5 {offsets = [0, 11, 0], sizes = [2, 1, 32], strides = [1, 1, 1]} : vector<2x64x32xf32> to vector<2x1x32xf32>
    %112 = vector.shape_cast %111 : vector<2x1x32xf32> to vector<2x32xf32>
    %113 = vector.extract_strided_slice %5 {offsets = [0, 12, 0], sizes = [2, 1, 32], strides = [1, 1, 1]} : vector<2x64x32xf32> to vector<2x1x32xf32>
    %114 = vector.shape_cast %113 : vector<2x1x32xf32> to vector<2x32xf32>
    %115 = arith.maximumf %112, %114 : vector<2x32xf32>
    %116 = vector.extract_strided_slice %5 {offsets = [0, 13, 0], sizes = [2, 1, 32], strides = [1, 1, 1]} : vector<2x64x32xf32> to vector<2x1x32xf32>
    %117 = vector.shape_cast %116 : vector<2x1x32xf32> to vector<2x32xf32>
    %118 = arith.maximumf %115, %117 : vector<2x32xf32>
    %119 = vector.extract_strided_slice %5 {offsets = [0, 19, 0], sizes = [2, 1, 32], strides = [1, 1, 1]} : vector<2x64x32xf32> to vector<2x1x32xf32>
    %120 = vector.shape_cast %119 : vector<2x1x32xf32> to vector<2x32xf32>
    %121 = arith.maximumf %118, %120 : vector<2x32xf32>
    %122 = vector.extract_strided_slice %5 {offsets = [0, 20, 0], sizes = [2, 1, 32], strides = [1, 1, 1]} : vector<2x64x32xf32> to vector<2x1x32xf32>
    %123 = vector.shape_cast %122 : vector<2x1x32xf32> to vector<2x32xf32>
    %124 = arith.maximumf %121, %123 : vector<2x32xf32>
    %125 = vector.extract_strided_slice %5 {offsets = [0, 21, 0], sizes = [2, 1, 32], strides = [1, 1, 1]} : vector<2x64x32xf32> to vector<2x1x32xf32>
    %126 = vector.shape_cast %125 : vector<2x1x32xf32> to vector<2x32xf32>
    %127 = arith.maximumf %124, %126 : vector<2x32xf32>
    %128 = vector.extract_strided_slice %5 {offsets = [0, 27, 0], sizes = [2, 1, 32], strides = [1, 1, 1]} : vector<2x64x32xf32> to vector<2x1x32xf32>
    %129 = vector.shape_cast %128 : vector<2x1x32xf32> to vector<2x32xf32>
    %130 = arith.maximumf %127, %129 : vector<2x32xf32>
    %131 = vector.extract_strided_slice %5 {offsets = [0, 28, 0], sizes = [2, 1, 32], strides = [1, 1, 1]} : vector<2x64x32xf32> to vector<2x1x32xf32>
    %132 = vector.shape_cast %131 : vector<2x1x32xf32> to vector<2x32xf32>
    %133 = arith.maximumf %130, %132 : vector<2x32xf32>
    %134 = vector.extract_strided_slice %5 {offsets = [0, 29, 0], sizes = [2, 1, 32], strides = [1, 1, 1]} : vector<2x64x32xf32> to vector<2x1x32xf32>
    %135 = vector.shape_cast %134 : vector<2x1x32xf32> to vector<2x32xf32>
    %136 = arith.maximumf %133, %135 : vector<2x32xf32>
    %137 = vector.extract_strided_slice %5 {offsets = [0, 13, 0], sizes = [2, 1, 32], strides = [1, 1, 1]} : vector<2x64x32xf32> to vector<2x1x32xf32>
    %138 = vector.shape_cast %137 : vector<2x1x32xf32> to vector<2x32xf32>
    %139 = vector.extract_strided_slice %5 {offsets = [0, 14, 0], sizes = [2, 1, 32], strides = [1, 1, 1]} : vector<2x64x32xf32> to vector<2x1x32xf32>
    %140 = vector.shape_cast %139 : vector<2x1x32xf32> to vector<2x32xf32>
    %141 = arith.maximumf %138, %140 : vector<2x32xf32>
    %142 = vector.extract_strided_slice %5 {offsets = [0, 15, 0], sizes = [2, 1, 32], strides = [1, 1, 1]} : vector<2x64x32xf32> to vector<2x1x32xf32>
    %143 = vector.shape_cast %142 : vector<2x1x32xf32> to vector<2x32xf32>
    %144 = arith.maximumf %141, %143 : vector<2x32xf32>
    %145 = vector.extract_strided_slice %5 {offsets = [0, 21, 0], sizes = [2, 1, 32], strides = [1, 1, 1]} : vector<2x64x32xf32> to vector<2x1x32xf32>
    %146 = vector.shape_cast %145 : vector<2x1x32xf32> to vector<2x32xf32>
    %147 = arith.maximumf %144, %146 : vector<2x32xf32>
    %148 = vector.extract_strided_slice %5 {offsets = [0, 22, 0], sizes = [2, 1, 32], strides = [1, 1, 1]} : vector<2x64x32xf32> to vector<2x1x32xf32>
    %149 = vector.shape_cast %148 : vector<2x1x32xf32> to vector<2x32xf32>
    %150 = arith.maximumf %147, %149 : vector<2x32xf32>
    %151 = vector.extract_strided_slice %5 {offsets = [0, 23, 0], sizes = [2, 1, 32], strides = [1, 1, 1]} : vector<2x64x32xf32> to vector<2x1x32xf32>
    %152 = vector.shape_cast %151 : vector<2x1x32xf32> to vector<2x32xf32>
    %153 = arith.maximumf %150, %152 : vector<2x32xf32>
    %154 = vector.extract_strided_slice %5 {offsets = [0, 29, 0], sizes = [2, 1, 32], strides = [1, 1, 1]} : vector<2x64x32xf32> to vector<2x1x32xf32>
    %155 = vector.shape_cast %154 : vector<2x1x32xf32> to vector<2x32xf32>
    %156 = arith.maximumf %153, %155 : vector<2x32xf32>
    %157 = vector.extract_strided_slice %5 {offsets = [0, 30, 0], sizes = [2, 1, 32], strides = [1, 1, 1]} : vector<2x64x32xf32> to vector<2x1x32xf32>
    %158 = vector.shape_cast %157 : vector<2x1x32xf32> to vector<2x32xf32>
    %159 = arith.maximumf %156, %158 : vector<2x32xf32>
    %160 = vector.extract_strided_slice %5 {offsets = [0, 31, 0], sizes = [2, 1, 32], strides = [1, 1, 1]} : vector<2x64x32xf32> to vector<2x1x32xf32>
    %161 = vector.shape_cast %160 : vector<2x1x32xf32> to vector<2x32xf32>
    %162 = arith.maximumf %159, %161 : vector<2x32xf32>
    %163 = vector.extract_strided_slice %5 {offsets = [0, 24, 0], sizes = [2, 1, 32], strides = [1, 1, 1]} : vector<2x64x32xf32> to vector<2x1x32xf32>
    %164 = vector.shape_cast %163 : vector<2x1x32xf32> to vector<2x32xf32>
    %165 = vector.extract_strided_slice %5 {offsets = [0, 25, 0], sizes = [2, 1, 32], strides = [1, 1, 1]} : vector<2x64x32xf32> to vector<2x1x32xf32>
    %166 = vector.shape_cast %165 : vector<2x1x32xf32> to vector<2x32xf32>
    %167 = arith.maximumf %164, %166 : vector<2x32xf32>
    %168 = vector.extract_strided_slice %5 {offsets = [0, 32, 0], sizes = [2, 1, 32], strides = [1, 1, 1]} : vector<2x64x32xf32> to vector<2x1x32xf32>
    %169 = vector.shape_cast %168 : vector<2x1x32xf32> to vector<2x32xf32>
    %170 = arith.maximumf %167, %169 : vector<2x32xf32>
    %171 = vector.extract_strided_slice %5 {offsets = [0, 33, 0], sizes = [2, 1, 32], strides = [1, 1, 1]} : vector<2x64x32xf32> to vector<2x1x32xf32>
    %172 = vector.shape_cast %171 : vector<2x1x32xf32> to vector<2x32xf32>
    %173 = arith.maximumf %170, %172 : vector<2x32xf32>
    %174 = vector.extract_strided_slice %5 {offsets = [0, 40, 0], sizes = [2, 1, 32], strides = [1, 1, 1]} : vector<2x64x32xf32> to vector<2x1x32xf32>
    %175 = vector.shape_cast %174 : vector<2x1x32xf32> to vector<2x32xf32>
    %176 = arith.maximumf %173, %175 : vector<2x32xf32>
    %177 = vector.extract_strided_slice %5 {offsets = [0, 41, 0], sizes = [2, 1, 32], strides = [1, 1, 1]} : vector<2x64x32xf32> to vector<2x1x32xf32>
    %178 = vector.shape_cast %177 : vector<2x1x32xf32> to vector<2x32xf32>
    %179 = arith.maximumf %176, %178 : vector<2x32xf32>
    %180 = vector.extract_strided_slice %5 {offsets = [0, 25, 0], sizes = [2, 1, 32], strides = [1, 1, 1]} : vector<2x64x32xf32> to vector<2x1x32xf32>
    %181 = vector.shape_cast %180 : vector<2x1x32xf32> to vector<2x32xf32>
    %182 = vector.extract_strided_slice %5 {offsets = [0, 26, 0], sizes = [2, 1, 32], strides = [1, 1, 1]} : vector<2x64x32xf32> to vector<2x1x32xf32>
    %183 = vector.shape_cast %182 : vector<2x1x32xf32> to vector<2x32xf32>
    %184 = arith.maximumf %181, %183 : vector<2x32xf32>
    %185 = vector.extract_strided_slice %5 {offsets = [0, 27, 0], sizes = [2, 1, 32], strides = [1, 1, 1]} : vector<2x64x32xf32> to vector<2x1x32xf32>
    %186 = vector.shape_cast %185 : vector<2x1x32xf32> to vector<2x32xf32>
    %187 = arith.maximumf %184, %186 : vector<2x32xf32>
    %188 = vector.extract_strided_slice %5 {offsets = [0, 33, 0], sizes = [2, 1, 32], strides = [1, 1, 1]} : vector<2x64x32xf32> to vector<2x1x32xf32>
    %189 = vector.shape_cast %188 : vector<2x1x32xf32> to vector<2x32xf32>
    %190 = arith.maximumf %187, %189 : vector<2x32xf32>
    %191 = vector.extract_strided_slice %5 {offsets = [0, 34, 0], sizes = [2, 1, 32], strides = [1, 1, 1]} : vector<2x64x32xf32> to vector<2x1x32xf32>
    %192 = vector.shape_cast %191 : vector<2x1x32xf32> to vector<2x32xf32>
    %193 = arith.maximumf %190, %192 : vector<2x32xf32>
    %194 = vector.extract_strided_slice %5 {offsets = [0, 35, 0], sizes = [2, 1, 32], strides = [1, 1, 1]} : vector<2x64x32xf32> to vector<2x1x32xf32>
    %195 = vector.shape_cast %194 : vector<2x1x32xf32> to vector<2x32xf32>
    %196 = arith.maximumf %193, %195 : vector<2x32xf32>
    %197 = vector.extract_strided_slice %5 {offsets = [0, 41, 0], sizes = [2, 1, 32], strides = [1, 1, 1]} : vector<2x64x32xf32> to vector<2x1x32xf32>
    %198 = vector.shape_cast %197 : vector<2x1x32xf32> to vector<2x32xf32>
    %199 = arith.maximumf %196, %198 : vector<2x32xf32>
    %200 = vector.extract_strided_slice %5 {offsets = [0, 42, 0], sizes = [2, 1, 32], strides = [1, 1, 1]} : vector<2x64x32xf32> to vector<2x1x32xf32>
    %201 = vector.shape_cast %200 : vector<2x1x32xf32> to vector<2x32xf32>
    %202 = arith.maximumf %199, %201 : vector<2x32xf32>
    %203 = vector.extract_strided_slice %5 {offsets = [0, 43, 0], sizes = [2, 1, 32], strides = [1, 1, 1]} : vector<2x64x32xf32> to vector<2x1x32xf32>
    %204 = vector.shape_cast %203 : vector<2x1x32xf32> to vector<2x32xf32>
    %205 = arith.maximumf %202, %204 : vector<2x32xf32>
    %206 = vector.extract_strided_slice %5 {offsets = [0, 27, 0], sizes = [2, 1, 32], strides = [1, 1, 1]} : vector<2x64x32xf32> to vector<2x1x32xf32>
    %207 = vector.shape_cast %206 : vector<2x1x32xf32> to vector<2x32xf32>
    %208 = vector.extract_strided_slice %5 {offsets = [0, 28, 0], sizes = [2, 1, 32], strides = [1, 1, 1]} : vector<2x64x32xf32> to vector<2x1x32xf32>
    %209 = vector.shape_cast %208 : vector<2x1x32xf32> to vector<2x32xf32>
    %210 = arith.maximumf %207, %209 : vector<2x32xf32>
    %211 = vector.extract_strided_slice %5 {offsets = [0, 29, 0], sizes = [2, 1, 32], strides = [1, 1, 1]} : vector<2x64x32xf32> to vector<2x1x32xf32>
    %212 = vector.shape_cast %211 : vector<2x1x32xf32> to vector<2x32xf32>
    %213 = arith.maximumf %210, %212 : vector<2x32xf32>
    %214 = vector.extract_strided_slice %5 {offsets = [0, 35, 0], sizes = [2, 1, 32], strides = [1, 1, 1]} : vector<2x64x32xf32> to vector<2x1x32xf32>
    %215 = vector.shape_cast %214 : vector<2x1x32xf32> to vector<2x32xf32>
    %216 = arith.maximumf %213, %215 : vector<2x32xf32>
    %217 = vector.extract_strided_slice %5 {offsets = [0, 36, 0], sizes = [2, 1, 32], strides = [1, 1, 1]} : vector<2x64x32xf32> to vector<2x1x32xf32>
    %218 = vector.shape_cast %217 : vector<2x1x32xf32> to vector<2x32xf32>
    %219 = arith.maximumf %216, %218 : vector<2x32xf32>
    %220 = vector.extract_strided_slice %5 {offsets = [0, 37, 0], sizes = [2, 1, 32], strides = [1, 1, 1]} : vector<2x64x32xf32> to vector<2x1x32xf32>
    %221 = vector.shape_cast %220 : vector<2x1x32xf32> to vector<2x32xf32>
    %222 = arith.maximumf %219, %221 : vector<2x32xf32>
    %223 = vector.extract_strided_slice %5 {offsets = [0, 43, 0], sizes = [2, 1, 32], strides = [1, 1, 1]} : vector<2x64x32xf32> to vector<2x1x32xf32>
    %224 = vector.shape_cast %223 : vector<2x1x32xf32> to vector<2x32xf32>
    %225 = arith.maximumf %222, %224 : vector<2x32xf32>
    %226 = vector.extract_strided_slice %5 {offsets = [0, 44, 0], sizes = [2, 1, 32], strides = [1, 1, 1]} : vector<2x64x32xf32> to vector<2x1x32xf32>
    %227 = vector.shape_cast %226 : vector<2x1x32xf32> to vector<2x32xf32>
    %228 = arith.maximumf %225, %227 : vector<2x32xf32>
    %229 = vector.extract_strided_slice %5 {offsets = [0, 45, 0], sizes = [2, 1, 32], strides = [1, 1, 1]} : vector<2x64x32xf32> to vector<2x1x32xf32>
    %230 = vector.shape_cast %229 : vector<2x1x32xf32> to vector<2x32xf32>
    %231 = arith.maximumf %228, %230 : vector<2x32xf32>
    %232 = vector.extract_strided_slice %5 {offsets = [0, 29, 0], sizes = [2, 1, 32], strides = [1, 1, 1]} : vector<2x64x32xf32> to vector<2x1x32xf32>
    %233 = vector.shape_cast %232 : vector<2x1x32xf32> to vector<2x32xf32>
    %234 = vector.extract_strided_slice %5 {offsets = [0, 30, 0], sizes = [2, 1, 32], strides = [1, 1, 1]} : vector<2x64x32xf32> to vector<2x1x32xf32>
    %235 = vector.shape_cast %234 : vector<2x1x32xf32> to vector<2x32xf32>
    %236 = arith.maximumf %233, %235 : vector<2x32xf32>
    %237 = vector.extract_strided_slice %5 {offsets = [0, 31, 0], sizes = [2, 1, 32], strides = [1, 1, 1]} : vector<2x64x32xf32> to vector<2x1x32xf32>
    %238 = vector.shape_cast %237 : vector<2x1x32xf32> to vector<2x32xf32>
    %239 = arith.maximumf %236, %238 : vector<2x32xf32>
    %240 = vector.extract_strided_slice %5 {offsets = [0, 37, 0], sizes = [2, 1, 32], strides = [1, 1, 1]} : vector<2x64x32xf32> to vector<2x1x32xf32>
    %241 = vector.shape_cast %240 : vector<2x1x32xf32> to vector<2x32xf32>
    %242 = arith.maximumf %239, %241 : vector<2x32xf32>
    %243 = vector.extract_strided_slice %5 {offsets = [0, 38, 0], sizes = [2, 1, 32], strides = [1, 1, 1]} : vector<2x64x32xf32> to vector<2x1x32xf32>
    %244 = vector.shape_cast %243 : vector<2x1x32xf32> to vector<2x32xf32>
    %245 = arith.maximumf %242, %244 : vector<2x32xf32>
    %246 = vector.extract_strided_slice %5 {offsets = [0, 39, 0], sizes = [2, 1, 32], strides = [1, 1, 1]} : vector<2x64x32xf32> to vector<2x1x32xf32>
    %247 = vector.shape_cast %246 : vector<2x1x32xf32> to vector<2x32xf32>
    %248 = arith.maximumf %245, %247 : vector<2x32xf32>
    %249 = vector.extract_strided_slice %5 {offsets = [0, 45, 0], sizes = [2, 1, 32], strides = [1, 1, 1]} : vector<2x64x32xf32> to vector<2x1x32xf32>
    %250 = vector.shape_cast %249 : vector<2x1x32xf32> to vector<2x32xf32>
    %251 = arith.maximumf %248, %250 : vector<2x32xf32>
    %252 = vector.extract_strided_slice %5 {offsets = [0, 46, 0], sizes = [2, 1, 32], strides = [1, 1, 1]} : vector<2x64x32xf32> to vector<2x1x32xf32>
    %253 = vector.shape_cast %252 : vector<2x1x32xf32> to vector<2x32xf32>
    %254 = arith.maximumf %251, %253 : vector<2x32xf32>
    %255 = vector.extract_strided_slice %5 {offsets = [0, 47, 0], sizes = [2, 1, 32], strides = [1, 1, 1]} : vector<2x64x32xf32> to vector<2x1x32xf32>
    %256 = vector.shape_cast %255 : vector<2x1x32xf32> to vector<2x32xf32>
    %257 = arith.maximumf %254, %256 : vector<2x32xf32>
    %258 = vector.extract_strided_slice %5 {offsets = [0, 40, 0], sizes = [2, 1, 32], strides = [1, 1, 1]} : vector<2x64x32xf32> to vector<2x1x32xf32>
    %259 = vector.shape_cast %258 : vector<2x1x32xf32> to vector<2x32xf32>
    %260 = vector.extract_strided_slice %5 {offsets = [0, 41, 0], sizes = [2, 1, 32], strides = [1, 1, 1]} : vector<2x64x32xf32> to vector<2x1x32xf32>
    %261 = vector.shape_cast %260 : vector<2x1x32xf32> to vector<2x32xf32>
    %262 = arith.maximumf %259, %261 : vector<2x32xf32>
    %263 = vector.extract_strided_slice %5 {offsets = [0, 48, 0], sizes = [2, 1, 32], strides = [1, 1, 1]} : vector<2x64x32xf32> to vector<2x1x32xf32>
    %264 = vector.shape_cast %263 : vector<2x1x32xf32> to vector<2x32xf32>
    %265 = arith.maximumf %262, %264 : vector<2x32xf32>
    %266 = vector.extract_strided_slice %5 {offsets = [0, 49, 0], sizes = [2, 1, 32], strides = [1, 1, 1]} : vector<2x64x32xf32> to vector<2x1x32xf32>
    %267 = vector.shape_cast %266 : vector<2x1x32xf32> to vector<2x32xf32>
    %268 = arith.maximumf %265, %267 : vector<2x32xf32>
    %269 = vector.extract_strided_slice %5 {offsets = [0, 56, 0], sizes = [2, 1, 32], strides = [1, 1, 1]} : vector<2x64x32xf32> to vector<2x1x32xf32>
    %270 = vector.shape_cast %269 : vector<2x1x32xf32> to vector<2x32xf32>
    %271 = arith.maximumf %268, %270 : vector<2x32xf32>
    %272 = vector.extract_strided_slice %5 {offsets = [0, 57, 0], sizes = [2, 1, 32], strides = [1, 1, 1]} : vector<2x64x32xf32> to vector<2x1x32xf32>
    %273 = vector.shape_cast %272 : vector<2x1x32xf32> to vector<2x32xf32>
    %274 = arith.maximumf %271, %273 : vector<2x32xf32>
    %275 = vector.extract_strided_slice %5 {offsets = [0, 41, 0], sizes = [2, 1, 32], strides = [1, 1, 1]} : vector<2x64x32xf32> to vector<2x1x32xf32>
    %276 = vector.shape_cast %275 : vector<2x1x32xf32> to vector<2x32xf32>
    %277 = vector.extract_strided_slice %5 {offsets = [0, 42, 0], sizes = [2, 1, 32], strides = [1, 1, 1]} : vector<2x64x32xf32> to vector<2x1x32xf32>
    %278 = vector.shape_cast %277 : vector<2x1x32xf32> to vector<2x32xf32>
    %279 = arith.maximumf %276, %278 : vector<2x32xf32>
    %280 = vector.extract_strided_slice %5 {offsets = [0, 43, 0], sizes = [2, 1, 32], strides = [1, 1, 1]} : vector<2x64x32xf32> to vector<2x1x32xf32>
    %281 = vector.shape_cast %280 : vector<2x1x32xf32> to vector<2x32xf32>
    %282 = arith.maximumf %279, %281 : vector<2x32xf32>
    %283 = vector.extract_strided_slice %5 {offsets = [0, 49, 0], sizes = [2, 1, 32], strides = [1, 1, 1]} : vector<2x64x32xf32> to vector<2x1x32xf32>
    %284 = vector.shape_cast %283 : vector<2x1x32xf32> to vector<2x32xf32>
    %285 = arith.maximumf %282, %284 : vector<2x32xf32>
    %286 = vector.extract_strided_slice %5 {offsets = [0, 50, 0], sizes = [2, 1, 32], strides = [1, 1, 1]} : vector<2x64x32xf32> to vector<2x1x32xf32>
    %287 = vector.shape_cast %286 : vector<2x1x32xf32> to vector<2x32xf32>
    %288 = arith.maximumf %285, %287 : vector<2x32xf32>
    %289 = vector.extract_strided_slice %5 {offsets = [0, 51, 0], sizes = [2, 1, 32], strides = [1, 1, 1]} : vector<2x64x32xf32> to vector<2x1x32xf32>
    %290 = vector.shape_cast %289 : vector<2x1x32xf32> to vector<2x32xf32>
    %291 = arith.maximumf %288, %290 : vector<2x32xf32>
    %292 = vector.extract_strided_slice %5 {offsets = [0, 57, 0], sizes = [2, 1, 32], strides = [1, 1, 1]} : vector<2x64x32xf32> to vector<2x1x32xf32>
    %293 = vector.shape_cast %292 : vector<2x1x32xf32> to vector<2x32xf32>
    %294 = arith.maximumf %291, %293 : vector<2x32xf32>
    %295 = vector.extract_strided_slice %5 {offsets = [0, 58, 0], sizes = [2, 1, 32], strides = [1, 1, 1]} : vector<2x64x32xf32> to vector<2x1x32xf32>
    %296 = vector.shape_cast %295 : vector<2x1x32xf32> to vector<2x32xf32>
    %297 = arith.maximumf %294, %296 : vector<2x32xf32>
    %298 = vector.extract_strided_slice %5 {offsets = [0, 59, 0], sizes = [2, 1, 32], strides = [1, 1, 1]} : vector<2x64x32xf32> to vector<2x1x32xf32>
    %299 = vector.shape_cast %298 : vector<2x1x32xf32> to vector<2x32xf32>
    %300 = arith.maximumf %297, %299 : vector<2x32xf32>
    %301 = vector.extract_strided_slice %5 {offsets = [0, 43, 0], sizes = [2, 1, 32], strides = [1, 1, 1]} : vector<2x64x32xf32> to vector<2x1x32xf32>
    %302 = vector.shape_cast %301 : vector<2x1x32xf32> to vector<2x32xf32>
    %303 = vector.extract_strided_slice %5 {offsets = [0, 44, 0], sizes = [2, 1, 32], strides = [1, 1, 1]} : vector<2x64x32xf32> to vector<2x1x32xf32>
    %304 = vector.shape_cast %303 : vector<2x1x32xf32> to vector<2x32xf32>
    %305 = arith.maximumf %302, %304 : vector<2x32xf32>
    %306 = vector.extract_strided_slice %5 {offsets = [0, 45, 0], sizes = [2, 1, 32], strides = [1, 1, 1]} : vector<2x64x32xf32> to vector<2x1x32xf32>
    %307 = vector.shape_cast %306 : vector<2x1x32xf32> to vector<2x32xf32>
    %308 = arith.maximumf %305, %307 : vector<2x32xf32>
    %309 = vector.extract_strided_slice %5 {offsets = [0, 51, 0], sizes = [2, 1, 32], strides = [1, 1, 1]} : vector<2x64x32xf32> to vector<2x1x32xf32>
    %310 = vector.shape_cast %309 : vector<2x1x32xf32> to vector<2x32xf32>
    %311 = arith.maximumf %308, %310 : vector<2x32xf32>
    %312 = vector.extract_strided_slice %5 {offsets = [0, 52, 0], sizes = [2, 1, 32], strides = [1, 1, 1]} : vector<2x64x32xf32> to vector<2x1x32xf32>
    %313 = vector.shape_cast %312 : vector<2x1x32xf32> to vector<2x32xf32>
    %314 = arith.maximumf %311, %313 : vector<2x32xf32>
    %315 = vector.extract_strided_slice %5 {offsets = [0, 53, 0], sizes = [2, 1, 32], strides = [1, 1, 1]} : vector<2x64x32xf32> to vector<2x1x32xf32>
    %316 = vector.shape_cast %315 : vector<2x1x32xf32> to vector<2x32xf32>
    %317 = arith.maximumf %314, %316 : vector<2x32xf32>
    %318 = vector.extract_strided_slice %5 {offsets = [0, 59, 0], sizes = [2, 1, 32], strides = [1, 1, 1]} : vector<2x64x32xf32> to vector<2x1x32xf32>
    %319 = vector.shape_cast %318 : vector<2x1x32xf32> to vector<2x32xf32>
    %320 = arith.maximumf %317, %319 : vector<2x32xf32>
    %321 = vector.extract_strided_slice %5 {offsets = [0, 60, 0], sizes = [2, 1, 32], strides = [1, 1, 1]} : vector<2x64x32xf32> to vector<2x1x32xf32>
    %322 = vector.shape_cast %321 : vector<2x1x32xf32> to vector<2x32xf32>
    %323 = arith.maximumf %320, %322 : vector<2x32xf32>
    %324 = vector.extract_strided_slice %5 {offsets = [0, 61, 0], sizes = [2, 1, 32], strides = [1, 1, 1]} : vector<2x64x32xf32> to vector<2x1x32xf32>
    %325 = vector.shape_cast %324 : vector<2x1x32xf32> to vector<2x32xf32>
    %326 = arith.maximumf %323, %325 : vector<2x32xf32>
    %327 = vector.extract_strided_slice %5 {offsets = [0, 45, 0], sizes = [2, 1, 32], strides = [1, 1, 1]} : vector<2x64x32xf32> to vector<2x1x32xf32>
    %328 = vector.shape_cast %327 : vector<2x1x32xf32> to vector<2x32xf32>
    %329 = vector.extract_strided_slice %5 {offsets = [0, 46, 0], sizes = [2, 1, 32], strides = [1, 1, 1]} : vector<2x64x32xf32> to vector<2x1x32xf32>
    %330 = vector.shape_cast %329 : vector<2x1x32xf32> to vector<2x32xf32>
    %331 = arith.maximumf %328, %330 : vector<2x32xf32>
    %332 = vector.extract_strided_slice %5 {offsets = [0, 47, 0], sizes = [2, 1, 32], strides = [1, 1, 1]} : vector<2x64x32xf32> to vector<2x1x32xf32>
    %333 = vector.shape_cast %332 : vector<2x1x32xf32> to vector<2x32xf32>
    %334 = arith.maximumf %331, %333 : vector<2x32xf32>
    %335 = vector.extract_strided_slice %5 {offsets = [0, 53, 0], sizes = [2, 1, 32], strides = [1, 1, 1]} : vector<2x64x32xf32> to vector<2x1x32xf32>
    %336 = vector.shape_cast %335 : vector<2x1x32xf32> to vector<2x32xf32>
    %337 = arith.maximumf %334, %336 : vector<2x32xf32>
    %338 = vector.extract_strided_slice %5 {offsets = [0, 54, 0], sizes = [2, 1, 32], strides = [1, 1, 1]} : vector<2x64x32xf32> to vector<2x1x32xf32>
    %339 = vector.shape_cast %338 : vector<2x1x32xf32> to vector<2x32xf32>
    %340 = arith.maximumf %337, %339 : vector<2x32xf32>
    %341 = vector.extract_strided_slice %5 {offsets = [0, 55, 0], sizes = [2, 1, 32], strides = [1, 1, 1]} : vector<2x64x32xf32> to vector<2x1x32xf32>
    %342 = vector.shape_cast %341 : vector<2x1x32xf32> to vector<2x32xf32>
    %343 = arith.maximumf %340, %342 : vector<2x32xf32>
    %344 = vector.extract_strided_slice %5 {offsets = [0, 61, 0], sizes = [2, 1, 32], strides = [1, 1, 1]} : vector<2x64x32xf32> to vector<2x1x32xf32>
    %345 = vector.shape_cast %344 : vector<2x1x32xf32> to vector<2x32xf32>
    %346 = arith.maximumf %343, %345 : vector<2x32xf32>
    %347 = vector.extract_strided_slice %5 {offsets = [0, 62, 0], sizes = [2, 1, 32], strides = [1, 1, 1]} : vector<2x64x32xf32> to vector<2x1x32xf32>
    %348 = vector.shape_cast %347 : vector<2x1x32xf32> to vector<2x32xf32>
    %349 = arith.maximumf %346, %348 : vector<2x32xf32>
    %350 = vector.extract_strided_slice %5 {offsets = [0, 63, 0], sizes = [2, 1, 32], strides = [1, 1, 1]} : vector<2x64x32xf32> to vector<2x1x32xf32>
    %351 = vector.shape_cast %350 : vector<2x1x32xf32> to vector<2x32xf32>
    %352 = arith.maximumf %349, %351 : vector<2x32xf32>
    %353 = vector.shape_cast %16 : vector<2x32xf32> to vector<2x1x32xf32>
    %354 = vector.shape_cast %33 : vector<2x32xf32> to vector<2x1x32xf32>
    %355 = vector.shape_cast %50 : vector<2x32xf32> to vector<2x1x32xf32>
    %356 = vector.shape_cast %67 : vector<2x32xf32> to vector<2x1x32xf32>
    %357 = vector.shape_cast %84 : vector<2x32xf32> to vector<2x1x32xf32>
    %358 = vector.shape_cast %110 : vector<2x32xf32> to vector<2x1x32xf32>
    %359 = vector.shape_cast %136 : vector<2x32xf32> to vector<2x1x32xf32>
    %360 = vector.shape_cast %162 : vector<2x32xf32> to vector<2x1x32xf32>
    %361 = vector.shape_cast %179 : vector<2x32xf32> to vector<2x1x32xf32>
    %362 = vector.shape_cast %205 : vector<2x32xf32> to vector<2x1x32xf32>
    %363 = vector.shape_cast %231 : vector<2x32xf32> to vector<2x1x32xf32>
    %364 = vector.shape_cast %257 : vector<2x32xf32> to vector<2x1x32xf32>
    %365 = vector.shape_cast %274 : vector<2x32xf32> to vector<2x1x32xf32>
    %366 = vector.shape_cast %300 : vector<2x32xf32> to vector<2x1x32xf32>
    %367 = vector.shape_cast %326 : vector<2x32xf32> to vector<2x1x32xf32>
    %368 = vector.shape_cast %352 : vector<2x32xf32> to vector<2x1x32xf32>
    %369 = tpu.concatenate %353, %354, %355, %356, %357, %358, %359, %360, %361, %362, %363, %364, %365, %366, %367, %368 in 1 : vector<2x1x32xf32>, vector<2x1x32xf32>, vector<2x1x32xf32>, vector<2x1x32xf32>, vector<2x1x32xf32>, vector<2x1x32xf32>, vector<2x1x32xf32>, vector<2x1x32xf32>, vector<2x1x32xf32>, vector<2x1x32xf32>, vector<2x1x32xf32>, vector<2x1x32xf32>, vector<2x1x32xf32>, vector<2x1x32xf32>, vector<2x1x32xf32>, vector<2x1x32xf32> -> vector<2x16x32xf32>
    %c0_4 = arith.constant 0 : index
    %c0_5 = arith.constant 0 : index
    %370 = vector.load %arg3[%c0_4, %c0_5] : memref<16x32xf32, #tpu.memory_space<vmem>>, vector<16x32xf32>
    %371 = vector.shape_cast %370 : vector<16x32xf32> to vector<1x16x32xf32>
    %372 = vector.broadcast %371 : vector<1x16x32xf32> to vector<2x16x32xf32>
    %373 = arith.addf %369, %372 : vector<2x16x32xf32>
    %374 = vector.shape_cast %373 : vector<2x16x32xf32> to vector<32x32xf32>
    %c0_6 = arith.constant 0 : index
    %c0_7 = arith.constant 0 : index
    %c0_8 = arith.constant 0 : index
    %375 = vector.load %arg4[%c0_6, %c0_7, %c0_8] : memref<2x1x32xf32, #tpu.memory_space<vmem>>, vector<1x1x32xf32>
    %376 = vector.shape_cast %375 : vector<1x1x32xf32> to vector<1x32xf32>
    %c0_9 = arith.constant 0 : index
    %c0_10 = arith.constant 0 : index
    %c0_11 = arith.constant 0 : index
    %377 = vector.load %arg5[%c0_9, %c0_10, %c0_11] : memref<2x1x32xf32, #tpu.memory_space<vmem>>, vector<1x1x32xf32>
    %378 = vector.shape_cast %377 : vector<1x1x32xf32> to vector<1x32xf32>
    %cst_12 = arith.constant dense<0.000000e+00> : vector<32xf32>
    %379 = vector.multi_reduction <add>, %374, %cst_12 [1] : vector<32x32xf32> to vector<32xf32>
    %380 = vector.shape_cast %379 : vector<32xf32> to vector<32x1xf32>
    %cst_13 = arith.constant 3.200000e+01 : f32
    %381 = vector.broadcast %cst_13 : f32 to vector<32x1xf32>
    %382 = arith.divf %380, %381 : vector<32x1xf32>
    %383 = vector.broadcast %382 : vector<32x1xf32> to vector<32x32xf32>
    %384 = arith.subf %374, %383 : vector<32x32xf32>
    %385 = arith.mulf %384, %384 : vector<32x32xf32>
    %cst_14 = arith.constant dense<0.000000e+00> : vector<32xf32>
    %386 = vector.multi_reduction <add>, %385, %cst_14 [1] : vector<32x32xf32> to vector<32xf32>
    %387 = vector.shape_cast %386 : vector<32xf32> to vector<32x1xf32>
    %cst_15 = arith.constant 3.200000e+01 : f32
    %388 = vector.broadcast %cst_15 : f32 to vector<32x1xf32>
    %389 = arith.divf %387, %388 : vector<32x1xf32>
    %390 = vector.broadcast %382 : vector<32x1xf32> to vector<32x32xf32>
    %391 = arith.subf %374, %390 : vector<32x32xf32>
    %cst_16 = arith.constant 9.99999974E-6 : f32
    %392 = vector.broadcast %cst_16 : f32 to vector<32x1xf32>
    %393 = arith.addf %389, %392 : vector<32x1xf32>
    %394 = math.rsqrt %393 : vector<32x1xf32>
    %395 = vector.broadcast %394 : vector<32x1xf32> to vector<32x32xf32>
    %396 = arith.mulf %391, %395 : vector<32x32xf32>
    %397 = vector.broadcast %376 : vector<1x32xf32> to vector<32x32xf32>
    %398 = arith.mulf %396, %397 : vector<32x32xf32>
    %399 = vector.broadcast %378 : vector<1x32xf32> to vector<32x32xf32>
    %400 = arith.addf %398, %399 : vector<32x32xf32>
    %401 = arith.truncf %400 : vector<32x32xf32> to vector<32x32xbf16>
    %c0_17 = arith.constant 0 : index
    %c0_18 = arith.constant 0 : index
    %c0_19 = arith.constant 0 : index
    %402 = vector.load %arg6[%c0_17, %c0_18, %c0_19] : memref<2x32x96xbf16, #tpu.memory_space<vmem>>, vector<1x32x96xbf16>
    %403 = vector.shape_cast %402 : vector<1x32x96xbf16> to vector<32x96xbf16>
    %cst_20 = arith.constant dense<0.000000e+00> : vector<32x96xf32>
    %404 = tpu.matmul %401, %403, %cst_20 {dimension_numbers = #tpu.dot_dimension_numbers<[1], [0], [0], [1], [0, 0, 1, 1], [], []>} : vector<32x32xbf16>, vector<32x96xbf16>, vector<32x96xf32> -> vector<32x96xf32>
    %405 = vector.extract_strided_slice %404 {offsets = [0, 0], sizes = [32, 8], strides = [1, 1]} : vector<32x96xf32> to vector<32x8xf32>
    %406 = arith.truncf %405 : vector<32x8xf32> to vector<32x8xbf16>
    %407 = vector.shape_cast %406 : vector<32x8xbf16> to vector<2x16x8xbf16>
    %408 = vector.extract_strided_slice %404 {offsets = [0, 32], sizes = [32, 8], strides = [1, 1]} : vector<32x96xf32> to vector<32x8xf32>
    %409 = arith.truncf %408 : vector<32x8xf32> to vector<32x8xbf16>
    %410 = vector.shape_cast %409 : vector<32x8xbf16> to vector<2x16x8xbf16>
    %411 = vector.extract_strided_slice %404 {offsets = [0, 64], sizes = [32, 8], strides = [1, 1]} : vector<32x96xf32> to vector<32x8xf32>
    %412 = arith.truncf %411 : vector<32x8xf32> to vector<32x8xbf16>
    %413 = vector.shape_cast %412 : vector<32x8xbf16> to vector<2x16x8xbf16>
    "tpu.trace_start"() <{level = 10 : i32, message = "bik,bjk->bij"}> : () -> ()
    %cst_21 = arith.constant dense<0.000000e+00> : vector<2x16x16xf32>
    %414 = tpu.matmul %407, %410, %cst_21 {dimension_numbers = #tpu.dot_dimension_numbers<[2], [2], [1], [1], [0, 0, 0, 1, 1, 1], [0], [0]>} : vector<2x16x8xbf16>, vector<2x16x8xbf16>, vector<2x16x16xf32> -> vector<2x16x16xf32>
    "tpu.trace_stop"() : () -> ()
    %cst_22 = arith.constant dense<0xFF800000> : vector<2x16xf32>
    %415 = vector.multi_reduction <maximumf>, %414, %cst_22 [2] : vector<2x16x16xf32> to vector<2x16xf32>
    %416 = vector.shape_cast %415 : vector<2x16xf32> to vector<2x16x1xf32>
    %417 = vector.broadcast %416 : vector<2x16x1xf32> to vector<2x16x16xf32>
    %418 = arith.subf %414, %417 : vector<2x16x16xf32>
    %419 = math.exp %418 : vector<2x16x16xf32>
    %cst_23 = arith.constant dense<0.000000e+00> : vector<2x16xf32>
    %420 = vector.multi_reduction <add>, %419, %cst_23 [2] : vector<2x16x16xf32> to vector<2x16xf32>
    %421 = vector.shape_cast %420 : vector<2x16xf32> to vector<2x16x1xf32>
    %422 = vector.broadcast %421 : vector<2x16x1xf32> to vector<2x16x16xf32>
    %423 = arith.divf %419, %422 : vector<2x16x16xf32>
    %424 = arith.truncf %423 : vector<2x16x16xf32> to vector<2x16x16xbf16>
    "tpu.trace_start"() <{level = 10 : i32, message = "bij,bjk->bik"}> : () -> ()
    %cst_24 = arith.constant dense<0.000000e+00> : vector<2x16x8xf32>
    %425 = tpu.matmul %424, %413, %cst_24 {dimension_numbers = #tpu.dot_dimension_numbers<[2], [1], [1], [2], [0, 0, 0, 1, 1, 2], [0], [0]>} : vector<2x16x16xbf16>, vector<2x16x8xbf16>, vector<2x16x8xf32> -> vector<2x16x8xf32>
    "tpu.trace_stop"() : () -> ()
    %426 = vector.extract_strided_slice %404 {offsets = [0, 8], sizes = [32, 8], strides = [1, 1]} : vector<32x96xf32> to vector<32x8xf32>
    %427 = arith.truncf %426 : vector<32x8xf32> to vector<32x8xbf16>
    %428 = vector.shape_cast %427 : vector<32x8xbf16> to vector<2x16x8xbf16>
    %429 = vector.extract_strided_slice %404 {offsets = [0, 40], sizes = [32, 8], strides = [1, 1]} : vector<32x96xf32> to vector<32x8xf32>
    %430 = arith.truncf %429 : vector<32x8xf32> to vector<32x8xbf16>
    %431 = vector.shape_cast %430 : vector<32x8xbf16> to vector<2x16x8xbf16>
    %432 = vector.extract_strided_slice %404 {offsets = [0, 72], sizes = [32, 8], strides = [1, 1]} : vector<32x96xf32> to vector<32x8xf32>
    %433 = arith.truncf %432 : vector<32x8xf32> to vector<32x8xbf16>
    %434 = vector.shape_cast %433 : vector<32x8xbf16> to vector<2x16x8xbf16>
    "tpu.trace_start"() <{level = 10 : i32, message = "bik,bjk->bij"}> : () -> ()
    %cst_25 = arith.constant dense<0.000000e+00> : vector<2x16x16xf32>
    %435 = tpu.matmul %428, %431, %cst_25 {dimension_numbers = #tpu.dot_dimension_numbers<[2], [2], [1], [1], [0, 0, 0, 1, 1, 1], [0], [0]>} : vector<2x16x8xbf16>, vector<2x16x8xbf16>, vector<2x16x16xf32> -> vector<2x16x16xf32>
    "tpu.trace_stop"() : () -> ()
    %cst_26 = arith.constant dense<0xFF800000> : vector<2x16xf32>
    %436 = vector.multi_reduction <maximumf>, %435, %cst_26 [2] : vector<2x16x16xf32> to vector<2x16xf32>
    %437 = vector.shape_cast %436 : vector<2x16xf32> to vector<2x16x1xf32>
    %438 = vector.broadcast %437 : vector<2x16x1xf32> to vector<2x16x16xf32>
    %439 = arith.subf %435, %438 : vector<2x16x16xf32>
    %440 = math.exp %439 : vector<2x16x16xf32>
    %cst_27 = arith.constant dense<0.000000e+00> : vector<2x16xf32>
    %441 = vector.multi_reduction <add>, %440, %cst_27 [2] : vector<2x16x16xf32> to vector<2x16xf32>
    %442 = vector.shape_cast %441 : vector<2x16xf32> to vector<2x16x1xf32>
    %443 = vector.broadcast %442 : vector<2x16x1xf32> to vector<2x16x16xf32>
    %444 = arith.divf %440, %443 : vector<2x16x16xf32>
    %445 = arith.truncf %444 : vector<2x16x16xf32> to vector<2x16x16xbf16>
    "tpu.trace_start"() <{level = 10 : i32, message = "bij,bjk->bik"}> : () -> ()
    %cst_28 = arith.constant dense<0.000000e+00> : vector<2x16x8xf32>
    %446 = tpu.matmul %445, %434, %cst_28 {dimension_numbers = #tpu.dot_dimension_numbers<[2], [1], [1], [2], [0, 0, 0, 1, 1, 2], [0], [0]>} : vector<2x16x16xbf16>, vector<2x16x8xbf16>, vector<2x16x8xf32> -> vector<2x16x8xf32>
    "tpu.trace_stop"() : () -> ()
    %447 = vector.extract_strided_slice %404 {offsets = [0, 16], sizes = [32, 8], strides = [1, 1]} : vector<32x96xf32> to vector<32x8xf32>
    %448 = arith.truncf %447 : vector<32x8xf32> to vector<32x8xbf16>
    %449 = vector.shape_cast %448 : vector<32x8xbf16> to vector<2x16x8xbf16>
    %450 = vector.extract_strided_slice %404 {offsets = [0, 48], sizes = [32, 8], strides = [1, 1]} : vector<32x96xf32> to vector<32x8xf32>
    %451 = arith.truncf %450 : vector<32x8xf32> to vector<32x8xbf16>
    %452 = vector.shape_cast %451 : vector<32x8xbf16> to vector<2x16x8xbf16>
    %453 = vector.extract_strided_slice %404 {offsets = [0, 80], sizes = [32, 8], strides = [1, 1]} : vector<32x96xf32> to vector<32x8xf32>
    %454 = arith.truncf %453 : vector<32x8xf32> to vector<32x8xbf16>
    %455 = vector.shape_cast %454 : vector<32x8xbf16> to vector<2x16x8xbf16>
    "tpu.trace_start"() <{level = 10 : i32, message = "bik,bjk->bij"}> : () -> ()
    %cst_29 = arith.constant dense<0.000000e+00> : vector<2x16x16xf32>
    %456 = tpu.matmul %449, %452, %cst_29 {dimension_numbers = #tpu.dot_dimension_numbers<[2], [2], [1], [1], [0, 0, 0, 1, 1, 1], [0], [0]>} : vector<2x16x8xbf16>, vector<2x16x8xbf16>, vector<2x16x16xf32> -> vector<2x16x16xf32>
    "tpu.trace_stop"() : () -> ()
    %cst_30 = arith.constant dense<0xFF800000> : vector<2x16xf32>
    %457 = vector.multi_reduction <maximumf>, %456, %cst_30 [2] : vector<2x16x16xf32> to vector<2x16xf32>
    %458 = vector.shape_cast %457 : vector<2x16xf32> to vector<2x16x1xf32>
    %459 = vector.broadcast %458 : vector<2x16x1xf32> to vector<2x16x16xf32>
    %460 = arith.subf %456, %459 : vector<2x16x16xf32>
    %461 = math.exp %460 : vector<2x16x16xf32>
    %cst_31 = arith.constant dense<0.000000e+00> : vector<2x16xf32>
    %462 = vector.multi_reduction <add>, %461, %cst_31 [2] : vector<2x16x16xf32> to vector<2x16xf32>
    %463 = vector.shape_cast %462 : vector<2x16xf32> to vector<2x16x1xf32>
    %464 = vector.broadcast %463 : vector<2x16x1xf32> to vector<2x16x16xf32>
    %465 = arith.divf %461, %464 : vector<2x16x16xf32>
    %466 = arith.truncf %465 : vector<2x16x16xf32> to vector<2x16x16xbf16>
    "tpu.trace_start"() <{level = 10 : i32, message = "bij,bjk->bik"}> : () -> ()
    %cst_32 = arith.constant dense<0.000000e+00> : vector<2x16x8xf32>
    %467 = tpu.matmul %466, %455, %cst_32 {dimension_numbers = #tpu.dot_dimension_numbers<[2], [1], [1], [2], [0, 0, 0, 1, 1, 2], [0], [0]>} : vector<2x16x16xbf16>, vector<2x16x8xbf16>, vector<2x16x8xf32> -> vector<2x16x8xf32>
    "tpu.trace_stop"() : () -> ()
    %468 = vector.extract_strided_slice %404 {offsets = [0, 24], sizes = [32, 8], strides = [1, 1]} : vector<32x96xf32> to vector<32x8xf32>
    %469 = arith.truncf %468 : vector<32x8xf32> to vector<32x8xbf16>
    %470 = vector.shape_cast %469 : vector<32x8xbf16> to vector<2x16x8xbf16>
    %471 = vector.extract_strided_slice %404 {offsets = [0, 56], sizes = [32, 8], strides = [1, 1]} : vector<32x96xf32> to vector<32x8xf32>
    %472 = arith.truncf %471 : vector<32x8xf32> to vector<32x8xbf16>
    %473 = vector.shape_cast %472 : vector<32x8xbf16> to vector<2x16x8xbf16>
    %474 = vector.extract_strided_slice %404 {offsets = [0, 88], sizes = [32, 8], strides = [1, 1]} : vector<32x96xf32> to vector<32x8xf32>
    %475 = arith.truncf %474 : vector<32x8xf32> to vector<32x8xbf16>
    %476 = vector.shape_cast %475 : vector<32x8xbf16> to vector<2x16x8xbf16>
    "tpu.trace_start"() <{level = 10 : i32, message = "bik,bjk->bij"}> : () -> ()
    %cst_33 = arith.constant dense<0.000000e+00> : vector<2x16x16xf32>
    %477 = tpu.matmul %470, %473, %cst_33 {dimension_numbers = #tpu.dot_dimension_numbers<[2], [2], [1], [1], [0, 0, 0, 1, 1, 1], [0], [0]>} : vector<2x16x8xbf16>, vector<2x16x8xbf16>, vector<2x16x16xf32> -> vector<2x16x16xf32>
    "tpu.trace_stop"() : () -> ()
    %cst_34 = arith.constant dense<0xFF800000> : vector<2x16xf32>
    %478 = vector.multi_reduction <maximumf>, %477, %cst_34 [2] : vector<2x16x16xf32> to vector<2x16xf32>
    %479 = vector.shape_cast %478 : vector<2x16xf32> to vector<2x16x1xf32>
    %480 = vector.broadcast %479 : vector<2x16x1xf32> to vector<2x16x16xf32>
    %481 = arith.subf %477, %480 : vector<2x16x16xf32>
    %482 = math.exp %481 : vector<2x16x16xf32>
    %cst_35 = arith.constant dense<0.000000e+00> : vector<2x16xf32>
    %483 = vector.multi_reduction <add>, %482, %cst_35 [2] : vector<2x16x16xf32> to vector<2x16xf32>
    %484 = vector.shape_cast %483 : vector<2x16xf32> to vector<2x16x1xf32>
    %485 = vector.broadcast %484 : vector<2x16x1xf32> to vector<2x16x16xf32>
    %486 = arith.divf %482, %485 : vector<2x16x16xf32>
    %487 = arith.truncf %486 : vector<2x16x16xf32> to vector<2x16x16xbf16>
    "tpu.trace_start"() <{level = 10 : i32, message = "bij,bjk->bik"}> : () -> ()
    %cst_36 = arith.constant dense<0.000000e+00> : vector<2x16x8xf32>
    %488 = tpu.matmul %487, %476, %cst_36 {dimension_numbers = #tpu.dot_dimension_numbers<[2], [1], [1], [2], [0, 0, 0, 1, 1, 2], [0], [0]>} : vector<2x16x16xbf16>, vector<2x16x8xbf16>, vector<2x16x8xf32> -> vector<2x16x8xf32>
    "tpu.trace_stop"() : () -> ()
    %489 = tpu.concatenate %425, %446, %467, %488 in 2 : vector<2x16x8xf32>, vector<2x16x8xf32>, vector<2x16x8xf32>, vector<2x16x8xf32> -> vector<2x16x32xf32>
    %490 = vector.shape_cast %489 : vector<2x16x32xf32> to vector<32x32xf32>
    %491 = arith.truncf %490 : vector<32x32xf32> to vector<32x32xbf16>
    %c0_37 = arith.constant 0 : index
    %c0_38 = arith.constant 0 : index
    %c0_39 = arith.constant 0 : index
    %492 = vector.load %arg7[%c0_37, %c0_38, %c0_39] : memref<2x32x32xbf16, #tpu.memory_space<vmem>>, vector<1x32x32xbf16>
    %493 = vector.shape_cast %492 : vector<1x32x32xbf16> to vector<32x32xbf16>
    %cst_40 = arith.constant dense<0.000000e+00> : vector<32x32xf32>
    %494 = tpu.matmul %491, %493, %cst_40 {dimension_numbers = #tpu.dot_dimension_numbers<[1], [0], [0], [1], [0, 0, 1, 1], [], []>} : vector<32x32xbf16>, vector<32x32xbf16>, vector<32x32xf32> -> vector<32x32xf32>
    %495 = arith.addf %374, %494 : vector<32x32xf32>
    %c0_41 = arith.constant 0 : index
    %c0_42 = arith.constant 0 : index
    %c0_43 = arith.constant 0 : index
    %496 = vector.load %arg8[%c0_41, %c0_42, %c0_43] : memref<2x1x32xf32, #tpu.memory_space<vmem>>, vector<1x1x32xf32>
    %497 = vector.shape_cast %496 : vector<1x1x32xf32> to vector<1x32xf32>
    %498 = vector.broadcast %497 : vector<1x32xf32> to vector<32x32xf32>
    %499 = arith.addf %495, %498 : vector<32x32xf32>
    %c0_44 = arith.constant 0 : index
    %c0_45 = arith.constant 0 : index
    %c0_46 = arith.constant 0 : index
    %500 = vector.load %arg9[%c0_44, %c0_45, %c0_46] : memref<2x1x32xf32, #tpu.memory_space<vmem>>, vector<1x1x32xf32>
    %501 = vector.shape_cast %500 : vector<1x1x32xf32> to vector<1x32xf32>
    %c0_47 = arith.constant 0 : index
    %c0_48 = arith.constant 0 : index
    %c0_49 = arith.constant 0 : index
    %502 = vector.load %arg10[%c0_47, %c0_48, %c0_49] : memref<2x1x32xf32, #tpu.memory_space<vmem>>, vector<1x1x32xf32>
    %503 = vector.shape_cast %502 : vector<1x1x32xf32> to vector<1x32xf32>
    %cst_50 = arith.constant dense<0.000000e+00> : vector<32xf32>
    %504 = vector.multi_reduction <add>, %499, %cst_50 [1] : vector<32x32xf32> to vector<32xf32>
    %505 = vector.shape_cast %504 : vector<32xf32> to vector<32x1xf32>
    %cst_51 = arith.constant 3.200000e+01 : f32
    %506 = vector.broadcast %cst_51 : f32 to vector<32x1xf32>
    %507 = arith.divf %505, %506 : vector<32x1xf32>
    %508 = vector.broadcast %507 : vector<32x1xf32> to vector<32x32xf32>
    %509 = arith.subf %499, %508 : vector<32x32xf32>
    %510 = arith.mulf %509, %509 : vector<32x32xf32>
    %cst_52 = arith.constant dense<0.000000e+00> : vector<32xf32>
    %511 = vector.multi_reduction <add>, %510, %cst_52 [1] : vector<32x32xf32> to vector<32xf32>
    %512 = vector.shape_cast %511 : vector<32xf32> to vector<32x1xf32>
    %cst_53 = arith.constant 3.200000e+01 : f32
    %513 = vector.broadcast %cst_53 : f32 to vector<32x1xf32>
    %514 = arith.divf %512, %513 : vector<32x1xf32>
    %515 = vector.broadcast %507 : vector<32x1xf32> to vector<32x32xf32>
    %516 = arith.subf %499, %515 : vector<32x32xf32>
    %cst_54 = arith.constant 9.99999974E-6 : f32
    %517 = vector.broadcast %cst_54 : f32 to vector<32x1xf32>
    %518 = arith.addf %514, %517 : vector<32x1xf32>
    %519 = math.rsqrt %518 : vector<32x1xf32>
    %520 = vector.broadcast %519 : vector<32x1xf32> to vector<32x32xf32>
    %521 = arith.mulf %516, %520 : vector<32x32xf32>
    %522 = vector.broadcast %501 : vector<1x32xf32> to vector<32x32xf32>
    %523 = arith.mulf %521, %522 : vector<32x32xf32>
    %524 = vector.broadcast %503 : vector<1x32xf32> to vector<32x32xf32>
    %525 = arith.addf %523, %524 : vector<32x32xf32>
    %526 = arith.truncf %525 : vector<32x32xf32> to vector<32x32xbf16>
    %c0_55 = arith.constant 0 : index
    %c0_56 = arith.constant 0 : index
    %c0_57 = arith.constant 0 : index
    %527 = vector.load %arg11[%c0_55, %c0_56, %c0_57] : memref<2x32x128xbf16, #tpu.memory_space<vmem>>, vector<1x32x128xbf16>
    %528 = vector.shape_cast %527 : vector<1x32x128xbf16> to vector<32x128xbf16>
    %cst_58 = arith.constant dense<0.000000e+00> : vector<32x128xf32>
    %529 = tpu.matmul %526, %528, %cst_58 {dimension_numbers = #tpu.dot_dimension_numbers<[1], [0], [0], [1], [0, 0, 1, 1], [], []>} : vector<32x32xbf16>, vector<32x128xbf16>, vector<32x128xf32> -> vector<32x128xf32>
    %c0_59 = arith.constant 0 : index
    %c0_60 = arith.constant 0 : index
    %c0_61 = arith.constant 0 : index
    %530 = vector.load %arg12[%c0_59, %c0_60, %c0_61] : memref<2x1x128xf32, #tpu.memory_space<vmem>>, vector<1x1x128xf32>
    %531 = vector.shape_cast %530 : vector<1x1x128xf32> to vector<1x128xf32>
    %532 = vector.broadcast %531 : vector<1x128xf32> to vector<32x128xf32>
    %533 = arith.addf %529, %532 : vector<32x128xf32>
    %cst_62 = arith.constant 5.000000e-01 : f32
    %534 = vector.broadcast %cst_62 : f32 to vector<32x128xf32>
    %535 = arith.mulf %534, %533 : vector<32x128xf32>
    %cst_63 = arith.constant 4.471500e-02 : f32
    %536 = vector.broadcast %cst_63 : f32 to vector<32x128xf32>
    %537 = arith.mulf %536, %533 : vector<32x128xf32>
    %538 = arith.mulf %537, %533 : vector<32x128xf32>
    %539 = arith.mulf %538, %533 : vector<32x128xf32>
    %540 = arith.addf %533, %539 : vector<32x128xf32>
    %cst_64 = arith.constant 0.797884583 : f32
    %541 = vector.broadcast %cst_64 : f32 to vector<32x128xf32>
    %542 = arith.mulf %541, %540 : vector<32x128xf32>
    %543 = math.tanh %542 : vector<32x128xf32>
    %cst_65 = arith.constant 1.000000e+00 : f32
    %544 = vector.broadcast %cst_65 : f32 to vector<32x128xf32>
    %545 = arith.addf %544, %543 : vector<32x128xf32>
    %546 = arith.mulf %535, %545 : vector<32x128xf32>
    %547 = arith.truncf %546 : vector<32x128xf32> to vector<32x128xbf16>
    %c0_66 = arith.constant 0 : index
    %c0_67 = arith.constant 0 : index
    %c0_68 = arith.constant 0 : index
    %548 = vector.load %arg13[%c0_66, %c0_67, %c0_68] : memref<2x128x32xbf16, #tpu.memory_space<vmem>>, vector<1x128x32xbf16>
    %549 = vector.shape_cast %548 : vector<1x128x32xbf16> to vector<128x32xbf16>
    %cst_69 = arith.constant dense<0.000000e+00> : vector<32x32xf32>
    %550 = tpu.matmul %547, %549, %cst_69 {dimension_numbers = #tpu.dot_dimension_numbers<[1], [0], [0], [1], [0, 0, 1, 1], [], []>} : vector<32x128xbf16>, vector<128x32xbf16>, vector<32x32xf32> -> vector<32x32xf32>
    %c0_70 = arith.constant 0 : index
    %c0_71 = arith.constant 0 : index
    %c0_72 = arith.constant 0 : index
    %551 = vector.load %arg14[%c0_70, %c0_71, %c0_72] : memref<2x1x32xf32, #tpu.memory_space<vmem>>, vector<1x1x32xf32>
    %552 = vector.shape_cast %551 : vector<1x1x32xf32> to vector<1x32xf32>
    %553 = vector.broadcast %552 : vector<1x32xf32> to vector<32x32xf32>
    %554 = arith.addf %550, %553 : vector<32x32xf32>
    %555 = arith.addf %525, %554 : vector<32x32xf32>
    %c1 = arith.constant 1 : index
    %c0_73 = arith.constant 0 : index
    %c0_74 = arith.constant 0 : index
    %556 = vector.load %arg4[%c1, %c0_73, %c0_74] : memref<2x1x32xf32, #tpu.memory_space<vmem>>, vector<1x1x32xf32>
    %557 = vector.shape_cast %556 : vector<1x1x32xf32> to vector<1x32xf32>
    %c1_75 = arith.constant 1 : index
    %c0_76 = arith.constant 0 : index
    %c0_77 = arith.constant 0 : index
    %558 = vector.load %arg5[%c1_75, %c0_76, %c0_77] : memref<2x1x32xf32, #tpu.memory_space<vmem>>, vector<1x1x32xf32>
    %559 = vector.shape_cast %558 : vector<1x1x32xf32> to vector<1x32xf32>
    %cst_78 = arith.constant dense<0.000000e+00> : vector<32xf32>
    %560 = vector.multi_reduction <add>, %555, %cst_78 [1] : vector<32x32xf32> to vector<32xf32>
    %561 = vector.shape_cast %560 : vector<32xf32> to vector<32x1xf32>
    %cst_79 = arith.constant 3.200000e+01 : f32
    %562 = vector.broadcast %cst_79 : f32 to vector<32x1xf32>
    %563 = arith.divf %561, %562 : vector<32x1xf32>
    %564 = vector.broadcast %563 : vector<32x1xf32> to vector<32x32xf32>
    %565 = arith.subf %555, %564 : vector<32x32xf32>
    %566 = arith.mulf %565, %565 : vector<32x32xf32>
    %cst_80 = arith.constant dense<0.000000e+00> : vector<32xf32>
    %567 = vector.multi_reduction <add>, %566, %cst_80 [1] : vector<32x32xf32> to vector<32xf32>
    %568 = vector.shape_cast %567 : vector<32xf32> to vector<32x1xf32>
    %cst_81 = arith.constant 3.200000e+01 : f32
    %569 = vector.broadcast %cst_81 : f32 to vector<32x1xf32>
    %570 = arith.divf %568, %569 : vector<32x1xf32>
    %571 = vector.broadcast %563 : vector<32x1xf32> to vector<32x32xf32>
    %572 = arith.subf %555, %571 : vector<32x32xf32>
    %cst_82 = arith.constant 9.99999974E-6 : f32
    %573 = vector.broadcast %cst_82 : f32 to vector<32x1xf32>
    %574 = arith.addf %570, %573 : vector<32x1xf32>
    %575 = math.rsqrt %574 : vector<32x1xf32>
    %576 = vector.broadcast %575 : vector<32x1xf32> to vector<32x32xf32>
    %577 = arith.mulf %572, %576 : vector<32x32xf32>
    %578 = vector.broadcast %557 : vector<1x32xf32> to vector<32x32xf32>
    %579 = arith.mulf %577, %578 : vector<32x32xf32>
    %580 = vector.broadcast %559 : vector<1x32xf32> to vector<32x32xf32>
    %581 = arith.addf %579, %580 : vector<32x32xf32>
    %582 = arith.truncf %581 : vector<32x32xf32> to vector<32x32xbf16>
    %c1_83 = arith.constant 1 : index
    %c0_84 = arith.constant 0 : index
    %c0_85 = arith.constant 0 : index
    %583 = vector.load %arg6[%c1_83, %c0_84, %c0_85] : memref<2x32x96xbf16, #tpu.memory_space<vmem>>, vector<1x32x96xbf16>
    %584 = vector.shape_cast %583 : vector<1x32x96xbf16> to vector<32x96xbf16>
    %cst_86 = arith.constant dense<0.000000e+00> : vector<32x96xf32>
    %585 = tpu.matmul %582, %584, %cst_86 {dimension_numbers = #tpu.dot_dimension_numbers<[1], [0], [0], [1], [0, 0, 1, 1], [], []>} : vector<32x32xbf16>, vector<32x96xbf16>, vector<32x96xf32> -> vector<32x96xf32>
    %586 = vector.extract_strided_slice %585 {offsets = [0, 0], sizes = [32, 8], strides = [1, 1]} : vector<32x96xf32> to vector<32x8xf32>
    %587 = arith.truncf %586 : vector<32x8xf32> to vector<32x8xbf16>
    %588 = vector.shape_cast %587 : vector<32x8xbf16> to vector<2x16x8xbf16>
    %589 = vector.extract_strided_slice %585 {offsets = [0, 32], sizes = [32, 8], strides = [1, 1]} : vector<32x96xf32> to vector<32x8xf32>
    %590 = arith.truncf %589 : vector<32x8xf32> to vector<32x8xbf16>
    %591 = vector.shape_cast %590 : vector<32x8xbf16> to vector<2x16x8xbf16>
    %592 = vector.extract_strided_slice %585 {offsets = [0, 64], sizes = [32, 8], strides = [1, 1]} : vector<32x96xf32> to vector<32x8xf32>
    %593 = arith.truncf %592 : vector<32x8xf32> to vector<32x8xbf16>
    %594 = vector.shape_cast %593 : vector<32x8xbf16> to vector<2x16x8xbf16>
    "tpu.trace_start"() <{level = 10 : i32, message = "bik,bjk->bij"}> : () -> ()
    %cst_87 = arith.constant dense<0.000000e+00> : vector<2x16x16xf32>
    %595 = tpu.matmul %588, %591, %cst_87 {dimension_numbers = #tpu.dot_dimension_numbers<[2], [2], [1], [1], [0, 0, 0, 1, 1, 1], [0], [0]>} : vector<2x16x8xbf16>, vector<2x16x8xbf16>, vector<2x16x16xf32> -> vector<2x16x16xf32>
    "tpu.trace_stop"() : () -> ()
    %cst_88 = arith.constant dense<0xFF800000> : vector<2x16xf32>
    %596 = vector.multi_reduction <maximumf>, %595, %cst_88 [2] : vector<2x16x16xf32> to vector<2x16xf32>
    %597 = vector.shape_cast %596 : vector<2x16xf32> to vector<2x16x1xf32>
    %598 = vector.broadcast %597 : vector<2x16x1xf32> to vector<2x16x16xf32>
    %599 = arith.subf %595, %598 : vector<2x16x16xf32>
    %600 = math.exp %599 : vector<2x16x16xf32>
    %cst_89 = arith.constant dense<0.000000e+00> : vector<2x16xf32>
    %601 = vector.multi_reduction <add>, %600, %cst_89 [2] : vector<2x16x16xf32> to vector<2x16xf32>
    %602 = vector.shape_cast %601 : vector<2x16xf32> to vector<2x16x1xf32>
    %603 = vector.broadcast %602 : vector<2x16x1xf32> to vector<2x16x16xf32>
    %604 = arith.divf %600, %603 : vector<2x16x16xf32>
    %605 = arith.truncf %604 : vector<2x16x16xf32> to vector<2x16x16xbf16>
    "tpu.trace_start"() <{level = 10 : i32, message = "bij,bjk->bik"}> : () -> ()
    %cst_90 = arith.constant dense<0.000000e+00> : vector<2x16x8xf32>
    %606 = tpu.matmul %605, %594, %cst_90 {dimension_numbers = #tpu.dot_dimension_numbers<[2], [1], [1], [2], [0, 0, 0, 1, 1, 2], [0], [0]>} : vector<2x16x16xbf16>, vector<2x16x8xbf16>, vector<2x16x8xf32> -> vector<2x16x8xf32>
    "tpu.trace_stop"() : () -> ()
    %607 = vector.extract_strided_slice %585 {offsets = [0, 8], sizes = [32, 8], strides = [1, 1]} : vector<32x96xf32> to vector<32x8xf32>
    %608 = arith.truncf %607 : vector<32x8xf32> to vector<32x8xbf16>
    %609 = vector.shape_cast %608 : vector<32x8xbf16> to vector<2x16x8xbf16>
    %610 = vector.extract_strided_slice %585 {offsets = [0, 40], sizes = [32, 8], strides = [1, 1]} : vector<32x96xf32> to vector<32x8xf32>
    %611 = arith.truncf %610 : vector<32x8xf32> to vector<32x8xbf16>
    %612 = vector.shape_cast %611 : vector<32x8xbf16> to vector<2x16x8xbf16>
    %613 = vector.extract_strided_slice %585 {offsets = [0, 72], sizes = [32, 8], strides = [1, 1]} : vector<32x96xf32> to vector<32x8xf32>
    %614 = arith.truncf %613 : vector<32x8xf32> to vector<32x8xbf16>
    %615 = vector.shape_cast %614 : vector<32x8xbf16> to vector<2x16x8xbf16>
    "tpu.trace_start"() <{level = 10 : i32, message = "bik,bjk->bij"}> : () -> ()
    %cst_91 = arith.constant dense<0.000000e+00> : vector<2x16x16xf32>
    %616 = tpu.matmul %609, %612, %cst_91 {dimension_numbers = #tpu.dot_dimension_numbers<[2], [2], [1], [1], [0, 0, 0, 1, 1, 1], [0], [0]>} : vector<2x16x8xbf16>, vector<2x16x8xbf16>, vector<2x16x16xf32> -> vector<2x16x16xf32>
    "tpu.trace_stop"() : () -> ()
    %cst_92 = arith.constant dense<0xFF800000> : vector<2x16xf32>
    %617 = vector.multi_reduction <maximumf>, %616, %cst_92 [2] : vector<2x16x16xf32> to vector<2x16xf32>
    %618 = vector.shape_cast %617 : vector<2x16xf32> to vector<2x16x1xf32>
    %619 = vector.broadcast %618 : vector<2x16x1xf32> to vector<2x16x16xf32>
    %620 = arith.subf %616, %619 : vector<2x16x16xf32>
    %621 = math.exp %620 : vector<2x16x16xf32>
    %cst_93 = arith.constant dense<0.000000e+00> : vector<2x16xf32>
    %622 = vector.multi_reduction <add>, %621, %cst_93 [2] : vector<2x16x16xf32> to vector<2x16xf32>
    %623 = vector.shape_cast %622 : vector<2x16xf32> to vector<2x16x1xf32>
    %624 = vector.broadcast %623 : vector<2x16x1xf32> to vector<2x16x16xf32>
    %625 = arith.divf %621, %624 : vector<2x16x16xf32>
    %626 = arith.truncf %625 : vector<2x16x16xf32> to vector<2x16x16xbf16>
    "tpu.trace_start"() <{level = 10 : i32, message = "bij,bjk->bik"}> : () -> ()
    %cst_94 = arith.constant dense<0.000000e+00> : vector<2x16x8xf32>
    %627 = tpu.matmul %626, %615, %cst_94 {dimension_numbers = #tpu.dot_dimension_numbers<[2], [1], [1], [2], [0, 0, 0, 1, 1, 2], [0], [0]>} : vector<2x16x16xbf16>, vector<2x16x8xbf16>, vector<2x16x8xf32> -> vector<2x16x8xf32>
    "tpu.trace_stop"() : () -> ()
    %628 = vector.extract_strided_slice %585 {offsets = [0, 16], sizes = [32, 8], strides = [1, 1]} : vector<32x96xf32> to vector<32x8xf32>
    %629 = arith.truncf %628 : vector<32x8xf32> to vector<32x8xbf16>
    %630 = vector.shape_cast %629 : vector<32x8xbf16> to vector<2x16x8xbf16>
    %631 = vector.extract_strided_slice %585 {offsets = [0, 48], sizes = [32, 8], strides = [1, 1]} : vector<32x96xf32> to vector<32x8xf32>
    %632 = arith.truncf %631 : vector<32x8xf32> to vector<32x8xbf16>
    %633 = vector.shape_cast %632 : vector<32x8xbf16> to vector<2x16x8xbf16>
    %634 = vector.extract_strided_slice %585 {offsets = [0, 80], sizes = [32, 8], strides = [1, 1]} : vector<32x96xf32> to vector<32x8xf32>
    %635 = arith.truncf %634 : vector<32x8xf32> to vector<32x8xbf16>
    %636 = vector.shape_cast %635 : vector<32x8xbf16> to vector<2x16x8xbf16>
    "tpu.trace_start"() <{level = 10 : i32, message = "bik,bjk->bij"}> : () -> ()
    %cst_95 = arith.constant dense<0.000000e+00> : vector<2x16x16xf32>
    %637 = tpu.matmul %630, %633, %cst_95 {dimension_numbers = #tpu.dot_dimension_numbers<[2], [2], [1], [1], [0, 0, 0, 1, 1, 1], [0], [0]>} : vector<2x16x8xbf16>, vector<2x16x8xbf16>, vector<2x16x16xf32> -> vector<2x16x16xf32>
    "tpu.trace_stop"() : () -> ()
    %cst_96 = arith.constant dense<0xFF800000> : vector<2x16xf32>
    %638 = vector.multi_reduction <maximumf>, %637, %cst_96 [2] : vector<2x16x16xf32> to vector<2x16xf32>
    %639 = vector.shape_cast %638 : vector<2x16xf32> to vector<2x16x1xf32>
    %640 = vector.broadcast %639 : vector<2x16x1xf32> to vector<2x16x16xf32>
    %641 = arith.subf %637, %640 : vector<2x16x16xf32>
    %642 = math.exp %641 : vector<2x16x16xf32>
    %cst_97 = arith.constant dense<0.000000e+00> : vector<2x16xf32>
    %643 = vector.multi_reduction <add>, %642, %cst_97 [2] : vector<2x16x16xf32> to vector<2x16xf32>
    %644 = vector.shape_cast %643 : vector<2x16xf32> to vector<2x16x1xf32>
    %645 = vector.broadcast %644 : vector<2x16x1xf32> to vector<2x16x16xf32>
    %646 = arith.divf %642, %645 : vector<2x16x16xf32>
    %647 = arith.truncf %646 : vector<2x16x16xf32> to vector<2x16x16xbf16>
    "tpu.trace_start"() <{level = 10 : i32, message = "bij,bjk->bik"}> : () -> ()
    %cst_98 = arith.constant dense<0.000000e+00> : vector<2x16x8xf32>
    %648 = tpu.matmul %647, %636, %cst_98 {dimension_numbers = #tpu.dot_dimension_numbers<[2], [1], [1], [2], [0, 0, 0, 1, 1, 2], [0], [0]>} : vector<2x16x16xbf16>, vector<2x16x8xbf16>, vector<2x16x8xf32> -> vector<2x16x8xf32>
    "tpu.trace_stop"() : () -> ()
    %649 = vector.extract_strided_slice %585 {offsets = [0, 24], sizes = [32, 8], strides = [1, 1]} : vector<32x96xf32> to vector<32x8xf32>
    %650 = arith.truncf %649 : vector<32x8xf32> to vector<32x8xbf16>
    %651 = vector.shape_cast %650 : vector<32x8xbf16> to vector<2x16x8xbf16>
    %652 = vector.extract_strided_slice %585 {offsets = [0, 56], sizes = [32, 8], strides = [1, 1]} : vector<32x96xf32> to vector<32x8xf32>
    %653 = arith.truncf %652 : vector<32x8xf32> to vector<32x8xbf16>
    %654 = vector.shape_cast %653 : vector<32x8xbf16> to vector<2x16x8xbf16>
    %655 = vector.extract_strided_slice %585 {offsets = [0, 88], sizes = [32, 8], strides = [1, 1]} : vector<32x96xf32> to vector<32x8xf32>
    %656 = arith.truncf %655 : vector<32x8xf32> to vector<32x8xbf16>
    %657 = vector.shape_cast %656 : vector<32x8xbf16> to vector<2x16x8xbf16>
    "tpu.trace_start"() <{level = 10 : i32, message = "bik,bjk->bij"}> : () -> ()
    %cst_99 = arith.constant dense<0.000000e+00> : vector<2x16x16xf32>
    %658 = tpu.matmul %651, %654, %cst_99 {dimension_numbers = #tpu.dot_dimension_numbers<[2], [2], [1], [1], [0, 0, 0, 1, 1, 1], [0], [0]>} : vector<2x16x8xbf16>, vector<2x16x8xbf16>, vector<2x16x16xf32> -> vector<2x16x16xf32>
    "tpu.trace_stop"() : () -> ()
    %cst_100 = arith.constant dense<0xFF800000> : vector<2x16xf32>
    %659 = vector.multi_reduction <maximumf>, %658, %cst_100 [2] : vector<2x16x16xf32> to vector<2x16xf32>
    %660 = vector.shape_cast %659 : vector<2x16xf32> to vector<2x16x1xf32>
    %661 = vector.broadcast %660 : vector<2x16x1xf32> to vector<2x16x16xf32>
    %662 = arith.subf %658, %661 : vector<2x16x16xf32>
    %663 = math.exp %662 : vector<2x16x16xf32>
    %cst_101 = arith.constant dense<0.000000e+00> : vector<2x16xf32>
    %664 = vector.multi_reduction <add>, %663, %cst_101 [2] : vector<2x16x16xf32> to vector<2x16xf32>
    %665 = vector.shape_cast %664 : vector<2x16xf32> to vector<2x16x1xf32>
    %666 = vector.broadcast %665 : vector<2x16x1xf32> to vector<2x16x16xf32>
    %667 = arith.divf %663, %666 : vector<2x16x16xf32>
    %668 = arith.truncf %667 : vector<2x16x16xf32> to vector<2x16x16xbf16>
    "tpu.trace_start"() <{level = 10 : i32, message = "bij,bjk->bik"}> : () -> ()
    %cst_102 = arith.constant dense<0.000000e+00> : vector<2x16x8xf32>
    %669 = tpu.matmul %668, %657, %cst_102 {dimension_numbers = #tpu.dot_dimension_numbers<[2], [1], [1], [2], [0, 0, 0, 1, 1, 2], [0], [0]>} : vector<2x16x16xbf16>, vector<2x16x8xbf16>, vector<2x16x8xf32> -> vector<2x16x8xf32>
    "tpu.trace_stop"() : () -> ()
    %670 = tpu.concatenate %606, %627, %648, %669 in 2 : vector<2x16x8xf32>, vector<2x16x8xf32>, vector<2x16x8xf32>, vector<2x16x8xf32> -> vector<2x16x32xf32>
    %671 = vector.shape_cast %670 : vector<2x16x32xf32> to vector<32x32xf32>
    %672 = arith.truncf %671 : vector<32x32xf32> to vector<32x32xbf16>
    %c1_103 = arith.constant 1 : index
    %c0_104 = arith.constant 0 : index
    %c0_105 = arith.constant 0 : index
    %673 = vector.load %arg7[%c1_103, %c0_104, %c0_105] : memref<2x32x32xbf16, #tpu.memory_space<vmem>>, vector<1x32x32xbf16>
    %674 = vector.shape_cast %673 : vector<1x32x32xbf16> to vector<32x32xbf16>
    %cst_106 = arith.constant dense<0.000000e+00> : vector<32x32xf32>
    %675 = tpu.matmul %672, %674, %cst_106 {dimension_numbers = #tpu.dot_dimension_numbers<[1], [0], [0], [1], [0, 0, 1, 1], [], []>} : vector<32x32xbf16>, vector<32x32xbf16>, vector<32x32xf32> -> vector<32x32xf32>
    %676 = arith.addf %555, %675 : vector<32x32xf32>
    %c1_107 = arith.constant 1 : index
    %c0_108 = arith.constant 0 : index
    %c0_109 = arith.constant 0 : index
    %677 = vector.load %arg8[%c1_107, %c0_108, %c0_109] : memref<2x1x32xf32, #tpu.memory_space<vmem>>, vector<1x1x32xf32>
    %678 = vector.shape_cast %677 : vector<1x1x32xf32> to vector<1x32xf32>
    %679 = vector.broadcast %678 : vector<1x32xf32> to vector<32x32xf32>
    %680 = arith.addf %676, %679 : vector<32x32xf32>
    %c1_110 = arith.constant 1 : index
    %c0_111 = arith.constant 0 : index
    %c0_112 = arith.constant 0 : index
    %681 = vector.load %arg9[%c1_110, %c0_111, %c0_112] : memref<2x1x32xf32, #tpu.memory_space<vmem>>, vector<1x1x32xf32>
    %682 = vector.shape_cast %681 : vector<1x1x32xf32> to vector<1x32xf32>
    %c1_113 = arith.constant 1 : index
    %c0_114 = arith.constant 0 : index
    %c0_115 = arith.constant 0 : index
    %683 = vector.load %arg10[%c1_113, %c0_114, %c0_115] : memref<2x1x32xf32, #tpu.memory_space<vmem>>, vector<1x1x32xf32>
    %684 = vector.shape_cast %683 : vector<1x1x32xf32> to vector<1x32xf32>
    %cst_116 = arith.constant dense<0.000000e+00> : vector<32xf32>
    %685 = vector.multi_reduction <add>, %680, %cst_116 [1] : vector<32x32xf32> to vector<32xf32>
    %686 = vector.shape_cast %685 : vector<32xf32> to vector<32x1xf32>
    %cst_117 = arith.constant 3.200000e+01 : f32
    %687 = vector.broadcast %cst_117 : f32 to vector<32x1xf32>
    %688 = arith.divf %686, %687 : vector<32x1xf32>
    %689 = vector.broadcast %688 : vector<32x1xf32> to vector<32x32xf32>
    %690 = arith.subf %680, %689 : vector<32x32xf32>
    %691 = arith.mulf %690, %690 : vector<32x32xf32>
    %cst_118 = arith.constant dense<0.000000e+00> : vector<32xf32>
    %692 = vector.multi_reduction <add>, %691, %cst_118 [1] : vector<32x32xf32> to vector<32xf32>
    %693 = vector.shape_cast %692 : vector<32xf32> to vector<32x1xf32>
    %cst_119 = arith.constant 3.200000e+01 : f32
    %694 = vector.broadcast %cst_119 : f32 to vector<32x1xf32>
    %695 = arith.divf %693, %694 : vector<32x1xf32>
    %696 = vector.broadcast %688 : vector<32x1xf32> to vector<32x32xf32>
    %697 = arith.subf %680, %696 : vector<32x32xf32>
    %cst_120 = arith.constant 9.99999974E-6 : f32
    %698 = vector.broadcast %cst_120 : f32 to vector<32x1xf32>
    %699 = arith.addf %695, %698 : vector<32x1xf32>
    %700 = math.rsqrt %699 : vector<32x1xf32>
    %701 = vector.broadcast %700 : vector<32x1xf32> to vector<32x32xf32>
    %702 = arith.mulf %697, %701 : vector<32x32xf32>
    %703 = vector.broadcast %682 : vector<1x32xf32> to vector<32x32xf32>
    %704 = arith.mulf %702, %703 : vector<32x32xf32>
    %705 = vector.broadcast %684 : vector<1x32xf32> to vector<32x32xf32>
    %706 = arith.addf %704, %705 : vector<32x32xf32>
    %707 = arith.truncf %706 : vector<32x32xf32> to vector<32x32xbf16>
    %c1_121 = arith.constant 1 : index
    %c0_122 = arith.constant 0 : index
    %c0_123 = arith.constant 0 : index
    %708 = vector.load %arg11[%c1_121, %c0_122, %c0_123] : memref<2x32x128xbf16, #tpu.memory_space<vmem>>, vector<1x32x128xbf16>
    %709 = vector.shape_cast %708 : vector<1x32x128xbf16> to vector<32x128xbf16>
    %cst_124 = arith.constant dense<0.000000e+00> : vector<32x128xf32>
    %710 = tpu.matmul %707, %709, %cst_124 {dimension_numbers = #tpu.dot_dimension_numbers<[1], [0], [0], [1], [0, 0, 1, 1], [], []>} : vector<32x32xbf16>, vector<32x128xbf16>, vector<32x128xf32> -> vector<32x128xf32>
    %c1_125 = arith.constant 1 : index
    %c0_126 = arith.constant 0 : index
    %c0_127 = arith.constant 0 : index
    %711 = vector.load %arg12[%c1_125, %c0_126, %c0_127] : memref<2x1x128xf32, #tpu.memory_space<vmem>>, vector<1x1x128xf32>
    %712 = vector.shape_cast %711 : vector<1x1x128xf32> to vector<1x128xf32>
    %713 = vector.broadcast %712 : vector<1x128xf32> to vector<32x128xf32>
    %714 = arith.addf %710, %713 : vector<32x128xf32>
    %cst_128 = arith.constant 5.000000e-01 : f32
    %715 = vector.broadcast %cst_128 : f32 to vector<32x128xf32>
    %716 = arith.mulf %715, %714 : vector<32x128xf32>
    %cst_129 = arith.constant 4.471500e-02 : f32
    %717 = vector.broadcast %cst_129 : f32 to vector<32x128xf32>
    %718 = arith.mulf %717, %714 : vector<32x128xf32>
    %719 = arith.mulf %718, %714 : vector<32x128xf32>
    %720 = arith.mulf %719, %714 : vector<32x128xf32>
    %721 = arith.addf %714, %720 : vector<32x128xf32>
    %cst_130 = arith.constant 0.797884583 : f32
    %722 = vector.broadcast %cst_130 : f32 to vector<32x128xf32>
    %723 = arith.mulf %722, %721 : vector<32x128xf32>
    %724 = math.tanh %723 : vector<32x128xf32>
    %cst_131 = arith.constant 1.000000e+00 : f32
    %725 = vector.broadcast %cst_131 : f32 to vector<32x128xf32>
    %726 = arith.addf %725, %724 : vector<32x128xf32>
    %727 = arith.mulf %716, %726 : vector<32x128xf32>
    %728 = arith.truncf %727 : vector<32x128xf32> to vector<32x128xbf16>
    %c1_132 = arith.constant 1 : index
    %c0_133 = arith.constant 0 : index
    %c0_134 = arith.constant 0 : index
    %729 = vector.load %arg13[%c1_132, %c0_133, %c0_134] : memref<2x128x32xbf16, #tpu.memory_space<vmem>>, vector<1x128x32xbf16>
    %730 = vector.shape_cast %729 : vector<1x128x32xbf16> to vector<128x32xbf16>
    %cst_135 = arith.constant dense<0.000000e+00> : vector<32x32xf32>
    %731 = tpu.matmul %728, %730, %cst_135 {dimension_numbers = #tpu.dot_dimension_numbers<[1], [0], [0], [1], [0, 0, 1, 1], [], []>} : vector<32x128xbf16>, vector<128x32xbf16>, vector<32x32xf32> -> vector<32x32xf32>
    %c1_136 = arith.constant 1 : index
    %c0_137 = arith.constant 0 : index
    %c0_138 = arith.constant 0 : index
    %732 = vector.load %arg14[%c1_136, %c0_137, %c0_138] : memref<2x1x32xf32, #tpu.memory_space<vmem>>, vector<1x1x32xf32>
    %733 = vector.shape_cast %732 : vector<1x1x32xf32> to vector<1x32xf32>
    %734 = vector.broadcast %733 : vector<1x32xf32> to vector<32x32xf32>
    %735 = arith.addf %731, %734 : vector<32x32xf32>
    %736 = arith.addf %706, %735 : vector<32x32xf32>
    %c0_139 = arith.constant 0 : index
    %c0_140 = arith.constant 0 : index
    %737 = vector.load %arg15[%c0_139, %c0_140] : memref<1x32xf32, #tpu.memory_space<vmem>>, vector<1x32xf32>
    %c0_141 = arith.constant 0 : index
    %c0_142 = arith.constant 0 : index
    %738 = vector.load %arg16[%c0_141, %c0_142] : memref<1x32xf32, #tpu.memory_space<vmem>>, vector<1x32xf32>
    %cst_143 = arith.constant dense<0.000000e+00> : vector<32xf32>
    %739 = vector.multi_reduction <add>, %736, %cst_143 [1] : vector<32x32xf32> to vector<32xf32>
    %740 = vector.shape_cast %739 : vector<32xf32> to vector<32x1xf32>
    %cst_144 = arith.constant 3.200000e+01 : f32
    %741 = vector.broadcast %cst_144 : f32 to vector<32x1xf32>
    %742 = arith.divf %740, %741 : vector<32x1xf32>
    %743 = vector.broadcast %742 : vector<32x1xf32> to vector<32x32xf32>
    %744 = arith.subf %736, %743 : vector<32x32xf32>
    %745 = arith.mulf %744, %744 : vector<32x32xf32>
    %cst_145 = arith.constant dense<0.000000e+00> : vector<32xf32>
    %746 = vector.multi_reduction <add>, %745, %cst_145 [1] : vector<32x32xf32> to vector<32xf32>
    %747 = vector.shape_cast %746 : vector<32xf32> to vector<32x1xf32>
    %cst_146 = arith.constant 3.200000e+01 : f32
    %748 = vector.broadcast %cst_146 : f32 to vector<32x1xf32>
    %749 = arith.divf %747, %748 : vector<32x1xf32>
    %750 = vector.broadcast %742 : vector<32x1xf32> to vector<32x32xf32>
    %751 = arith.subf %736, %750 : vector<32x32xf32>
    %cst_147 = arith.constant 9.99999974E-6 : f32
    %752 = vector.broadcast %cst_147 : f32 to vector<32x1xf32>
    %753 = arith.addf %749, %752 : vector<32x1xf32>
    %754 = math.rsqrt %753 : vector<32x1xf32>
    %755 = vector.broadcast %754 : vector<32x1xf32> to vector<32x32xf32>
    %756 = arith.mulf %751, %755 : vector<32x32xf32>
    %757 = vector.broadcast %737 : vector<1x32xf32> to vector<32x32xf32>
    %758 = arith.mulf %756, %757 : vector<32x32xf32>
    %759 = vector.broadcast %738 : vector<1x32xf32> to vector<32x32xf32>
    %760 = arith.addf %758, %759 : vector<32x32xf32>
    %761 = vector.shape_cast %760 : vector<32x32xf32> to vector<2x16x32xf32>
    %c0_148 = arith.constant 0 : index
    %c0_149 = arith.constant 0 : index
    %762 = vector.load %arg17[%c0_148, %c0_149] : memref<1x32xf32, #tpu.memory_space<vmem>>, vector<1x32xf32>
    %763 = vector.shape_cast %762 : vector<1x32xf32> to vector<1x1x32xf32>
    %764 = vector.broadcast %763 : vector<1x1x32xf32> to vector<2x16x32xf32>
    %765 = arith.mulf %761, %764 : vector<2x16x32xf32>
    %cst_150 = arith.constant dense<0.000000e+00> : vector<2x16xf32>
    %766 = vector.multi_reduction <add>, %765, %cst_150 [2] : vector<2x16x32xf32> to vector<2x16xf32>
    %767 = vector.shape_cast %766 : vector<2x16xf32> to vector<2x16x1xf32>
    %c0_151 = arith.constant 0 : index
    %c0_152 = arith.constant 0 : index
    %768 = vector.load %arg18[%c0_151, %c0_152] : memref<1x1xf32, #tpu.memory_space<vmem>>, vector<1x1xf32>
    %769 = vector.shape_cast %768 : vector<1x1xf32> to vector<1x1x1xf32>
    %770 = vector.broadcast %769 : vector<1x1x1xf32> to vector<2x16x1xf32>
    %771 = arith.addf %767, %770 : vector<2x16x1xf32>
    %cst_153 = arith.constant dense<0xFF800000> : vector<2x1xf32>
    %772 = vector.multi_reduction <maximumf>, %771, %cst_153 [1] : vector<2x16x1xf32> to vector<2x1xf32>
    %773 = vector.shape_cast %772 : vector<2x1xf32> to vector<2x1x1xf32>
    %774 = vector.broadcast %773 : vector<2x1x1xf32> to vector<2x16x1xf32>
    %775 = arith.subf %771, %774 : vector<2x16x1xf32>
    %776 = math.exp %775 : vector<2x16x1xf32>
    %cst_154 = arith.constant dense<0.000000e+00> : vector<2x1xf32>
    %777 = vector.multi_reduction <add>, %776, %cst_154 [1] : vector<2x16x1xf32> to vector<2x1xf32>
    %778 = vector.shape_cast %777 : vector<2x1xf32> to vector<2x1x1xf32>
    %779 = vector.broadcast %778 : vector<2x1x1xf32> to vector<2x16x1xf32>
    %780 = arith.divf %776, %779 : vector<2x16x1xf32>
    %781 = vector.broadcast %780 : vector<2x16x1xf32> to vector<2x16x32xf32>
    %782 = arith.mulf %781, %761 : vector<2x16x32xf32>
    %cst_155 = arith.constant dense<0.000000e+00> : vector<2x32xf32>
    %783 = vector.multi_reduction <add>, %782, %cst_155 [1] : vector<2x16x32xf32> to vector<2x32xf32>
    %784 = arith.truncf %783 : vector<2x32xf32> to vector<2x32xbf16>
    %c0_156 = arith.constant 0 : index
    %c0_157 = arith.constant 0 : index
    %785 = vector.load %arg19[%c0_156, %c0_157] : memref<32x10xbf16, #tpu.memory_space<vmem>>, vector<32x10xbf16>
    %cst_158 = arith.constant dense<0.000000e+00> : vector<2x10xf32>
    %786 = tpu.matmul %784, %785, %cst_158 {dimension_numbers = #tpu.dot_dimension_numbers<[1], [0], [0], [1], [0, 0, 1, 1], [], []>} : vector<2x32xbf16>, vector<32x10xbf16>, vector<2x10xf32> -> vector<2x10xf32>
    %c0_159 = arith.constant 0 : index
    %c0_160 = arith.constant 0 : index
    %787 = vector.load %arg20[%c0_159, %c0_160] : memref<1x10xf32, #tpu.memory_space<vmem>>, vector<1x10xf32>
    %788 = vector.broadcast %787 : vector<1x10xf32> to vector<2x10xf32>
    %789 = arith.addf %786, %788 : vector<2x10xf32>
    %c0_161 = arith.constant 0 : index
    %c0_162 = arith.constant 0 : index
    %790 = vector.load %arg21[%c0_161, %c0_162] : memref<2x10xf32, #tpu.memory_space<vmem>>, vector<2x10xf32>
    tpu.vector_store %arg21[%c0_161, %c0_162], %789 {strides = array<i32>} : memref<2x10xf32, #tpu.memory_space<vmem>>, vector<2x10xf32>,
    return
  }
  func.func @transform_0(%arg0: i32) -> (i32, i32) {
    %c0_i32 = arith.constant 0 : i32
    %c0_i32_0 = arith.constant 0 : i32
    return %arg0, %c0_i32 : i32, i32
  }
  func.func @transform_1(%arg0: i32) -> (i32, i32) {
    %c0_i32 = arith.constant 0 : i32
    %c0_i32_0 = arith.constant 0 : i32
    %c0_i32_1 = arith.constant 0 : i32
    return %c0_i32, %c0_i32_0 : i32, i32
  }
  func.func @transform_2(%arg0: i32) -> (i32, i32) {
    %c0_i32 = arith.constant 0 : i32
    %c0_i32_0 = arith.constant 0 : i32
    %c0_i32_1 = arith.constant 0 : i32
    return %c0_i32, %c0_i32_0 : i32, i32
  }
  func.func @transform_3(%arg0: i32) -> (i32, i32, i32) {
    %c0_i32 = arith.constant 0 : i32
    %c0_i32_0 = arith.constant 0 : i32
    %c0_i32_1 = arith.constant 0 : i32
    %c0_i32_2 = arith.constant 0 : i32
    return %c0_i32, %c0_i32_0, %c0_i32_1 : i32, i32, i32
  }
  func.func @transform_4(%arg0: i32) -> (i32, i32, i32) {
    %c0_i32 = arith.constant 0 : i32
    %c0_i32_0 = arith.constant 0 : i32
    %c0_i32_1 = arith.constant 0 : i32
    %c0_i32_2 = arith.constant 0 : i32
    return %c0_i32, %c0_i32_0, %c0_i32_1 : i32, i32, i32
  }
  func.func @transform_5(%arg0: i32) -> (i32, i32, i32) {
    %c0_i32 = arith.constant 0 : i32
    %c0_i32_0 = arith.constant 0 : i32
    %c0_i32_1 = arith.constant 0 : i32
    %c0_i32_2 = arith.constant 0 : i32
    return %c0_i32, %c0_i32_0, %c0_i32_1 : i32, i32, i32
  }
  func.func @transform_6(%arg0: i32) -> (i32, i32, i32) {
    %c0_i32 = arith.constant 0 : i32
    %c0_i32_0 = arith.constant 0 : i32
    %c0_i32_1 = arith.constant 0 : i32
    %c0_i32_2 = arith.constant 0 : i32
    return %c0_i32, %c0_i32_0, %c0_i32_1 : i32, i32, i32
  }
  func.func @transform_7(%arg0: i32) -> (i32, i32, i32) {
    %c0_i32 = arith.constant 0 : i32
    %c0_i32_0 = arith.constant 0 : i32
    %c0_i32_1 = arith.constant 0 : i32
    %c0_i32_2 = arith.constant 0 : i32
    return %c0_i32, %c0_i32_0, %c0_i32_1 : i32, i32, i32
  }
  func.func @transform_8(%arg0: i32) -> (i32, i32, i32) {
    %c0_i32 = arith.constant 0 : i32
    %c0_i32_0 = arith.constant 0 : i32
    %c0_i32_1 = arith.constant 0 : i32
    %c0_i32_2 = arith.constant 0 : i32
    return %c0_i32, %c0_i32_0, %c0_i32_1 : i32, i32, i32
  }
  func.func @transform_9(%arg0: i32) -> (i32, i32, i32) {
    %c0_i32 = arith.constant 0 : i32
    %c0_i32_0 = arith.constant 0 : i32
    %c0_i32_1 = arith.constant 0 : i32
    %c0_i32_2 = arith.constant 0 : i32
    return %c0_i32, %c0_i32_0, %c0_i32_1 : i32, i32, i32
  }
  func.func @transform_10(%arg0: i32) -> (i32, i32, i32) {
    %c0_i32 = arith.constant 0 : i32
    %c0_i32_0 = arith.constant 0 : i32
    %c0_i32_1 = arith.constant 0 : i32
    %c0_i32_2 = arith.constant 0 : i32
    return %c0_i32, %c0_i32_0, %c0_i32_1 : i32, i32, i32
  }
  func.func @transform_11(%arg0: i32) -> (i32, i32, i32) {
    %c0_i32 = arith.constant 0 : i32
    %c0_i32_0 = arith.constant 0 : i32
    %c0_i32_1 = arith.constant 0 : i32
    %c0_i32_2 = arith.constant 0 : i32
    return %c0_i32, %c0_i32_0, %c0_i32_1 : i32, i32, i32
  }
  func.func @transform_12(%arg0: i32) -> (i32, i32, i32) {
    %c0_i32 = arith.constant 0 : i32
    %c0_i32_0 = arith.constant 0 : i32
    %c0_i32_1 = arith.constant 0 : i32
    %c0_i32_2 = arith.constant 0 : i32
    return %c0_i32, %c0_i32_0, %c0_i32_1 : i32, i32, i32
  }
  func.func @transform_13(%arg0: i32) -> (i32, i32, i32) {
    %c0_i32 = arith.constant 0 : i32
    %c0_i32_0 = arith.constant 0 : i32
    %c0_i32_1 = arith.constant 0 : i32
    %c0_i32_2 = arith.constant 0 : i32
    return %c0_i32, %c0_i32_0, %c0_i32_1 : i32, i32, i32
  }
  func.func @transform_14(%arg0: i32) -> (i32, i32) {
    %c0_i32 = arith.constant 0 : i32
    %c0_i32_0 = arith.constant 0 : i32
    %c0_i32_1 = arith.constant 0 : i32
    return %c0_i32, %c0_i32_0 : i32, i32
  }
  func.func @transform_15(%arg0: i32) -> (i32, i32) {
    %c0_i32 = arith.constant 0 : i32
    %c0_i32_0 = arith.constant 0 : i32
    %c0_i32_1 = arith.constant 0 : i32
    return %c0_i32, %c0_i32_0 : i32, i32
  }
  func.func @transform_16(%arg0: i32) -> (i32, i32) {
    %c0_i32 = arith.constant 0 : i32
    %c0_i32_0 = arith.constant 0 : i32
    %c0_i32_1 = arith.constant 0 : i32
    return %c0_i32, %c0_i32_0 : i32, i32
  }
  func.func @transform_17(%arg0: i32) -> (i32, i32) {
    %c0_i32 = arith.constant 0 : i32
    %c0_i32_0 = arith.constant 0 : i32
    %c0_i32_1 = arith.constant 0 : i32
    return %c0_i32, %c0_i32_0 : i32, i32
  }
  func.func @transform_18(%arg0: i32) -> (i32, i32) {
    %c0_i32 = arith.constant 0 : i32
    %c0_i32_0 = arith.constant 0 : i32
    %c0_i32_1 = arith.constant 0 : i32
    return %c0_i32, %c0_i32_0 : i32, i32
  }
  func.func @transform_19(%arg0: i32) -> (i32, i32) {
    %c0_i32 = arith.constant 0 : i32
    %c0_i32_0 = arith.constant 0 : i32
    %c0_i32_1 = arith.constant 0 : i32
    return %c0_i32, %c0_i32_0 : i32, i32
  }
  func.func @transform_20(%arg0: i32) -> (i32, i32) {
    %c0_i32 = arith.constant 0 : i32
    %c0_i32_0 = arith.constant 0 : i32
    return %arg0, %c0_i32 : i32, i32
  }
}

</mosaic_0001>

<bundles_post_ra>
// kernel: cct_forward.1
= control target key start
LH: loop header
LB: loop body
LE: loop exit
PB: predicated region body
PF: predicated region fallthrough
CT: control target
= control target key end

     0   :  { %s6001_s0 = inlined_call_operand.vmem [shape: bf16[128,160], index: 0, kind: input, shape index: {}]   ;;  %s6002_s1 = inlined_call_operand.vmem [shape: bf16[160,32], index: 1, kind: input, shape index: {}]   ;;  %s6003_s2 = inlined_call_operand.vmem [shape: f32[16,32], index: 2, kind: input, shape index: {}]   ;;  %s6004_s3 = inlined_call_operand.vmem [shape: f32[2,1,32], index: 3, kind: input, shape index: {}]   ;;  %s6005_s4 = inlined_call_operand.vmem [shape: f32[2,1,32], index: 4, kind: input, shape index: {}]   ;;  %s6006_s5 = inlined_call_operand.vmem [shape: bf16[2,32,96], index: 5, kind: input, shape index: {}]   ;;  %s6007_s6 = inlined_call_operand.vmem [shape: bf16[2,32,32], index: 6, kind: input, shape index: {}]   ;;  %s6008_s7 = inlined_call_operand.vmem [shape: f32[2,1,32], index: 7, kind: input, shape index: {}]   ;;  %s6009_s8 = inlined_call_operand.vmem [shape: f32[2,1,32], index: 8, kind: input, shape index: {}]   ;;  %s6010_s9 = inlined_call_operand.vmem [shape: f32[2,1,32], index: 9, kind: input, shape index: {}]   ;;  %s6011_s10 = inlined_call_operand.vmem [shape: bf16[2,32,128], index: 10, kind: input, shape index: {}]   ;;  %s6012_s11 = inlined_call_operand.vmem [shape: f32[2,1,128], index: 11, kind: input, shape index: {}]   ;;  %s6013_s12 = inlined_call_operand.vmem [shape: bf16[2,128,32], index: 12, kind: input, shape index: {}]   ;;  %s6014_s13 = inlined_call_operand.vmem [shape: f32[2,1,32], index: 13, kind: input, shape index: {}]   ;;  %s6015_s14 = inlined_call_operand.vmem [shape: f32[1,32], index: 14, kind: input, shape index: {}]   ;;  %s6016_s15 = inlined_call_operand.vmem [shape: f32[1,32], index: 15, kind: input, shape index: {}]   ;;  %s6017_s16 = inlined_call_operand.vmem [shape: f32[1,32], index: 16, kind: input, shape index: {}]   ;;  %s6018_s17 = inlined_call_operand.<no memory space> [shape: f32[1,1], index: 17, kind: input, shape index: {}]   ;;  %s6019_s18 = inlined_call_operand.vmem [shape: bf16[32,10], index: 18, kind: input, shape index: {}]   ;;  %s6020_s19 = inlined_call_operand.vmem [shape: f32[1,10], index: 19, kind: input, shape index: {}]   ;;  %s6021_s20 = inlined_call_operand.hbm [shape: f32[2,10], index: 20, kind: output, shape index: {}]  }
   0x1   :  { %6043 = sst [smem:[#allocation6_spill]] %s6001_s0  ;;  %v25_v0 = vstv %s6018_s17 }
   0x2   :  { %6044 = sst [smem:[#allocation7_spill]] %s6002_s1  ;;  %26 = vst [vmem:[#allocation2] sm:$0x1] %v25_v0 }
   0x3   :  { %6045 = sst [smem:[#allocation8_spill]] %s6003_s2 }
   0x4   :  { %6046 = sst [smem:[#allocation9_spill]] %s6004_s3 }
   0x5   :  { %6047 = sst [smem:[#allocation10_spill]] %s6005_s4 }
   0x6   :  { %s6048_s2 = sld [smem:[#allocation7_spill]]  ;;  %v5035_v2 = vmov 0   ;;  %vm237_vm0 = vcmask 261120  }
   0x7   :  { %262 = vmatprep.subr.bf16.mxu0 %v5035_v2  ;;  %4751 = vset.pattern.permute.xlu0 %v5035_v2  ;;  %s6049_s30 = sld [smem:[#allocation6_spill]] }
   0x8   :  { %4752 = vset.pattern.permute.xlu1 %v5035_v2 }
   0xc   :  { %v4753_v1 = vld [vmem:[%s6048_s2 + $0x38] sm:$0xff]   ;;  %v4754_v3 = vld [vmem:[%s6048_s2 + $0x30] sm:$0xff]   ;;  %v4755_v4 = vld [vmem:[%s6048_s2 + $0x28] sm:$0xff]  }
   0xd   :  { %263 = vmatpush1.bf16.msra.mxu0 %v4753_v1  ;;  %v4756_v5 = vld [vmem:[%s6048_s2 + $0x20] sm:$0xff]   ;;  %v4757_v7 = vld [vmem:[%s6048_s2 + $0x18] sm:$0xff]   ;;  %v4758_v8 = vld [vmem:[%s6048_s2 + $0x10] sm:$0xff]  }
   0xe   :  { %264 = vmatprep.subr.bf16.mxu0 %v5035_v2  ;;  %v4765_v6 = vld [vmem:[%s6049_s30 + $0x4] ss:$8 sps:$4 sm:$0xff]   ;;  %v4763_v13 = vld [vmem:[%s6049_s30] ss:$8 sps:$4 sm:$0xff]   ;;  %v4766_v14 = vld [vmem:[%s6049_s30 + $0x14] ss:$8 sps:$4 sm:$0xff]  }
   0xf   :  { %4137 = vmatprep.mubr.msk.bf16.mxu0 %vm237_vm0, %v4765_v6  ;;  %v4759_v9 = vld [vmem:[%s6048_s2 + $0x8] sm:$0xff]   ;;  %v4760_v10 = vld [vmem:[%s6048_s2] sm:$0xff]  }
  0x10   :  { %v4761_v11 = vld [vmem:[%s6048_s2 + $0x48] sm:$0xff]   ;;  %v4762_v12 = vld [vmem:[%s6048_s2 + $0x40] sm:$0xff]  }
  0x11   :  { %265 = vmatpush1.bf16.msra.mxu0 %v4754_v3 }
  0x12   :  { %266 = vmatprep.subr.bf16.mxu0 %v5035_v2 }
  0x15   :  { %267 = vmatpush1.bf16.msra.mxu0 %v4755_v4 }
  0x16   :  { %268 = vmatprep.subr.bf16.mxu0 %v5035_v2 }
  0x19   :  { %269 = vmatpush1.bf16.msra.mxu0 %v4756_v5 }
  0x1a   :  { %270 = vmatprep.subr.bf16.mxu0 %v5035_v2 }
  0x1d   :  { %271 = vmatpush1.bf16.msra.mxu0 %v4757_v7 }
  0x1e   :  { %272 = vmatprep.subr.bf16.mxu0 %v5035_v2 }
  0x21   :  { %273 = vmatpush1.bf16.msra.mxu0 %v4758_v8 }
  0x22   :  { %274 = vmatprep.subr.bf16.mxu0 %v5035_v2 }
  0x25   :  { %275 = vmatpush1.bf16.msra.mxu0 %v4759_v9 }
  0x26   :  { %276 = vmatprep.subr.bf16.mxu0 %v5035_v2 }
  0x29   :  { %277 = vmatpush1.bf16.msra.mxu0 %v4760_v10 }
  0x2a   :  { %290 = vmatprep.subr.bf16.mxu0 %v5035_v2 }
  0x2d   :  { %291 = vmatpush2.bf16.msra.mxu0 %v4761_v11 }
  0x2e   :  { %292 = vmatprep.subr.bf16.mxu0 %v5035_v2 }
  0x31   :  { %293 = vmatpush2.bf16.msra.mxu0 %v4762_v12 }
  0x32   :  { %27 = vsyncpa [#allocation4], 0  ;;  %v4768_v15 = vld [vmem:[%s6049_s30 + $0x10] ss:$8 sps:$4 sm:$0xff]   ;;  %v4769_v16 = vld [vmem:[%s6049_s30 + $0x24] ss:$8 sps:$4 sm:$0xff]  }
  0x33   :  { %v4771_v17 = vld [vmem:[%s6049_s30 + $0x20] ss:$8 sps:$4 sm:$0xff]   ;;  %v4772_v18 = vld [vmem:[%s6049_s30 + $0x34] ss:$8 sps:$4 sm:$0xff]   ;;  %v4774_v19 = vld [vmem:[%s6049_s30 + $0x30] ss:$8 sps:$4 sm:$0xff]  }
  0x34   :  { %295 = vmatmul.mubr.bf16.vlgmr.msra.gmra.mxu0 %v4763_v13  ;;  %v4775_v20 = vld [vmem:[%s6049_s30 + $0x44] ss:$8 sps:$4 sm:$0xff]   ;;  %v4777_v21 = vld [vmem:[%s6049_s30 + $0x40] ss:$8 sps:$4 sm:$0xff]   ;;  %v4778_v22 = vld [vmem:[%s6049_s30 + $0x54] ss:$8 sps:$4 sm:$0xff]  }
  0x35   :  { %4138 = vmatprep.mubr.msk.bf16.mxu0 %vm237_vm0, %v4766_v14  ;;  %v4780_v23 = vld [vmem:[%s6049_s30 + $0x50] ss:$8 sps:$4 sm:$0xff]   ;;  %v4781_v24 = vld [vmem:[%s6049_s30 + $0x64] ss:$8 sps:$4 sm:$0xff]   ;;  %v4783_v25 = vld [vmem:[%s6049_s30 + $0x60] ss:$8 sps:$4 sm:$0xff]  }
  0x36   :  { %v4784_v26 = vld [vmem:[%s6049_s30 + $0x74] ss:$8 sps:$4 sm:$0xff]   ;;  %v4786_v27 = vld [vmem:[%s6049_s30 + $0x70] ss:$8 sps:$4 sm:$0xff]   ;;  %vm601_vm1 = vcmask 1040384   ;;  %vm604_vm2 = vcmask 1041408  }
  0x37   :  { %vm607_vm3 = vcmask 1042432   ;;  %vm610_vm4 = vcmask 1043456   ;;  %vm613_vm5 = vcmask 1044480   ;;  %vm616_vm6 = vcmask 1045504   ;;  %s6050_s29 = sld [smem:[#allocation8_spill]]  ;;  %s5038_s28 = smov 96  }
  0x38   :  { %vm619_vm7 = vcmask 1046528   ;;  %s6051_s3 = sld [smem:[#allocation9_spill]]  ;;  %vm5037_vm8 = vmmov 0   ;;  %vm795_vm9 = vcmask 64512   ;;  %vm893_vm10 = vcmask 130048   ;;  %s5039_s30 = smov 64  }
  0x39   :  { %s6052_s17 = sld [smem:[#allocation10_spill]]  ;;  %s5040_s4 = smov 88   ;;  %vm1816_vm11 = vcmask 195584   ;;  %vm3923_vm12 = vcmask 7168   ;;  %vm4037_vm13 = vcmask 1041409   ;;  %vm4095_vm14 = vcmask 74752  }
  0x3a   :  { %s5042_s0 = smov 56   ;;  %s5043_s21 = smov 80  }
  0x3b   :  { %s6041_s1 = smov 112   ;;  %s6039_s22 = smov 48  }
  0x3c   :  { %303 = vmatmul.mubr.bf16.gmra.mxu0 %v4768_v15  ;;  %s6037_s2 = smov 72   ;;  %s6033_s23 = smov 104  }
  0x3d   :  { %4139 = vmatprep.mubr.msk.bf16.mxu0 %vm237_vm0, %v4769_v16  ;;  %s6031_s24 = smov 40   ;;  %s6029_s25 = smov 8  }
  0x3e   :  { %s6027_s26 = smov 16  }
  0x44   :  { %311 = vmatmul.mubr.bf16.gmra.mxu0 %v4771_v17 }
  0x45   :  { %4140 = vmatprep.mubr.msk.bf16.mxu0 %vm237_vm0, %v4772_v18 }
  0x4c   :  { %319 = vmatmul.mubr.bf16.gmra.mxu0 %v4774_v19 }
  0x4d   :  { %4141 = vmatprep.mubr.msk.bf16.mxu0 %vm237_vm0, %v4775_v20 }
  0x54   :  { %327 = vmatmul.mubr.bf16.gmra.mxu0 %v4777_v21 }
  0x55   :  { %4142 = vmatprep.mubr.msk.bf16.mxu0 %vm237_vm0, %v4778_v22 }
  0x5c   :  { %335 = vmatmul.mubr.bf16.gmra.mxu0 %v4780_v23 }
  0x5d   :  { %4143 = vmatprep.mubr.msk.bf16.mxu0 %vm237_vm0, %v4781_v24 }
  0x64   :  { %343 = vmatmul.mubr.bf16.gmra.mxu0 %v4783_v25 }
  0x65   :  { %4144 = vmatprep.mubr.msk.bf16.mxu0 %vm237_vm0, %v4784_v26 }
  0x6c   :  { %351 = vmatmul.mubr.bf16.gmra.mxu0 %v4786_v27 }
  0xf4   :  { %v296_v28 = vpop.f32.mrf.mxu0 }
  0xf5   :  { %v359_v29 = vmax.f32 %v296_v28, 0.0 }
  0xf6   :  { %v298_v30 = vpop.f32.mrf.mxu0 }
  0xf7   :  { %v377_v31 = vrot.slane %v359_v29, 1  ;;  %v393_v34 = vrot.slane %v359_v29, 2 }
  0xf8   :  { %v299_v32 = vpop.f32.mrf.mxu0 }
  0xf9   :  { %v381_v33 = vmax.f32 %v359_v29, %v377_v31  ;;  %v360_v35 = vmax.f32 %v299_v32, 0.0 }
  0xfa   :  { %v301_v36 = vpop.f32.mrf.mxu0 }
  0xfb   :  { %v397_v37 = vmax.f32 %v381_v33, %v393_v34  ;;  %v387_v38 = vrot.slane %v360_v35, 1  ;;  %v403_v42 = vrot.slane %v360_v35, 2  ;;  %v383_v53 = vmax.f32 %v381_v33, %v360_v35 }
  0xfc   :  { %v304_v39 = vpop.f32.mrf.mxu0 }
  0xfd   :  { %v399_v40 = vmax.f32 %v397_v37, %v360_v35  ;;  %v361_v41 = vmax.f32 %v304_v39, 0.0  ;;  %v409_v43 = vmax.f32 %v360_v35, %v387_v38  ;;  %v391_v0 = vmax.f32 %v383_v53, %v387_v38 }
  0xfe   :  { %v306_v44 = vpop.f32.mrf.mxu0 }
  0xff   :  { %v401_v45 = vmax.f32 %v399_v40, %v387_v38  ;;  %v411_v46 = vmax.f32 %v409_v43, %v361_v41  ;;  %v415_v47 = vrot.slane %v361_v41, 1  ;;  %v431_v48 = vmax.f32 %v409_v43, %v403_v42 }
 0x100   :  { %v307_v49 = vpop.f32.mrf.mxu0  ;;  %v437_v54 = vrot.slane %v361_v41, 2 }
 0x101   :  { %v419_v50 = vmax.f32 %v411_v46, %v415_v47  ;;  %v433_v51 = vmax.f32 %v431_v48, %v361_v41  ;;  %v362_v52 = vmax.f32 %v307_v49, 0.0  ;;  %v407_v56 = vmax.f32 %v401_v45, %v403_v42  ;;  %v5256_v45 = vld [vmem:[%s6050_s29] sm:$0xff] }
 0x102   :  { %v309_v55 = vpop.f32.mrf.mxu0 }
 0x103   :  { %v435_v57 = vmax.f32 %v433_v51, %v415_v47  ;;  %v421_v58 = vmax.f32 %v419_v50, %v362_v52  ;;  %v425_v59 = vrot.slane %v362_v52, 1  ;;  %v447_v1 = vrot.slane %v362_v52, 2 }
 0x104   :  { %v312_v60 = vpop.f32.mrf.mxu0  ;;  %v543_v3 = vrot.slane %v407_v56, 1  ;;  %v602_v10 = vsel %vm601_vm1, %v391_v0, %v407_v56  ;;  %v547_v15 = vrot.slane %v407_v56, 2 }
 0x105   :  { %v441_v61 = vmax.f32 %v435_v57, %v437_v54  ;;  %v363_v62 = vmax.f32 %v312_v60, 0.0  ;;  %v453_v63 = vmax.f32 %v362_v52, %v425_v59  ;;  %v429_v4 = vmax.f32 %v421_v58, %v425_v59 }
 0x106   :  { %v314_v2 = vpop.f32.mrf.mxu0  ;;  %v605_v19 = vsel %vm604_vm2, %v602_v10, %v543_v3 }
 0x107   :  { %v443_v5 = vmax.f32 %v441_v61, %v362_v52  ;;  %v455_v6 = vmax.f32 %v453_v63, %v363_v62  ;;  %v459_v7 = vrot.slane %v363_v62, 1  ;;  %v475_v8 = vmax.f32 %v453_v63, %v447_v1 }
 0x108   :  { %v315_v9 = vpop.f32.mrf.mxu0  ;;  %v553_v16 = vrot.slane %v429_v4, 4  ;;  %v481_v22 = vrot.slane %v363_v62, 2  ;;  %v608_v31 = vsel %vm607_vm3, %v605_v19, %v547_v15 }
 0x109   :  { %v445_v11 = vmax.f32 %v443_v5, %v425_v59  ;;  %v364_v12 = vmax.f32 %v315_v9, 0.0  ;;  %v477_v13 = vmax.f32 %v475_v8, %v363_v62  ;;  %v463_v20 = vmax.f32 %v455_v6, %v459_v7 }
 0x10a   :  { %v317_v14 = vpop.f32.mrf.mxu0  ;;  %v611_v35 = vsel %vm610_vm4, %v608_v31, %v553_v16 }
 0x10b   :  { %v469_v17 = vrot.slane %v364_v12, 1  ;;  %v451_v18 = vmax.f32 %v445_v11, %v447_v1  ;;  %v479_v21 = vmax.f32 %v477_v13, %v459_v7  ;;  %v491_v25 = vrot.slane %v364_v12, 2 }
 0x10c   :  { %v320_v23 = vpop.f32.mrf.mxu0  ;;  %v465_v36 = vmax.f32 %v463_v20, %v364_v12 }
 0x10d   :  { %v365_v24 = vmax.f32 %v320_v23, 0.0  ;;  %v497_v26 = vmax.f32 %v364_v12, %v469_v17  ;;  %v559_v27 = vrot.slane %v451_v18, 4  ;;  %v485_v28 = vmax.f32 %v479_v21, %v481_v22 }
 0x10e   :  { %v322_v29 = vpop.f32.mrf.mxu0  ;;  %v563_v30 = vrot.slane %v451_v18, 5  ;;  %v567_v39 = vrot.slane %v451_v18, 6  ;;  %v473_v53 = vmax.f32 %v465_v36, %v469_v17 }
 0x10f   :  { %v499_v32 = vmax.f32 %v497_v26, %v365_v24  ;;  %v503_v33 = vrot.slane %v365_v24, 1  ;;  %v519_v34 = vmax.f32 %v497_v26, %v491_v25  ;;  %v487_v37 = vmax.f32 %v485_v28, %v364_v12 }
 0x110   :  { %v323_v38 = vpop.f32.mrf.mxu0  ;;  %v614_v40 = vsel %vm613_vm5, %v611_v35, %v559_v27  ;;  %v525_v50 = vrot.slane %v365_v24, 2 }
 0x111   :  { %v521_v41 = vmax.f32 %v519_v34, %v365_v24  ;;  %v366_v42 = vmax.f32 %v323_v38, 0.0  ;;  %v507_v43 = vmax.f32 %v499_v32, %v503_v33  ;;  %v617_v44 = vsel %vm616_vm6, %v614_v40, %v563_v30 }
 0x112   :  { %v489_v46 = vmax.f32 %v487_v37, %v469_v17  ;;  %v325_v47 = vpop.f32.mrf.mxu0  ;;  %v620_v48 = vsel %vm619_vm7, %v617_v44, %v567_v39 }
 0x113   :  { %v523_v49 = vmax.f32 %v521_v41, %v503_v33  ;;  %v509_v51 = vmax.f32 %v507_v43, %v366_v42  ;;  %v513_v52 = vrot.slane %v366_v42, 1  ;;  %v5260_v56 = vadd.f32 %v5256_v45, %v620_v48  ;;  %v5273_v43 = vld [vmem:[%s6050_s29 + $0x8] sm:$0xff]  ;;  %s5041_s29 = smov 120  }
 0x114   :  { %v495_v54 = vmax.f32 %v489_v46, %v491_v25  ;;  %v328_v55 = vpop.f32.mrf.mxu0  ;;  %v535_v3 = vrot.slane %v366_v42, 2 }
 0x115   :  { %v529_v57 = vmax.f32 %v523_v49, %v525_v50  ;;  %v367_v58 = vmax.f32 %v328_v55, 0.0  ;;  %v517_v61 = vmax.f32 %v509_v51, %v513_v52  ;;  %v644_v62 = vsel %vm237_vm0, %v5260_v56, 0.0 }
 0x116   :  { %v573_v59 = vrot.slane %v495_v54, 1  ;;  %v622_v60 = vsel %vm601_vm1, %v473_v53, %v495_v54  ;;  %v330_v63 = vpop.f32.mrf.mxu0  ;;  %v577_v0 = vrot.slane %v495_v54, 2  ;;  %645 = vadd.xlane.f32.xlu0 %v644_v62 }
 0x117   :  { %v531_v1 = vmax.f32 %v529_v57, %v366_v42  ;;  %v378_v2 = vrot.slane %v367_v58, 1  ;;  %v394_v8 = vrot.slane %v367_v58, 2  ;;  %v583_v10 = vrot.slane %v517_v61, 4 }
 0x118   :  { %v331_v4 = vpop.f32.mrf.mxu0  ;;  %v624_v5 = vsel %vm604_vm2, %v622_v60, %v573_v59 }
 0x119   :  { %v533_v6 = vmax.f32 %v531_v1, %v513_v52  ;;  %v382_v7 = vmax.f32 %v367_v58, %v378_v2  ;;  %v368_v9 = vmax.f32 %v331_v4, 0.0  ;;  %v626_v15 = vsel %vm607_vm3, %v624_v5, %v577_v0 }
 0x11a   :  { %v333_v11 = vpop.f32.mrf.mxu0  ;;  %v628_v24 = vsel %vm610_vm4, %v626_v15, %v583_v10 }
 0x11b   :  { %v539_v12 = vmax.f32 %v533_v6, %v535_v3  ;;  %v398_v13 = vmax.f32 %v382_v7, %v394_v8  ;;  %v388_v14 = vrot.slane %v368_v9, 1  ;;  %v404_v19 = vrot.slane %v368_v9, 2 }
 0x11c   :  { %v336_v16 = vpop.f32.mrf.mxu0  ;;  %v384_v31 = vmax.f32 %v382_v7, %v368_v9 }
 0x11d   :  { %v400_v17 = vmax.f32 %v398_v13, %v368_v9  ;;  %v369_v18 = vmax.f32 %v336_v16, 0.0  ;;  %v410_v20 = vmax.f32 %v368_v9, %v388_v14  ;;  %v589_v22 = vrot.slane %v539_v12, 4 }
 0x11e   :  { %v338_v21 = vpop.f32.mrf.mxu0  ;;  %v593_v23 = vrot.slane %v539_v12, 5  ;;  %v597_v37 = vrot.slane %v539_v12, 6  ;;  %v392_v47 = vmax.f32 %v384_v31, %v388_v14 }
 0x11f   :  { %v402_v25 = vmax.f32 %v400_v17, %v388_v14  ;;  %v412_v26 = vmax.f32 %v410_v20, %v369_v18  ;;  %v416_v27 = vrot.slane %v369_v18, 1  ;;  %v432_v28 = vmax.f32 %v410_v20, %v404_v19 }
 0x120   :  { %v339_v29 = vpop.f32.mrf.mxu0  ;;  %v630_v30 = vsel %vm613_vm5, %v628_v24, %v589_v22  ;;  %v438_v35 = vrot.slane %v369_v18, 2 }
 0x121   :  { %v420_v32 = vmax.f32 %v412_v26, %v416_v27  ;;  %v434_v33 = vmax.f32 %v432_v28, %v369_v18  ;;  %v370_v34 = vmax.f32 %v339_v29, 0.0  ;;  %v632_v38 = vsel %vm616_vm6, %v630_v30, %v593_v23 }
 0x122   :  { %v341_v36 = vpop.f32.mrf.mxu0  ;;  %v408_v39 = vmax.f32 %v402_v25, %v404_v19  ;;  %v634_v46 = vsel %vm619_vm7, %v632_v38, %v597_v37 }
 0x123   :  { %v436_v40 = vmax.f32 %v434_v33, %v416_v27  ;;  %v422_v41 = vmax.f32 %v420_v32, %v370_v34  ;;  %v426_v42 = vrot.slane %v370_v34, 1  ;;  %v448_v51 = vrot.slane %v370_v34, 2 }
 0x124   :  { %v344_v44 = vpop.f32.mrf.mxu0  ;;  %v5277_v52 = vadd.f32 %v5273_v43, %v634_v46  ;;  %v544_v54 = vrot.slane %v408_v39, 1  ;;  %v603_v58 = vsel %vm601_vm1, %v392_v47, %v408_v39  ;;  %v548_v4 = vrot.slane %v408_v39, 2 }
 0x125   :  { %v442_v48 = vmax.f32 %v436_v40, %v438_v35  ;;  %v371_v49 = vmax.f32 %v344_v44, 0.0  ;;  %v454_v50 = vmax.f32 %v370_v34, %v426_v42  ;;  %v430_v55 = vmax.f32 %v422_v41, %v426_v42 }
 0x126   :  { %v346_v53 = vpop.f32.mrf.mxu0  ;;  %v647_v62 = vsel %vm237_vm0, %v5277_v52, 0.0  ;;  %v606_v8 = vsel %vm604_vm2, %v603_v58, %v544_v54 }
 0x127   :  { %v444_v57 = vmax.f32 %v442_v48, %v370_v34  ;;  %v456_v59 = vmax.f32 %v454_v50, %v371_v49  ;;  %v460_v60 = vrot.slane %v371_v49, 1  ;;  %v476_v61 = vmax.f32 %v454_v50, %v448_v51  ;;  %648 = vadd.xlane.f32.xlu0 %v647_v62 }
 0x128   :  { %v347_v63 = vpop.f32.mrf.mxu0  ;;  %v554_v5 = vrot.slane %v430_v55, 4  ;;  %v482_v11 = vrot.slane %v371_v49, 2  ;;  %v609_v20 = vsel %vm607_vm3, %v606_v8, %v548_v4 }
 0x129   :  { %v446_v0 = vmax.f32 %v444_v57, %v426_v42  ;;  %v372_v1 = vmax.f32 %v347_v63, 0.0  ;;  %v478_v2 = vmax.f32 %v476_v61, %v371_v49  ;;  %v464_v9 = vmax.f32 %v456_v59, %v460_v60 }
 0x12a   :  { %v349_v3 = vpop.f32.mrf.mxu0  ;;  %v612_v24 = vsel %vm610_vm4, %v609_v20, %v554_v5 }
 0x12b   :  { %v470_v6 = vrot.slane %v372_v1, 1  ;;  %v452_v7 = vmax.f32 %v446_v0, %v448_v51  ;;  %v480_v10 = vmax.f32 %v478_v2, %v460_v60  ;;  %v492_v14 = vrot.slane %v372_v1, 2 }
 0x12c   :  { %v352_v12 = vpop.f32.mrf.mxu0  ;;  %v466_v25 = vmax.f32 %v464_v9, %v372_v1 }
 0x12d   :  { %v373_v13 = vmax.f32 %v352_v12, 0.0  ;;  %v498_v15 = vmax.f32 %v372_v1, %v470_v6  ;;  %v560_v16 = vrot.slane %v452_v7, 4  ;;  %v486_v17 = vmax.f32 %v480_v10, %v482_v11 }
 0x12e   :  { %v354_v18 = vpop.f32.mrf.mxu0  ;;  %v564_v19 = vrot.slane %v452_v7, 5  ;;  %v568_v28 = vrot.slane %v452_v7, 6  ;;  %v474_v41 = vmax.f32 %v466_v25, %v470_v6  ;;  %v4788_v25 = vld [vmem:[%s6006_s5] sm:$0xff]  }
 0x12f   :  { %v500_v21 = vmax.f32 %v498_v15, %v373_v13  ;;  %v504_v22 = vrot.slane %v373_v13, 1  ;;  %v520_v23 = vmax.f32 %v498_v15, %v492_v14  ;;  %v488_v26 = vmax.f32 %v486_v17, %v372_v1 }
 0x130   :  { %v355_v27 = vpop.f32.mrf.mxu0  ;;  %v615_v29 = vsel %vm613_vm5, %v612_v24, %v560_v16  ;;  %v526_v38 = vrot.slane %v373_v13, 2  ;;  %v4787_v24 = vld [vmem:[%s6006_s5 + $0x8] sm:$0xff]  }
 0x131   :  { %v522_v30 = vmax.f32 %v520_v23, %v373_v13  ;;  %v374_v31 = vmax.f32 %v355_v27, 0.0  ;;  %v508_v32 = vmax.f32 %v500_v21, %v504_v22  ;;  %v618_v33 = vsel %vm616_vm6, %v615_v29, %v564_v19  ;;  %4385 = vmatprep.subr.bf16.mxu1 %v4787_v24 }
 0x132   :  { %v490_v34 = vmax.f32 %v488_v26, %v470_v6  ;;  %v357_v35 = vpop.f32.mrf.mxu0  ;;  %v621_v36 = vsel %vm619_vm7, %v618_v33, %v568_v28  ;;  %4386 = vmatpush3.bf16.msra.mxu1 %v4787_v24 }
 0x133   :  { %v524_v37 = vmax.f32 %v522_v30, %v504_v22  ;;  %v510_v39 = vmax.f32 %v508_v32, %v374_v31  ;;  %v514_v40 = vrot.slane %v374_v31, 1  ;;  %v5289_v44 = vadd.f32 %v5256_v45, %v621_v36  ;;  %4387 = vmatprep.subr.bf16.mxu1 %v4788_v25  ;;  %v4145_v35 = vld [vmem:[%s6051_s3] ss:$0 sm:$0xff] }
 0x134   :  { %v496_v42 = vmax.f32 %v490_v34, %v492_v14  ;;  %v536_v57 = vrot.slane %v374_v31, 2 }
 0x135   :  { %v530_v46 = vmax.f32 %v524_v37, %v526_v38  ;;  %v518_v49 = vmax.f32 %v510_v39, %v514_v40  ;;  %v650_v50 = vsel %vm237_vm0, %v5289_v44, 0.0 }
 0x136   :  { %v574_v47 = vrot.slane %v496_v42, 1  ;;  %v623_v48 = vsel %vm601_vm1, %v474_v41, %v496_v42  ;;  %v578_v51 = vrot.slane %v496_v42, 2  ;;  %651 = vadd.xlane.f32.xlu1 %v650_v50  ;;  %4388 = vmatpush3.bf16.msra.mxu1 %v4788_v25 }
 0x137   :  { %v532_v53 = vmax.f32 %v530_v46, %v374_v31  ;;  %v584_v58 = vrot.slane %v518_v49, 4 }
 0x138   :  { %v625_v54 = vsel %vm604_vm2, %v623_v48, %v574_v47 }
 0x139   :  { %v534_v55 = vmax.f32 %v532_v53, %v514_v40  ;;  %v627_v45 = vsel %vm607_vm3, %v625_v54, %v578_v51  ;;  %v4146_v40 = vld [vmem:[%s6052_s17] ss:$0 sm:$0xff] }
 0x13a   :  { %v629_v62 = vsel %vm610_vm4, %v627_v45, %v584_v58 }
 0x13b   :  { %v540_v59 = vmax.f32 %v534_v55, %v536_v57 }
 0x13d   :  { %v590_v60 = vrot.slane %v540_v59, 4  ;;  %v594_v61 = vrot.slane %v540_v59, 5  ;;  %v598_v63 = vrot.slane %v540_v59, 6 }
 0x13f   :  { %v631_v0 = vsel %vm613_vm5, %v629_v62, %v590_v60  ;;  %v5036_v62 = vmov 0.0  }
 0x140   :  { %v633_v1 = vsel %vm616_vm6, %v631_v0, %v594_v61  ;;  %4393 = vmatprep.subr.bf16.mxu1 %v5036_v62  ;;  %4471 = vmatprep.subr.bf16.mxu0 %v5036_v62 }
 0x141   :  { %v635_v2 = vsel %vm619_vm7, %v633_v1, %v598_v63  ;;  %4473 = vmatprep.mubr.msk.bf16.mxu0 %vm5037_vm8, %v5036_v62 }
 0x142   :  { %v5301_v3 = vadd.f32 %v5273_v43, %v635_v2 }
 0x144   :  { %v653_v4 = vsel %vm237_vm0, %v5301_v3, 0.0 }
 0x145   :  { %654 = vadd.xlane.f32.xlu1 %v653_v4 }
 0x19f   :  { %v646_v5 = vpop.xlane.xlu0 %645 }
 0x1a0   :  { %v657_v6 = vmul.f32 0.03125, %v646_v5 }
 0x1a2   :  { %v661_v7 = vsub.f32 %v5260_v56, %v657_v6 }
 0x1a4   :  { %v665_v8 = vmul.f32 %v661_v7, %v661_v7 }
 0x1a6   :  { %v669_v9 = vsel %vm237_vm0, %v665_v8, 0.0 }
 0x1a7   :  { %670 = vadd.xlane.f32.xlu0 %v669_v9 }
 0x1b0   :  { %v649_v10 = vpop.xlane.xlu0 %648 }
 0x1b1   :  { %v658_v11 = vmul.f32 0.03125, %v649_v10 }
 0x1b3   :  { %v662_v12 = vsub.f32 %v5277_v52, %v658_v11 }
 0x1b5   :  { %v666_v13 = vmul.f32 %v662_v12, %v662_v12 }
 0x1b7   :  { %v672_v43 = vsel %vm237_vm0, %v666_v13, 0.0 }
 0x1b8   :  { %673 = vadd.xlane.f32.xlu1 %v672_v43 }
 0x1bf   :  { %v652_v14 = vpop.xlane.xlu1 %651 }
 0x1c0   :  { %v659_v15 = vmul.f32 0.03125, %v652_v14 }
 0x1c2   :  { %v663_v16 = vsub.f32 %v5289_v44, %v659_v15 }
 0x1c4   :  { %v667_v17 = vmul.f32 %v663_v16, %v663_v16 }
 0x1c6   :  { %v675_v18 = vsel %vm237_vm0, %v667_v17, 0.0 }
 0x1c7   :  { %676 = vadd.xlane.f32.xlu0 %v675_v18 }
 0x1ce   :  { %v655_v19 = vpop.xlane.xlu1 %654 }
 0x1cf   :  { %v660_v20 = vmul.f32 0.03125, %v655_v19 }
 0x1d1   :  { %v664_v21 = vsub.f32 %v5301_v3, %v660_v20 }
 0x1d3   :  { %v668_v22 = vmul.f32 %v664_v21, %v664_v21 }
 0x1d5   :  { %v678_v23 = vsel %vm237_vm0, %v668_v22, 0.0 }
 0x1d6   :  { %679 = vadd.xlane.f32.xlu1 %v678_v23 }
 0x230   :  { %v671_v26 = vpop.xlane.xlu0 %670 }
 0x231   :  { %v681_v27 = vmul.f32 0.03125, %v671_v26 }
 0x233   :  { %v685_v28 = vadd.f32 1e-05, %v681_v27 }
 0x235   :  { %4817 = vrsqrt.f32 %v685_v28 }
 0x241   :  { %v674_v29 = vpop.xlane.xlu1 %673 }
 0x242   :  { %v682_v30 = vmul.f32 0.03125, %v674_v29  ;;  %v4818_v32 = vpop.eup %4817 }
 0x243   :  { %v693_v33 = vmul.f32 %v4818_v32, %v661_v7 }
 0x244   :  { %v686_v31 = vadd.f32 1e-05, %v682_v30 }
 0x245   :  { %v703_v39 = vmul.f32 %v4145_v35, %v693_v33 }
 0x246   :  { %4819 = vrsqrt.f32 %v686_v31 }
 0x247   :  { %v713_v46 = vadd.f32 %v4146_v40, %v703_v39 }
 0x250   :  { %v677_v34 = vpop.xlane.xlu0 %676 }
 0x251   :  { %v683_v37 = vmul.f32 0.03125, %v677_v34 }
 0x253   :  { %v4820_v36 = vpop.eup %4819  ;;  %v687_v42 = vadd.f32 1e-05, %v683_v37 }
 0x254   :  { %v694_v38 = vmul.f32 %v4820_v36, %v662_v12 }
 0x255   :  { %4821 = vrsqrt.f32 %v687_v42 }
 0x256   :  { %v704_v41 = vmul.f32 %v4145_v35, %v694_v38 }
 0x258   :  { %v714_v47 = vadd.f32 %v4146_v40, %v704_v41 }
 0x25a   :  { %v717_v48 = vpack.c.bf16 %v714_v47, %v713_v46 }
 0x25c   :  { %4389 = vmatprep.mubr.msk.bf16.mxu1 %vm237_vm0, %v717_v48 }
 0x25f   :  { %v680_v49 = vpop.xlane.xlu1 %679 }
 0x260   :  { %v684_v50 = vmul.f32 0.03125, %v680_v49 }
 0x262   :  { %v688_v51 = vadd.f32 1e-05, %v684_v50  ;;  %v4822_v53 = vpop.eup %4821 }
 0x263   :  { %v695_v54 = vmul.f32 %v4822_v53, %v663_v16 }
 0x264   :  { %4823 = vrsqrt.f32 %v688_v51 }
 0x265   :  { %v705_v58 = vmul.f32 %v4145_v35, %v695_v54 }
 0x267   :  { %v715_v45 = vadd.f32 %v4146_v40, %v705_v58 }
 0x271   :  { %v4824_v55 = vpop.eup %4823 }
 0x272   :  { %v696_v57 = vmul.f32 %v4824_v55, %v664_v21 }
 0x274   :  { %v706_v59 = vmul.f32 %v4145_v35, %v696_v57 }
 0x276   :  { %v716_v60 = vadd.f32 %v4146_v40, %v706_v59 }
 0x278   :  { %v718_v61 = vpack.c.bf16 %v716_v60, %v715_v45 }
 0x27a   :  { %4390 = vmatmul.mubr.msk.bf16.vlgmr.msra.gmra.mxu1 %vm237_vm0, %v718_v61 }
 0x27b   :  { %4395 = vmatprep.mubr.msk.bf16.mxu1 %vm5037_vm8, %v5036_v62 }
 0x33a   :  { %v4391_v63 = vpop.f32.mrf.mxu1 }
 0x33c   :  { %v775_v0 = vpop.f32.mrf.mxu1 }
 0x33e   :  { %v4392_v1 = vpop.f32.mrf.mxu1 }
 0x33f   :  { %v5333_v2 = vpack.c.bf16 %v4392_v1, %v4391_v63 }
 0x340   :  { %v778_v4 = vpop.f32.mrf.mxu1 }
 0x341   :  { %v5335_v5 = vpack.c.bf16 %v778_v4, %v775_v0  ;;  %844 = vrot.lane.b32.xlu1 %v5333_v2, %s5038_s28 }
 0x343   :  { %793 = vrot.lane.b32.xlu0 %v5335_v5, %s5038_s28 }
 0x3b3   :  { %v845_v8 = vpop.permute.xlu1 %844 }
 0x3b4   :  { %v850_v9 = vsel %vm795_vm9, %v845_v8, 0 }
 0x3b5   :  { %v794_v6 = vpop.permute.xlu0 %793 }
 0x3b6   :  { %v800_v7 = vsel %vm795_vm9, %v794_v6, 0 }
 0x3b7   :  { %4394 = vmatpush3.bf16.xpose.msra.mxu1 %v800_v7 }
 0x3b8   :  { %4399 = vmatprep.subr.bf16.mxu1 %v5036_v62 }
 0x3be   :  { %4396 = vmatmul.mubr.msk.bf16.vlgmr.msra.gmra.mxu1 %vm795_vm9, %v5335_v5 }
 0x3bf   :  { %4400 = vmatpush3.bf16.xpose.msra.mxu1 %v850_v9  ;;  %4401 = vmatprep.mubr.msk.bf16.mxu1 %vm5037_vm8, %v5036_v62 }
 0x3c0   :  { %4405 = vmatprep.subr.bf16.mxu1 %v5036_v62 }
 0x3c6   :  { %4402 = vmatmul.mubr.msk.bf16.vlgmr.msra.gmra.mxu1 %vm795_vm9, %v5333_v2 }
 0x3c7   :  { %4407 = vmatprep.mubr.msk.bf16.mxu1 %vm5037_vm8, %v5036_v62 }
 0x47e   :  { %v836_v10 = vpop.f32.mrf.mxu1 }
 0x47f   :  { %v894_v11 = vsel %vm893_vm10, %v836_v10, -inf }
 0x480   :  { %895 = vmax.xlane.f32.xlu1 %v894_v11  ;;  %v4397_v12 = vpop.f32.mrf.mxu1 }
 0x482   :  { %v839_v13 = vpop.f32.mrf.mxu1 }
 0x483   :  { %v897_v43 = vsel %vm893_vm10, %v839_v13, -inf }
 0x484   :  { %898 = vmax.xlane.f32.xlu0 %v897_v43  ;;  %v4398_v14 = vpop.f32.mrf.mxu1 }
 0x486   :  { %v886_v15 = vpop.f32.mrf.mxu1 }
 0x487   :  { %v900_v16 = vsel %vm893_vm10, %v886_v15, -inf }
 0x488   :  { %901 = vmax.xlane.f32.xlu0 %v900_v16  ;;  %v4403_v17 = vpop.f32.mrf.mxu1 }
 0x48a   :  { %v889_v18 = vpop.f32.mrf.mxu1 }
 0x48b   :  { %v903_v19 = vsel %vm893_vm10, %v889_v18, -inf }
 0x48c   :  { %904 = vmax.xlane.f32.xlu1 %v903_v19  ;;  %v4404_v20 = vpop.f32.mrf.mxu1 }
 0x509   :  { %v896_v21 = vpop.xlane.xlu1 %895 }
 0x50a   :  { %v906_v22 = vsub.f32 %v836_v10, %v896_v21 }
 0x50c   :  { %v910_v23 = vmul.f32 1.442695, %v906_v22 }
 0x50d   :  { %v899_v24 = vpop.xlane.xlu0 %898 }
 0x50e   :  { %4825 = vpow2.f32 %v910_v23  ;;  %v907_v25 = vsub.f32 %v839_v13, %v899_v24 }
 0x510   :  { %v912_v26 = vmul.f32 1.442695, %v907_v25 }
 0x511   :  { %v902_v27 = vpop.xlane.xlu0 %901 }
 0x512   :  { %4827 = vpow2.f32 %v912_v26  ;;  %v908_v28 = vsub.f32 %v886_v15, %v902_v27 }
 0x514   :  { %v914_v29 = vmul.f32 1.442695, %v908_v28 }
 0x515   :  { %v905_v36 = vpop.xlane.xlu1 %904 }
 0x516   :  { %4829 = vpow2.f32 %v914_v29  ;;  %v909_v37 = vsub.f32 %v889_v18, %v905_v36 }
 0x518   :  { %v916_v38 = vmul.f32 1.442695, %v909_v37 }
 0x51a   :  { %4831 = vpow2.f32 %v916_v38 }
 0x51b   :  { %v4826_v30 = vpop.eup %4825 }
 0x51c   :  { %v918_v31 = vsel %vm893_vm10, %v4826_v30, 0.0 }
 0x51d   :  { %919 = vadd.xlane.f32.xlu0 %v918_v31 }
 0x51f   :  { %v4828_v32 = vpop.eup %4827 }
 0x520   :  { %v921_v33 = vsel %vm893_vm10, %v4828_v32, 0.0 }
 0x521   :  { %922 = vadd.xlane.f32.xlu1 %v921_v33 }
 0x523   :  { %v4830_v34 = vpop.eup %4829 }
 0x524   :  { %v924_v35 = vsel %vm893_vm10, %v4830_v34, 0.0 }
 0x525   :  { %925 = vadd.xlane.f32.xlu0 %v924_v35 }
 0x527   :  { %v4832_v39 = vpop.eup %4831 }
 0x528   :  { %v927_v40 = vsel %vm893_vm10, %v4832_v39, 0.0 }
 0x532   :  { %987 = vrot.lane.b32.xlu1 %v5333_v2, %s5039_s30 }
 0x53b   :  { %940 = vrot.lane.b32.xlu0 %v5335_v5, %s5039_s30 }
 0x53f   :  { %1087 = vrot.lane.b32.xlu0 %v5333_v2, %s5040_s4 }
 0x556   :  { %928 = vadd.xlane.f32.xlu1 %v927_v40 }
 0x567   :  { %1036 = vrot.lane.b32.xlu1 %v5335_v5, %s5040_s4 }
 0x56b   :  { %1034 = vrot.lane.b32.xlu1 %v5335_v5, %s5041_s29 }
 0x56f   :  { %1085 = vrot.lane.b32.xlu1 %v5333_v2, %s5041_s29 }
 0x5a6   :  { %v920_v41 = vpop.xlane.xlu0 %919 }
 0x5a7   :  { %4833 = vrcp.f32 %v920_v41 }
 0x5aa   :  { %v923_v42 = vpop.xlane.xlu1 %922 }
 0x5ab   :  { %4835 = vrcp.f32 %v923_v42 }
 0x5ae   :  { %v926_v46 = vpop.xlane.xlu0 %925  ;;  %v988_v54 = vpop.permute.xlu1 %987 }
 0x5af   :  { %4837 = vrcp.f32 %v926_v46 }
 0x5b2   :  { %v941_v47 = vpop.permute.xlu0 %940 }
 0x5b3   :  { %4406 = vmatpush3.bf16.msra.mxu1 %v941_v47 }
 0x5b4   :  { %4411 = vmatprep.subr.bf16.mxu1 %v5036_v62  ;;  %v4834_v48 = vpop.eup %4833 }
 0x5b5   :  { %v931_v50 = vmul.f32 %v4834_v48, %v4826_v30 }
 0x5b6   :  { %v1088_v0 = vpop.permute.xlu0 %1087 }
 0x5b7   :  { %v1093_v4 = vsel %vm795_vm9, %v1088_v0, 0 }
 0x5b8   :  { %v4836_v49 = vpop.eup %4835 }
 0x5b9   :  { %v933_v51 = vmul.f32 %v4836_v49, %v4828_v32 }
 0x5bb   :  { %v938_v53 = vpack.c.bf16 %v933_v51, %v931_v50 }
 0x5bc   :  { %v4838_v57 = vpop.eup %4837 }
 0x5bd   :  { %4408 = vmatmul.mubr.msk.bf16.vlgmr.msra.gmra.mxu1 %vm893_vm10, %v938_v53  ;;  %v935_v59 = vmul.f32 %v4838_v57, %v4830_v34 }
 0x5be   :  { %4412 = vmatpush3.bf16.msra.mxu1 %v988_v54  ;;  %4413 = vmatprep.mubr.msk.bf16.mxu1 %vm5037_vm8, %v5036_v62 }
 0x5bf   :  { %4417 = vmatprep.subr.bf16.mxu1 %v5036_v62 }
 0x5df   :  { %v929_v55 = vpop.xlane.xlu1 %928 }
 0x5e0   :  { %4839 = vrcp.f32 %v929_v55 }
 0x5e3   :  { %v1037_v60 = vpop.permute.xlu1 %1036 }
 0x5e4   :  { %v1042_v63 = vsel %vm795_vm9, %v1037_v60, 0 }
 0x5e7   :  { %v1035_v1 = vpop.permute.xlu1 %1034 }
 0x5eb   :  { %v1086_v6 = vpop.permute.xlu1 %1085 }
 0x5ed   :  { %v4840_v58 = vpop.eup %4839 }
 0x5ee   :  { %v937_v45 = vmul.f32 %v4840_v58, %v4832_v39 }
 0x5f0   :  { %v939_v61 = vpack.c.bf16 %v937_v45, %v935_v59 }
 0x5f2   :  { %4414 = vmatmul.mubr.msk.bf16.vlgmr.msra.gmra.mxu1 %vm893_vm10, %v939_v61 }
 0x5f3   :  { %4418 = vmatpush3.bf16.xpose.msra.mxu1 %v1042_v63  ;;  %4419 = vmatprep.mubr.msk.bf16.mxu1 %vm5037_vm8, %v5036_v62 }
 0x5f4   :  { %4423 = vmatprep.subr.bf16.mxu1 %v5036_v62 }
 0x5fa   :  { %4420 = vmatmul.mubr.msk.bf16.vlgmr.msra.gmra.mxu1 %vm795_vm9, %v1035_v1 }
 0x5fb   :  { %4424 = vmatpush3.bf16.xpose.msra.mxu1 %v1093_v4  ;;  %4425 = vmatprep.mubr.msk.bf16.mxu1 %vm5037_vm8, %v5036_v62 }
 0x5fc   :  { %4429 = vmatprep.subr.bf16.mxu1 %v5036_v62 }
 0x602   :  { %4426 = vmatmul.mubr.msk.bf16.vlgmr.msra.gmra.mxu1 %vm795_vm9, %v1086_v6 }
 0x603   :  { %4431 = vmatprep.mubr.msk.bf16.mxu1 %vm5037_vm8, %v5036_v62 }
 0x67d   :  { %v5391_v7 = vpop.f32.mrf.mxu1 }
 0x67f   :  { %v4409_v8 = vpop.f32.mrf.mxu1 }
 0x681   :  { %v5393_v9 = vpop.f32.mrf.mxu1 }
 0x683   :  { %v4410_v10 = vpop.f32.mrf.mxu1 }
 0x6b2   :  { %v5395_v11 = vpop.f32.mrf.mxu1 }
 0x6b4   :  { %v4415_v12 = vpop.f32.mrf.mxu1 }
 0x6b6   :  { %v5397_v13 = vpop.f32.mrf.mxu1 }
 0x6b8   :  { %v4416_v43 = vpop.f32.mrf.mxu1 }
 0x6ba   :  { %v1078_v14 = vpop.f32.mrf.mxu1 }
 0x6bb   :  { %v1136_v15 = vsel %vm893_vm10, %v1078_v14, -inf }
 0x6bc   :  { %1137 = vmax.xlane.f32.xlu0 %v1136_v15  ;;  %v4421_v16 = vpop.f32.mrf.mxu1 }
 0x6be   :  { %v1081_v17 = vpop.f32.mrf.mxu1 }
 0x6bf   :  { %v1139_v18 = vsel %vm893_vm10, %v1081_v17, -inf }
 0x6c0   :  { %1140 = vmax.xlane.f32.xlu1 %v1139_v18  ;;  %v4422_v19 = vpop.f32.mrf.mxu1 }
 0x6c2   :  { %v1129_v20 = vpop.f32.mrf.mxu1 }
 0x6c3   :  { %v1142_v21 = vsel %vm893_vm10, %v1129_v20, -inf }
 0x6c4   :  { %1143 = vmax.xlane.f32.xlu0 %v1142_v21  ;;  %v4427_v22 = vpop.f32.mrf.mxu1 }
 0x6c6   :  { %v1132_v23 = vpop.f32.mrf.mxu1 }
 0x6c7   :  { %v1145_v24 = vsel %vm893_vm10, %v1132_v23, -inf }
 0x6c8   :  { %1146 = vmax.xlane.f32.xlu0 %v1145_v24  ;;  %v4428_v25 = vpop.f32.mrf.mxu1 }
 0x745   :  { %v1138_v26 = vpop.xlane.xlu0 %1137 }
 0x746   :  { %v1148_v27 = vsub.f32 %v1078_v14, %v1138_v26 }
 0x748   :  { %v1152_v28 = vmul.f32 1.442695, %v1148_v27 }
 0x749   :  { %v1141_v29 = vpop.xlane.xlu1 %1140 }
 0x74a   :  { %4841 = vpow2.f32 %v1152_v28  ;;  %v1149_v30 = vsub.f32 %v1081_v17, %v1141_v29 }
 0x74c   :  { %v1154_v31 = vmul.f32 1.442695, %v1149_v30 }
 0x74d   :  { %v1144_v32 = vpop.xlane.xlu0 %1143 }
 0x74e   :  { %4843 = vpow2.f32 %v1154_v31  ;;  %v1150_v33 = vsub.f32 %v1129_v20, %v1144_v32 }
 0x750   :  { %v1156_v34 = vmul.f32 1.442695, %v1150_v33 }
 0x751   :  { %v1147_v41 = vpop.xlane.xlu0 %1146 }
 0x752   :  { %4845 = vpow2.f32 %v1156_v34  ;;  %v1151_v42 = vsub.f32 %v1132_v23, %v1147_v41 }
 0x754   :  { %v1158_v46 = vmul.f32 1.442695, %v1151_v42 }
 0x756   :  { %4847 = vpow2.f32 %v1158_v46 }
 0x757   :  { %v4842_v35 = vpop.eup %4841 }
 0x758   :  { %v1160_v36 = vsel %vm893_vm10, %v4842_v35, 0.0 }
 0x759   :  { %1161 = vadd.xlane.f32.xlu0 %v1160_v36 }
 0x75b   :  { %v4844_v37 = vpop.eup %4843 }
 0x75c   :  { %v1163_v38 = vsel %vm893_vm10, %v4844_v37, 0.0 }
 0x75d   :  { %1164 = vadd.xlane.f32.xlu1 %v1163_v38 }
 0x75f   :  { %v4846_v39 = vpop.eup %4845 }
 0x760   :  { %v1166_v40 = vsel %vm893_vm10, %v4846_v39, 0.0 }
 0x761   :  { %1167 = vadd.xlane.f32.xlu0 %v1166_v40 }
 0x763   :  { %v4848_v47 = vpop.eup %4847 }
 0x764   :  { %v1169_v48 = vsel %vm893_vm10, %v4848_v47, 0.0 }
 0x76e   :  { %1229 = vrot.lane.b32.xlu1 %v5333_v2, %s5042_s0 }
 0x777   :  { %1182 = vrot.lane.b32.xlu0 %v5335_v5, %s5042_s0 }
 0x77b   :  { %1329 = vrot.lane.b32.xlu0 %v5333_v2, %s5043_s21 }
 0x792   :  { %1170 = vadd.xlane.f32.xlu1 %v1169_v48 }
 0x7a3   :  { %1278 = vrot.lane.b32.xlu1 %v5335_v5, %s5043_s21 }
 0x7a7   :  { %1276 = vrot.lane.b32.xlu1 %v5335_v5, %s6041_s1 }
 0x7ab   :  { %1327 = vrot.lane.b32.xlu1 %v5333_v2, %s6041_s1 }
 0x7e2   :  { %v1162_v49 = vpop.xlane.xlu0 %1161 }
 0x7e3   :  { %4849 = vrcp.f32 %v1162_v49 }
 0x7e6   :  { %v1165_v50 = vpop.xlane.xlu1 %1164 }
 0x7e7   :  { %4851 = vrcp.f32 %v1165_v50 }
 0x7ea   :  { %v1168_v51 = vpop.xlane.xlu0 %1167  ;;  %v1230_v45 = vpop.permute.xlu1 %1229 }
 0x7eb   :  { %4853 = vrcp.f32 %v1168_v51 }
 0x7ee   :  { %v1183_v53 = vpop.permute.xlu0 %1182 }
 0x7ef   :  { %4430 = vmatpush3.bf16.msra.mxu1 %v1183_v53 }
 0x7f0   :  { %4435 = vmatprep.subr.bf16.mxu1 %v5036_v62  ;;  %v4850_v54 = vpop.eup %4849 }
 0x7f1   :  { %v1173_v57 = vmul.f32 %v4850_v54, %v4842_v35 }
 0x7f2   :  { %v1330_v10 = vpop.permute.xlu0 %1329 }
 0x7f3   :  { %v1335_v43 = vsel %vm795_vm9, %v1330_v10, 0 }
 0x7f4   :  { %v4852_v55 = vpop.eup %4851 }
 0x7f5   :  { %v1175_v58 = vmul.f32 %v4852_v55, %v4844_v37 }
 0x7f7   :  { %v1180_v59 = vpack.c.bf16 %v1175_v58, %v1173_v57 }
 0x7f8   :  { %v4854_v61 = vpop.eup %4853 }
 0x7f9   :  { %4432 = vmatmul.mubr.msk.bf16.vlgmr.msra.gmra.mxu1 %vm893_vm10, %v1180_v59  ;;  %v1177_v0 = vmul.f32 %v4854_v61, %v4846_v39 }
 0x7fa   :  { %4436 = vmatpush3.bf16.msra.mxu1 %v1230_v45  ;;  %4437 = vmatprep.mubr.msk.bf16.mxu1 %vm5037_vm8, %v5036_v62 }
 0x7fb   :  { %4441 = vmatprep.subr.bf16.mxu1 %v5036_v62 }
 0x81b   :  { %v1171_v60 = vpop.xlane.xlu1 %1170 }
 0x81c   :  { %4855 = vrcp.f32 %v1171_v60 }
 0x81f   :  { %v1279_v4 = vpop.permute.xlu1 %1278 }
 0x820   :  { %v1284_v8 = vsel %vm795_vm9, %v1279_v4, 0 }
 0x823   :  { %v1277_v12 = vpop.permute.xlu1 %1276 }
 0x827   :  { %v1328_v14 = vpop.permute.xlu1 %1327 }
 0x829   :  { %v4856_v63 = vpop.eup %4855 }
 0x82a   :  { %v1179_v1 = vmul.f32 %v4856_v63, %v4848_v47 }
 0x82c   :  { %v1181_v6 = vpack.c.bf16 %v1179_v1, %v1177_v0 }
 0x82e   :  { %4438 = vmatmul.mubr.msk.bf16.vlgmr.msra.gmra.mxu1 %vm893_vm10, %v1181_v6 }
 0x82f   :  { %4442 = vmatpush3.bf16.xpose.msra.mxu1 %v1284_v8  ;;  %4443 = vmatprep.mubr.msk.bf16.mxu1 %vm5037_vm8, %v5036_v62 }
 0x830   :  { %4447 = vmatprep.subr.bf16.mxu1 %v5036_v62 }
 0x836   :  { %4444 = vmatmul.mubr.msk.bf16.vlgmr.msra.gmra.mxu1 %vm795_vm9, %v1277_v12 }
 0x837   :  { %4448 = vmatpush3.bf16.xpose.msra.mxu1 %v1335_v43  ;;  %4449 = vmatprep.mubr.msk.bf16.mxu1 %vm5037_vm8, %v5036_v62 }
 0x838   :  { %4453 = vmatprep.subr.bf16.mxu1 %v5036_v62 }
 0x83e   :  { %4450 = vmatmul.mubr.msk.bf16.vlgmr.msra.gmra.mxu1 %vm795_vm9, %v1328_v14 }
 0x83f   :  { %4455 = vmatprep.mubr.msk.bf16.mxu1 %vm5037_vm8, %v5036_v62 }
 0x8b9   :  { %v5437_v15 = vpop.f32.mrf.mxu1 }
 0x8bb   :  { %v4433_v16 = vpop.f32.mrf.mxu1 }
 0x8bd   :  { %v5439_v17 = vpop.f32.mrf.mxu1 }
 0x8be   :  { %v4691_v18 = vpack.i.bf16 %v5439_v17, %v5437_v15 }
 0x8bf   :  { %v4434_v19 = vpop.f32.mrf.mxu1 }
 0x8ee   :  { %v5443_v20 = vpop.f32.mrf.mxu1 }
 0x8f0   :  { %v4439_v21 = vpop.f32.mrf.mxu1 }
 0x8f2   :  { %v5445_v22 = vpop.f32.mrf.mxu1 }
 0x8f3   :  { %v4696_v23 = vpack.i.bf16 %v5445_v22, %v5443_v20 }
 0x8f4   :  { %v4440_v24 = vpop.f32.mrf.mxu1 }
 0x8f6   :  { %v1320_v25 = vpop.f32.mrf.mxu1 }
 0x8f7   :  { %v1378_v26 = vsel %vm893_vm10, %v1320_v25, -inf }
 0x8f8   :  { %1379 = vmax.xlane.f32.xlu0 %v1378_v26  ;;  %v4445_v27 = vpop.f32.mrf.mxu1 }
 0x8fa   :  { %v1323_v28 = vpop.f32.mrf.mxu1 }
 0x8fb   :  { %v1381_v29 = vsel %vm893_vm10, %v1323_v28, -inf }
 0x8fc   :  { %1382 = vmax.xlane.f32.xlu1 %v1381_v29  ;;  %v4446_v30 = vpop.f32.mrf.mxu1 }
 0x8fe   :  { %v1371_v31 = vpop.f32.mrf.mxu1 }
 0x8ff   :  { %v1384_v32 = vsel %vm893_vm10, %v1371_v31, -inf }
 0x900   :  { %1385 = vmax.xlane.f32.xlu0 %v1384_v32  ;;  %v4451_v33 = vpop.f32.mrf.mxu1 }
 0x902   :  { %v1374_v34 = vpop.f32.mrf.mxu1 }
 0x903   :  { %v1387_v35 = vsel %vm893_vm10, %v1374_v34, -inf }
 0x904   :  { %1388 = vmax.xlane.f32.xlu0 %v1387_v35  ;;  %v4452_v36 = vpop.f32.mrf.mxu1 }
 0x981   :  { %v1380_v37 = vpop.xlane.xlu0 %1379 }
 0x982   :  { %v1390_v38 = vsub.f32 %v1320_v25, %v1380_v37 }
 0x984   :  { %v1394_v39 = vmul.f32 1.442695, %v1390_v38 }
 0x985   :  { %v1383_v40 = vpop.xlane.xlu1 %1382 }
 0x986   :  { %4857 = vpow2.f32 %v1394_v39  ;;  %v1391_v41 = vsub.f32 %v1323_v28, %v1383_v40 }
 0x988   :  { %v1396_v42 = vmul.f32 1.442695, %v1391_v41 }
 0x989   :  { %v1386_v46 = vpop.xlane.xlu0 %1385 }
 0x98a   :  { %4859 = vpow2.f32 %v1396_v42  ;;  %v1392_v47 = vsub.f32 %v1371_v31, %v1386_v46 }
 0x98c   :  { %v1398_v48 = vmul.f32 1.442695, %v1392_v47 }
 0x98d   :  { %v1389_v57 = vpop.xlane.xlu0 %1388 }
 0x98e   :  { %4861 = vpow2.f32 %v1398_v48  ;;  %v1393_v58 = vsub.f32 %v1374_v34, %v1389_v57 }
 0x990   :  { %v1400_v59 = vmul.f32 1.442695, %v1393_v58 }
 0x992   :  { %4863 = vpow2.f32 %v1400_v59 }
 0x993   :  { %v4858_v49 = vpop.eup %4857 }
 0x994   :  { %v1402_v50 = vsel %vm893_vm10, %v4858_v49, 0.0 }
 0x995   :  { %1403 = vadd.xlane.f32.xlu0 %v1402_v50 }
 0x997   :  { %v4860_v51 = vpop.eup %4859 }
 0x998   :  { %v1405_v53 = vsel %vm893_vm10, %v4860_v51, 0.0 }
 0x999   :  { %1406 = vadd.xlane.f32.xlu1 %v1405_v53 }
 0x99b   :  { %v4862_v54 = vpop.eup %4861 }
 0x99c   :  { %v1408_v55 = vsel %vm893_vm10, %v4862_v54, 0.0 }
 0x99d   :  { %1409 = vadd.xlane.f32.xlu0 %v1408_v55 }
 0x99f   :  { %v4864_v45 = vpop.eup %4863 }
 0x9a0   :  { %v1411_v60 = vsel %vm893_vm10, %v4864_v45, 0.0 }
 0x9aa   :  { %1471 = vrot.lane.b32.xlu1 %v5333_v2, %s6039_s22 }
 0x9ae   :  { %1520 = vrot.lane.b32.xlu1 %v5335_v5, %s6037_s2 }
 0x9b3   :  { %1424 = vrot.lane.b32.xlu0 %v5335_v5, %s6039_s22 }
 0x9b7   :  { %1518 = vrot.lane.b32.xlu0 %v5335_v5, %s6033_s23 }
 0x9d2   :  { %1412 = vadd.xlane.f32.xlu1 %v1411_v60 }
 0x9e3   :  { %1571 = vrot.lane.b32.xlu1 %v5333_v2, %s6037_s2  ;;  %s6060_s2 = smov 24  }
 0x9e7   :  { %1569 = vrot.lane.b32.xlu1 %v5333_v2, %s6033_s23  ;;  %s6035_s23 = smov 24  }
 0xa1e   :  { %v1404_v61 = vpop.xlane.xlu0 %1403 }
 0xa1f   :  { %4865 = vrcp.f32 %v1404_v61 }
 0xa22   :  { %v1407_v63 = vpop.xlane.xlu1 %1406 }
 0xa23   :  { %4867 = vrcp.f32 %v1407_v63 }
 0xa26   :  { %v1410_v0 = vpop.xlane.xlu0 %1409  ;;  %v1472_v43 = vpop.permute.xlu1 %1471 }
 0xa27   :  { %4869 = vrcp.f32 %v1410_v0 }
 0xa2a   :  { %v1425_v1 = vpop.permute.xlu0 %1424  ;;  %v1521_v14 = vpop.permute.xlu1 %1520 }
 0xa2b   :  { %4454 = vmatpush3.bf16.msra.mxu1 %v1425_v1  ;;  %v1526_v30 = vsel %vm795_vm9, %v1521_v14, 0 }
 0xa2c   :  { %4459 = vmatprep.subr.bf16.mxu1 %v5036_v62  ;;  %v4866_v4 = vpop.eup %4865 }
 0xa2d   :  { %v1415_v8 = vmul.f32 %v4866_v4, %v4858_v49 }
 0xa2e   :  { %v1519_v31 = vpop.permute.xlu0 %1518 }
 0xa30   :  { %v4868_v6 = vpop.eup %4867 }
 0xa31   :  { %v1417_v10 = vmul.f32 %v4868_v6, %v4860_v51 }
 0xa33   :  { %v1422_v12 = vpack.c.bf16 %v1417_v10, %v1415_v8 }
 0xa34   :  { %v4870_v24 = vpop.eup %4869 }
 0xa35   :  { %4456 = vmatmul.mubr.msk.bf16.vlgmr.msra.gmra.mxu1 %vm893_vm10, %v1422_v12  ;;  %v1419_v27 = vmul.f32 %v4870_v24, %v4862_v54 }
 0xa36   :  { %4460 = vmatpush3.bf16.msra.mxu1 %v1472_v43  ;;  %4461 = vmatprep.mubr.msk.bf16.mxu1 %vm5037_vm8, %v5036_v62 }
 0xa37   :  { %4465 = vmatprep.subr.bf16.mxu1 %v5036_v62 }
 0xa5b   :  { %v1413_v16 = vpop.xlane.xlu1 %1412 }
 0xa5c   :  { %4871 = vrcp.f32 %v1413_v16 }
 0xa5f   :  { %v1572_v19 = vpop.permute.xlu1 %1571 }
 0xa60   :  { %v1577_v21 = vsel %vm795_vm9, %v1572_v19, 0 }
 0xa61   :  { %4472 = vmatpush3.bf16.xpose.msra.mxu0 %v1577_v21 }
 0xa62   :  { %4483 = vmatprep.subr.bf16.mxu0 %v5036_v62 }
 0xa63   :  { %v1570_v25 = vpop.permute.xlu1 %1569 }
 0xa68   :  { %4474 = vmatmul.mubr.msk.bf16.vlgmr.msra.gmra.mxu0 %vm795_vm9, %v1570_v25 }
 0xa69   :  { %v4872_v26 = vpop.eup %4871  ;;  %4485 = vmatprep.mubr.msk.bf16.mxu0 %vm5037_vm8, %v5036_v62 }
 0xa6a   :  { %v1421_v28 = vmul.f32 %v4872_v26, %v4864_v45 }
 0xa6c   :  { %v1423_v29 = vpack.c.bf16 %v1421_v28, %v1419_v27 }
 0xa6e   :  { %4462 = vmatmul.mubr.msk.bf16.vlgmr.msra.gmra.mxu1 %vm893_vm10, %v1423_v29 }
 0xa6f   :  { %4466 = vmatpush3.bf16.xpose.msra.mxu1 %v1526_v30  ;;  %4467 = vmatprep.mubr.msk.bf16.mxu1 %vm5037_vm8, %v5036_v62 }
 0xa70   :  { %4477 = vmatprep.subr.bf16.mxu1 %v5036_v62 }
 0xa76   :  { %4468 = vmatmul.mubr.msk.bf16.vlgmr.msra.gmra.mxu1 %vm795_vm9, %v1519_v31 }
 0xa77   :  { %4479 = vmatprep.mubr.msk.bf16.mxu1 %vm5037_vm8, %v5036_v62 }
 0xaf5   :  { %v1464_v32 = vpop.f32.mrf.mxu1 }
 0xaf7   :  { %v4457_v33 = vpop.f32.mrf.mxu1 }
 0xaf9   :  { %v1467_v34 = vpop.f32.mrf.mxu1 }
 0xafa   :  { %v4701_v35 = vpack.i.bf16 %v1467_v34, %v1464_v32 }
 0xafb   :  { %v4458_v36 = vpop.f32.mrf.mxu1 }
 0xb28   :  { %v1613_v37 = vpop.f32.mrf.mxu0 }
 0xb29   :  { %v1626_v55 = vsel %vm893_vm10, %v1613_v37, -inf }
 0xb2a   :  { %v4475_v38 = vpop.f32.mrf.mxu0 }
 0xb2c   :  { %v1616_v39 = vpop.f32.mrf.mxu0 }
 0xb2d   :  { %v1629_v58 = vsel %vm893_vm10, %v1616_v39, -inf }
 0xb2e   :  { %v1511_v40 = vpop.f32.mrf.mxu1  ;;  %v4476_v41 = vpop.f32.mrf.mxu0 }
 0xb30   :  { %v4463_v42 = vpop.f32.mrf.mxu1 }
 0xb32   :  { %v1514_v46 = vpop.f32.mrf.mxu1 }
 0xb33   :  { %v4706_v47 = vpack.i.bf16 %v1514_v46, %v1511_v40 }
 0xb34   :  { %v4464_v48 = vpop.f32.mrf.mxu1 }
 0xb36   :  { %v1562_v49 = vpop.f32.mrf.mxu1 }
 0xb37   :  { %v1620_v50 = vsel %vm893_vm10, %v1562_v49, -inf }
 0xb38   :  { %1621 = vmax.xlane.f32.xlu0 %v1620_v50  ;;  %v4469_v51 = vpop.f32.mrf.mxu1 }
 0xb3a   :  { %v1565_v53 = vpop.f32.mrf.mxu1 }
 0xb3b   :  { %v1623_v54 = vsel %vm893_vm10, %v1565_v53, -inf }
 0xb3c   :  { %1624 = vmax.xlane.f32.xlu1 %v1623_v54  ;;  %v4470_v57 = vpop.f32.mrf.mxu1  ;;  %1627 = vmax.xlane.f32.xlu0 %v1626_v55 }
 0xb40   :  { %1630 = vmax.xlane.f32.xlu0 %v1629_v58 }
 0xbc1   :  { %v1622_v59 = vpop.xlane.xlu0 %1621 }
 0xbc2   :  { %v1632_v45 = vsub.f32 %v1562_v49, %v1622_v59 }
 0xbc4   :  { %v1636_v4 = vmul.f32 1.442695, %v1632_v45 }
 0xbc5   :  { %v1625_v60 = vpop.xlane.xlu1 %1624  ;;  %v1628_v61 = vpop.xlane.xlu0 %1627 }
 0xbc6   :  { %v1634_v63 = vsub.f32 %v1613_v37, %v1628_v61  ;;  %v1633_v0 = vsub.f32 %v1565_v53, %v1625_v60  ;;  %v4790_v37 = vld [vmem:[%s6007_s6] sm:$0xff]  }
 0xbc8   :  { %v1640_v1 = vmul.f32 1.442695, %v1634_v63  ;;  %v1638_v10 = vmul.f32 1.442695, %v1633_v0 }
 0xbc9   :  { %v1631_v6 = vpop.xlane.xlu0 %1630 }
 0xbca   :  { %v1635_v8 = vsub.f32 %v1616_v39, %v1631_v6  ;;  %4873 = vpow2.f32 %v1640_v1 }
 0xbcb   :  { %4875 = vpow2.f32 %v1636_v4 }
 0xbcc   :  { %v1642_v12 = vmul.f32 1.442695, %v1635_v8 }
 0xbce   :  { %4877 = vpow2.f32 %v1642_v12 }
 0xbcf   :  { %4879 = vpow2.f32 %v1638_v10 }
 0xbd7   :  { %v4874_v43 = vpop.eup %4873 }
 0xbd8   :  { %v1650_v14 = vsel %vm893_vm10, %v4874_v43, 0.0  ;;  %v4876_v16 = vpop.eup %4875 }
 0xbd9   :  { %1651 = vadd.xlane.f32.xlu0 %v1650_v14  ;;  %v1644_v25 = vsel %vm893_vm10, %v4876_v16, 0.0 }
 0xbdb   :  { %v4878_v19 = vpop.eup %4877 }
 0xbdc   :  { %v1653_v21 = vsel %vm893_vm10, %v4878_v19, 0.0  ;;  %v4880_v24 = vpop.eup %4879 }
 0xbdd   :  { %1654 = vadd.xlane.f32.xlu1 %v1653_v21  ;;  %1645 = vadd.xlane.f32.xlu0 %v1644_v25  ;;  %v1647_v26 = vsel %vm893_vm10, %v4880_v24, 0.0 }
 0xbe1   :  { %1648 = vadd.xlane.f32.xlu1 %v1647_v26 }
 0xbf2   :  { %1713 = vrot.lane.b32.xlu1 %v5333_v2, %s6031_s24 }
 0xbf3   :  { %1666 = vrot.lane.b32.xlu0 %v5335_v5, %s6031_s24 }
 0xbf6   :  { %4692 = vrot.lane.b32.xlu1 %v4691_v18, %s6029_s25 }
 0xbf7   :  { %4702 = vrot.lane.b32.xlu0 %v4701_v35, %s6027_s26  ;;  %v4789_v35 = vld [vmem:[%s6007_s6 + $0x8] sm:$0xff]  }
 0xbfa   :  { %4697 = vrot.lane.b32.xlu1 %v4696_v23, %s6029_s25 }
 0xbfe   :  { %4707 = vrot.lane.b32.xlu1 %v4706_v47, %s6027_s26 }
 0xc62   :  { %v1652_v2 = vpop.xlane.xlu0 %1651 }
 0xc63   :  { %4881 = vrcp.f32 %v1652_v2 }
 0xc66   :  { %v1655_v27 = vpop.xlane.xlu1 %1654  ;;  %v1646_v5 = vpop.xlane.xlu0 %1645 }
 0xc67   :  { %4883 = vrcp.f32 %v1655_v27 }
 0xc68   :  { %4885 = vrcp.f32 %v1646_v5 }
 0xc6a   :  { %v1649_v28 = vpop.xlane.xlu1 %1648  ;;  %v1667_v15 = vpop.permute.xlu0 %1666 }
 0xc6b   :  { %4887 = vrcp.f32 %v1649_v28  ;;  %4478 = vmatpush3.bf16.msra.mxu1 %v1667_v15 }
 0xc6c   :  { %4489 = vmatprep.subr.bf16.mxu1 %v4789_v35 }
 0xc6e   :  { %v1714_v17 = vpop.permute.xlu1 %1713  ;;  %v4703_v57 = vpop.permute.xlu0 %4702 }
 0xc6f   :  { %4484 = vmatpush3.bf16.msra.mxu0 %v1714_v17  ;;  %v4705_v6 = vunpack.i.h.bf16 %v4703_v57  ;;  %v4704_v8 = vunpack.i.l.bf16 %v4703_v57 }
 0xc70   :  { %v4882_v18 = vpop.eup %4881 }
 0xc71   :  { %v1661_v30 = vmul.f32 %v4882_v18, %v4874_v43  ;;  %v4171_v18 = vld [vmem:[%s6008_s7] ss:$0 sm:$0xff] }
 0xc72   :  { %v4693_v50 = vpop.permute.xlu1 %4692 }
 0xc73   :  { %v4695_v54 = vunpack.i.h.bf16 %v4693_v50  ;;  %v4694_v55 = vunpack.i.l.bf16 %v4693_v50 }
 0xc74   :  { %v4884_v29 = vpop.eup %4883 }
 0xc75   :  { %v1663_v31 = vmul.f32 %v4884_v29, %v4878_v19  ;;  %v4886_v20 = vpop.eup %4885  ;;  %v1809_v1 = vsel %vm795_vm9, %v5393_v9, %v4695_v54  ;;  %v1808_v4 = vsel %vm795_vm9, %v5391_v7, %v4694_v55 }
 0xc76   :  { %v1657_v32 = vmul.f32 %v4886_v20, %v4876_v16  ;;  %v4698_v51 = vpop.permute.xlu1 %4697  ;;  %v1813_v25 = vsel %vm893_vm10, %v1809_v1, %v4705_v6 }
 0xc77   :  { %v1665_v22 = vpack.c.bf16 %v1663_v31, %v1661_v30  ;;  %v4700_v58 = vunpack.i.h.bf16 %v4698_v51  ;;  %v4699_v59 = vunpack.i.l.bf16 %v4698_v51 }
 0xc78   :  { %v4888_v23 = vpop.eup %4887 }
 0xc79   :  { %4486 = vmatmul.mubr.msk.bf16.vlgmr.msra.gmra.mxu0 %vm893_vm10, %v1665_v22  ;;  %v1659_v33 = vmul.f32 %v4888_v23, %v4880_v24  ;;  %v1811_v10 = vsel %vm795_vm9, %v5397_v13, %v4700_v58  ;;  %v1810_v12 = vsel %vm795_vm9, %v5395_v11, %v4699_v59  ;;  %v1812_v24 = vsel %vm893_vm10, %v1808_v4, %v4704_v8  ;;  %v4791_v58 = vld [vmem:[%s6011_s10 + $0x8] sm:$0xff]   ;;  %v4792_v59 = vld [vmem:[%s6011_s10] sm:$0xff]  }
 0xc7a   :  { %v4708_v53 = vpop.permute.xlu1 %4707  ;;  %4497 = vmatprep.subr.bf16.mxu0 %v4791_v58 }
 0xc7b   :  { %v1664_v34 = vpack.c.bf16 %v1659_v33, %v1657_v32  ;;  %v4710_v60 = vunpack.i.h.bf16 %v4708_v53  ;;  %v4709_v61 = vunpack.i.l.bf16 %v4708_v53  ;;  %4498 = vmatpush3.bf16.msra.mxu0 %v4791_v58 }
 0xc7c   :  { %4499 = vmatprep.subr.bf16.mxu0 %v4792_v59 }
 0xc7d   :  { %4480 = vmatmul.mubr.msk.bf16.vlgmr.msra.gmra.mxu1 %vm893_vm10, %v1664_v34  ;;  %v1814_v14 = vsel %vm893_vm10, %v1810_v12, %v4709_v61  ;;  %v1815_v16 = vsel %vm893_vm10, %v1811_v10, %v4710_v60 }
 0xc7e   :  { %4490 = vmatpush3.bf16.msra.mxu1 %v4789_v35 }
 0xc7f   :  { %4491 = vmatprep.subr.bf16.mxu1 %v4790_v37  ;;  %4500 = vmatpush3.bf16.msra.mxu0 %v4792_v59 }
 0xc82   :  { %4492 = vmatpush3.bf16.msra.mxu1 %v4790_v37 }
 0xd39   :  { %v1753_v36 = vpop.f32.mrf.mxu0 }
 0xd3b   :  { %v4487_v38 = vpop.f32.mrf.mxu0 }
 0xd3d   :  { %v1706_v39 = vpop.f32.mrf.mxu1  ;;  %v1756_v40 = vpop.f32.mrf.mxu0 }
 0xd3e   :  { %v4716_v41 = vpack.i.bf16 %v1756_v40, %v1753_v36 }
 0xd3f   :  { %v4481_v42 = vpop.f32.mrf.mxu1  ;;  %v4488_v46 = vpop.f32.mrf.mxu0 }
 0xd40   :  { %4717 = vrot.lane.b32.xlu1 %v4716_v41, %s6035_s23 }
 0xd41   :  { %v1709_v47 = vpop.f32.mrf.mxu1 }
 0xd42   :  { %v4711_v48 = vpack.i.bf16 %v1709_v47, %v1706_v39 }
 0xd43   :  { %v4482_v49 = vpop.f32.mrf.mxu1 }
 0xd44   :  { %4712 = vrot.lane.b32.xlu0 %v4711_v48, %s6035_s23 }
 0xdb2   :  { %v4718_v45 = vpop.permute.xlu1 %4717 }
 0xdb3   :  { %v4720_v63 = vunpack.i.h.bf16 %v4718_v45  ;;  %v4719_v0 = vunpack.i.l.bf16 %v4718_v45 }
 0xdb5   :  { %v1820_v9 = vsel %vm1816_vm11, %v1815_v16, %v4720_v63  ;;  %v1819_v7 = vsel %vm1816_vm11, %v1814_v14, %v4719_v0 }
 0xdb6   :  { %v4713_v43 = vpop.permute.xlu0 %4712  ;;  %v1822_v2 = vpack.c.bf16 %v1820_v9, %v1819_v7 }
 0xdb7   :  { %v4715_v19 = vunpack.i.h.bf16 %v4713_v43  ;;  %v4714_v21 = vunpack.i.l.bf16 %v4713_v43 }
 0xdb9   :  { %v1817_v13 = vsel %vm1816_vm11, %v1812_v24, %v4714_v21  ;;  %v1818_v26 = vsel %vm1816_vm11, %v1813_v25, %v4715_v19  ;;  %v4172_v19 = vld [vmem:[%s6009_s8] ss:$0 sm:$0xff] }
 0xdba   :  { %v1821_v11 = vpack.c.bf16 %v1818_v26, %v1817_v13  ;;  %v4173_v13 = vld [vmem:[%s6010_s9] ss:$0 sm:$0xff] }
 0xdbc   :  { %4493 = vmatprep.mubr.msk.bf16.mxu1 %vm237_vm0, %v1821_v11 }
 0xdbd   :  { %4494 = vmatmul.mubr.msk.bf16.vlgmr.msra.gmra.mxu1 %vm237_vm0, %v1822_v2 }
 0xe7d   :  { %v4495_v27 = vpop.f32.mrf.mxu1 }
 0xe7e   :  { %v1896_v28 = vadd.f32 %v4495_v27, %v5289_v44 }
 0xe7f   :  { %v1879_v5 = vpop.f32.mrf.mxu1 }
 0xe80   :  { %v1894_v15 = vadd.f32 %v1879_v5, %v5260_v56  ;;  %v1907_v23 = vadd.f32 %v4171_v18, %v1896_v28 }
 0xe81   :  { %v4496_v17 = vpop.f32.mrf.mxu1 }
 0xe82   :  { %v1905_v29 = vadd.f32 %v4171_v18, %v1894_v15  ;;  %v1897_v31 = vadd.f32 %v4496_v17, %v5301_v3  ;;  %v1917_v44 = vsel %vm237_vm0, %v1907_v23, 0.0 }
 0xe83   :  { %v1882_v30 = vpop.f32.mrf.mxu1 }
 0xe84   :  { %v1895_v20 = vadd.f32 %v1882_v30, %v5277_v52  ;;  %v1911_v22 = vsel %vm237_vm0, %v1905_v29, 0.0  ;;  %v1908_v33 = vadd.f32 %v4171_v18, %v1897_v31  ;;  %v4793_v31 = vld [vmem:[%s6013_s12 + $0x38] sm:$0xff]  }
 0xe85   :  { %1912 = vadd.xlane.f32.xlu0 %v1911_v22  ;;  %4505 = vmatprep.subr.bf16.mxu1 %v4793_v31  ;;  %v4795_v22 = vld [vmem:[%s6013_s12 + $0x28] sm:$0xff]  }
 0xe86   :  { %v1906_v32 = vadd.f32 %v4171_v18, %v1895_v20  ;;  %v1920_v34 = vsel %vm237_vm0, %v1908_v33, 0.0  ;;  %4506 = vmatpush3.bf16.msra.mxu1 %v4793_v31  ;;  %v4794_v20 = vld [vmem:[%s6013_s12 + $0x30] sm:$0xff]  }
 0xe87   :  { %4507 = vmatprep.subr.bf16.mxu1 %v4794_v20 }
 0xe88   :  { %v1914_v56 = vsel %vm237_vm0, %v1906_v32, 0.0 }
 0xe89   :  { %1918 = vadd.xlane.f32.xlu0 %v1917_v44  ;;  %1915 = vadd.xlane.f32.xlu1 %v1914_v56  ;;  %v4798_v44 = vld [vmem:[%s6013_s12 + $0x10] sm:$0xff]   ;;  %v4799_v56 = vld [vmem:[%s6013_s12 + $0x8] sm:$0xff]  }
 0xe8a   :  { %4508 = vmatpush3.bf16.msra.mxu1 %v4794_v20 }
 0xe8b   :  { %4509 = vmatprep.subr.bf16.mxu1 %v4795_v22 }
 0xe8d   :  { %1921 = vadd.xlane.f32.xlu0 %v1920_v34  ;;  %v4174_v34 = vld [vmem:[%s6012_s11] ss:$0 sm:$0xff] }
 0xe8e   :  { %4510 = vmatpush3.bf16.msra.mxu1 %v4795_v22 }
 0xf0e   :  { %v1913_v35 = vpop.xlane.xlu0 %1912 }
 0xf0f   :  { %v1923_v36 = vmul.f32 0.03125, %v1913_v35 }
 0xf11   :  { %v1927_v3 = vsub.f32 %v1905_v29, %v1923_v36 }
 0xf12   :  { %v1919_v37 = vpop.xlane.xlu0 %1918  ;;  %v1916_v52 = vpop.xlane.xlu1 %1915 }
 0xf13   :  { %v1925_v38 = vmul.f32 0.03125, %v1919_v37  ;;  %v1924_v39 = vmul.f32 0.03125, %v1916_v52  ;;  %v1931_v40 = vmul.f32 %v1927_v3, %v1927_v3 }
 0xf15   :  { %v1929_v41 = vsub.f32 %v1907_v23, %v1925_v38  ;;  %v1928_v42 = vsub.f32 %v1906_v32, %v1924_v39  ;;  %v1935_v46 = vsel %vm237_vm0, %v1931_v40, 0.0  ;;  %v4796_v23 = vld [vmem:[%s6013_s12 + $0x20] sm:$0xff]   ;;  %v4797_v32 = vld [vmem:[%s6013_s12 + $0x18] sm:$0xff]  }
 0xf16   :  { %1936 = vadd.xlane.f32.xlu0 %v1935_v46  ;;  %v1922_v47 = vpop.xlane.xlu0 %1921  ;;  %4511 = vmatprep.subr.bf16.mxu1 %v4796_v23 }
 0xf17   :  { %v1926_v48 = vmul.f32 0.03125, %v1922_v47  ;;  %v1933_v49 = vmul.f32 %v1929_v41, %v1929_v41  ;;  %v1932_v50 = vmul.f32 %v1928_v42, %v1928_v42  ;;  %4512 = vmatpush3.bf16.msra.mxu1 %v4796_v23 }
 0xf18   :  { %4513 = vmatprep.subr.bf16.mxu1 %v4797_v32 }
 0xf19   :  { %v1930_v51 = vsub.f32 %v1908_v33, %v1926_v48  ;;  %v1941_v53 = vsel %vm237_vm0, %v1933_v49, 0.0  ;;  %v1938_v54 = vsel %vm237_vm0, %v1932_v50, 0.0  ;;  %v4800_v33 = vld [vmem:[%s6013_s12] sm:$0xff]  }
 0xf1a   :  { %1942 = vadd.xlane.f32.xlu0 %v1941_v53  ;;  %1939 = vadd.xlane.f32.xlu1 %v1938_v54 }
 0xf1b   :  { %v1934_v55 = vmul.f32 %v1930_v51, %v1930_v51  ;;  %4514 = vmatpush3.bf16.msra.mxu1 %v4797_v32 }
 0xf1c   :  { %4515 = vmatprep.subr.bf16.mxu1 %v4798_v44 }
 0xf1d   :  { %v1944_v57 = vsel %vm237_vm0, %v1934_v55, 0.0 }
 0xf1e   :  { %1945 = vadd.xlane.f32.xlu1 %v1944_v57 }
 0xf1f   :  { %4516 = vmatpush3.bf16.msra.mxu1 %v4798_v44 }
 0xf20   :  { %4517 = vmatprep.subr.bf16.mxu1 %v4799_v56 }
 0xf23   :  { %4518 = vmatpush3.bf16.msra.mxu1 %v4799_v56 }
 0xf24   :  { %4519 = vmatprep.subr.bf16.mxu1 %v4800_v33 }
 0xf27   :  { %4520 = vmatpush3.bf16.msra.mxu1 %v4800_v33 }
 0xf28   :  { %4551 = vmatprep.subr.bf16.mxu1 %v5036_v62 }
 0xf9f   :  { %v1937_v45 = vpop.xlane.xlu0 %1936 }
 0xfa0   :  { %v1947_v60 = vmul.f32 0.03125, %v1937_v45 }
 0xfa2   :  { %v1951_v61 = vadd.f32 1e-05, %v1947_v60 }
 0xfa3   :  { %v1943_v63 = vpop.xlane.xlu0 %1942  ;;  %v1940_v0 = vpop.xlane.xlu1 %1939 }
 0xfa4   :  { %4889 = vrsqrt.f32 %v1951_v61  ;;  %v1949_v1 = vmul.f32 0.03125, %v1943_v63  ;;  %v1948_v4 = vmul.f32 0.03125, %v1940_v0 }
 0xfa6   :  { %v1953_v6 = vadd.f32 1e-05, %v1949_v1  ;;  %v1952_v8 = vadd.f32 1e-05, %v1948_v4 }
 0xfa7   :  { %v1946_v10 = vpop.xlane.xlu1 %1945 }
 0xfa8   :  { %4891 = vrsqrt.f32 %v1953_v6  ;;  %v1950_v12 = vmul.f32 0.03125, %v1946_v10 }
 0xfa9   :  { %4893 = vrsqrt.f32 %v1952_v8 }
 0xfaa   :  { %v1954_v43 = vadd.f32 1e-05, %v1950_v12 }
 0xfac   :  { %4895 = vrsqrt.f32 %v1954_v43 }
 0xfb1   :  { %v4890_v14 = vpop.eup %4889 }
 0xfb2   :  { %v1959_v16 = vmul.f32 %v4890_v14, %v1927_v3 }
 0xfb4   :  { %v1969_v25 = vmul.f32 %v4172_v19, %v1959_v16 }
 0xfb5   :  { %v4892_v21 = vpop.eup %4891 }
 0xfb6   :  { %v4894_v9 = vpop.eup %4893  ;;  %v1961_v7 = vmul.f32 %v4892_v21, %v1929_v41  ;;  %v5564_v5 = vadd.f32 %v4173_v13, %v1969_v25 }
 0xfb7   :  { %v1960_v24 = vmul.f32 %v4894_v9, %v1928_v42 }
 0xfb8   :  { %v1971_v27 = vmul.f32 %v4172_v19, %v1961_v7 }
 0xfb9   :  { %v4896_v26 = vpop.eup %4895  ;;  %v1970_v11 = vmul.f32 %v4172_v19, %v1960_v24 }
 0xfba   :  { %v1962_v2 = vmul.f32 %v4896_v26, %v1930_v51  ;;  %v5570_v18 = vadd.f32 %v4173_v13, %v1971_v27 }
 0xfbb   :  { %v5566_v28 = vadd.f32 %v4173_v13, %v1970_v11 }
 0xfbc   :  { %v1972_v15 = vmul.f32 %v4172_v19, %v1962_v2 }
 0xfbd   :  { %v1983_v17 = vpack.c.bf16 %v5566_v28, %v5564_v5 }
 0xfbe   :  { %v5572_v29 = vadd.f32 %v4173_v13, %v1972_v15  ;;  %v4179_v15 = vld [vmem:[%s6014_s13] ss:$0 sm:$0xff] }
 0xfbf   :  { %4501 = vmatprep.mubr.msk.bf16.mxu0 %vm237_vm0, %v1983_v17 }
 0xfc0   :  { %v1984_v30 = vpack.c.bf16 %v5572_v29, %v5570_v18 }
 0xfc2   :  { %4502 = vmatmul.mubr.msk.bf16.vlgmr.msra.gmra.mxu0 %vm237_vm0, %v1984_v30 }
0x1082   :  { %v4503_v35 = vpop.f32.mrf.mxu0 }
0x1083   :  { %v2057_v36 = vadd.f32 %v4503_v35, %v4174_v34 }
0x1084   :  { %v2048_v3 = vpop.f32.mrf.mxu0 }
0x1085   :  { %v2069_v37 = vmul.f32 0.044715, %v2057_v36  ;;  %v2049_v52 = vadd.f32 %v4174_v34, %v2048_v3  ;;  %v2065_v7 = vmul.f32 0.5, %v2057_v36 }
0x1086   :  { %v4504_v38 = vpop.f32.mrf.mxu0 }
0x1087   :  { %v2073_v39 = vmul.f32 %v2069_v37, %v2057_v36  ;;  %v2067_v40 = vmul.f32 0.044715, %v2049_v52  ;;  %v2060_v41 = vadd.f32 %v4504_v38, %v4174_v34  ;;  %v2063_v19 = vmul.f32 0.5, %v2049_v52 }
0x1088   :  { %v2051_v42 = vpop.f32.mrf.mxu0 }
0x1089   :  { %v2077_v46 = vmul.f32 %v2073_v39, %v2057_v36  ;;  %v2071_v47 = vmul.f32 %v2067_v40, %v2049_v52  ;;  %v2070_v48 = vmul.f32 0.044715, %v2060_v41  ;;  %v2052_v49 = vadd.f32 %v4174_v34, %v2051_v42 }
0x108a   :  { %v2066_v14 = vmul.f32 0.5, %v2060_v41 }
0x108b   :  { %v2081_v50 = vadd.f32 %v2077_v46, %v2057_v36  ;;  %v2075_v51 = vmul.f32 %v2071_v47, %v2049_v52  ;;  %v2074_v53 = vmul.f32 %v2070_v48, %v2060_v41  ;;  %v2068_v54 = vmul.f32 0.044715, %v2052_v49 }
0x108c   :  { %v2064_v21 = vmul.f32 0.5, %v2052_v49 }
0x108d   :  { %v2078_v55 = vmul.f32 %v2074_v53, %v2060_v41  ;;  %v2072_v57 = vmul.f32 %v2068_v54, %v2052_v49  ;;  %v2079_v58 = vadd.f32 %v2075_v51, %v2049_v52  ;;  %v2085_v59 = vmul.f32 0.7978846, %v2081_v50 }
0x108f   :  { %v2082_v45 = vadd.f32 %v2078_v55, %v2060_v41  ;;  %v2076_v60 = vmul.f32 %v2072_v57, %v2052_v49  ;;  %v2083_v61 = vmul.f32 0.7978846, %v2079_v58  ;;  %v4801_v58 = vld [vmem:[%s6006_s5 + $0x18] sm:$0xff]  }
0x1090   :  { %4525 = vmatprep.subr.bf16.mxu0 %v4801_v58 }
0x1091   :  { %v2086_v63 = vmul.f32 0.7978846, %v2082_v45  ;;  %v2080_v0 = vadd.f32 %v2076_v60, %v2052_v49  ;;  %4897 = vtanh.f32 %v2083_v61  ;;  %4526 = vmatpush3.bf16.msra.mxu0 %v4801_v58 }
0x1092   :  { %4899 = vtanh.f32 %v2085_v59  ;;  %v4802_v59 = vld [vmem:[%s6006_s5 + $0x10] sm:$0xff]  }
0x1093   :  { %4901 = vtanh.f32 %v2086_v63  ;;  %v2084_v1 = vmul.f32 0.7978846, %v2080_v0  ;;  %4527 = vmatprep.subr.bf16.mxu0 %v4802_v59 }
0x1095   :  { %4903 = vtanh.f32 %v2084_v1  ;;  %4528 = vmatpush3.bf16.msra.mxu0 %v4802_v59 }
0x1096   :  { %4533 = vmatprep.subr.bf16.mxu0 %v5036_v62 }
0x109e   :  { %v4898_v4 = vpop.eup %4897 }
0x109f   :  { %v4900_v6 = vpop.eup %4899  ;;  %v2091_v10 = vadd.f32 1.0, %v4898_v4 }
0x10a0   :  { %v4902_v8 = vpop.eup %4901  ;;  %v2093_v16 = vadd.f32 1.0, %v4900_v6 }
0x10a1   :  { %v2094_v12 = vadd.f32 1.0, %v4902_v8  ;;  %v2095_v25 = vmul.f32 %v2091_v10, %v2063_v19  ;;  %v4190_v19 = vld [vmem:[%s6051_s3 + $0x1] ss:$0 sm:$0xff]  ;;  %s6053_s3 = smov 112  }
0x10a2   :  { %v4904_v43 = vpop.eup %4903  ;;  %v2097_v26 = vmul.f32 %v2093_v16, %v2065_v7 }
0x10a3   :  { %v2092_v9 = vadd.f32 1.0, %v4904_v43  ;;  %v2098_v24 = vmul.f32 %v2094_v12, %v2066_v14 }
0x10a5   :  { %v2096_v13 = vmul.f32 %v2092_v9, %v2064_v21  ;;  %v2100_v2 = vpack.c.bf16 %v2098_v24, %v2097_v26 }
0x10a7   :  { %v2099_v11 = vpack.c.bf16 %v2096_v13, %v2095_v25  ;;  %v4191_v13 = vld [vmem:[%s6052_s17 + $0x1] ss:$0 sm:$0xff]  ;;  %s6054_s17 = smov 48  }
0x10a9   :  { %4521 = vmatprep.mubr.bf16.mxu1 %v2099_v11 }
0x10aa   :  { %4522 = vmatmul.mubr.bf16.vlgmr.msra.gmra.mxu1 %v2100_v2 }
0x10ab   :  { %4553 = vmatprep.mubr.msk.bf16.mxu1 %vm5037_vm8, %v5036_v62 }
0x116a   :  { %v4523_v27 = vpop.f32.mrf.mxu1 }
0x116b   :  { %v2215_v30 = vadd.f32 %v4523_v27, %v4179_v15 }
0x116c   :  { %v2206_v17 = vpop.f32.mrf.mxu1 }
0x116d   :  { %v2207_v31 = vadd.f32 %v4179_v15, %v2206_v17  ;;  %v5615_v32 = vadd.f32 %v2215_v30, %v5570_v18 }
0x116e   :  { %v4524_v20 = vpop.f32.mrf.mxu1 }
0x116f   :  { %v5612_v22 = vadd.f32 %v2207_v31, %v5564_v5  ;;  %v2218_v44 = vadd.f32 %v4524_v20, %v4179_v15  ;;  %v2235_v36 = vsel %vm237_vm0, %v5615_v32, 0.0 }
0x1170   :  { %v2209_v23 = vpop.f32.mrf.mxu1 }
0x1171   :  { %v2210_v56 = vadd.f32 %v4179_v15, %v2209_v23  ;;  %v2229_v33 = vsel %vm237_vm0, %v5612_v22, 0.0  ;;  %v5623_v35 = vadd.f32 %v2218_v44, %v5572_v29 }
0x1172   :  { %2230 = vadd.xlane.f32.xlu0 %v2229_v33 }
0x1173   :  { %v5620_v34 = vadd.f32 %v2210_v56, %v5566_v28  ;;  %v2238_v18 = vsel %vm237_vm0, %v5623_v35, 0.0 }
0x1175   :  { %v2232_v5 = vsel %vm237_vm0, %v5620_v34, 0.0 }
0x1176   :  { %2233 = vadd.xlane.f32.xlu1 %v2232_v5  ;;  %2236 = vadd.xlane.f32.xlu0 %v2235_v36 }
0x117a   :  { %2239 = vadd.xlane.f32.xlu1 %v2238_v18 }
0x11fb   :  { %v2231_v3 = vpop.xlane.xlu0 %2230 }
0x11fc   :  { %v2241_v37 = vmul.f32 0.03125, %v2231_v3 }
0x11fe   :  { %v2245_v28 = vsub.f32 %v5612_v22, %v2241_v37 }
0x11ff   :  { %v2234_v52 = vpop.xlane.xlu1 %2233  ;;  %v2237_v38 = vpop.xlane.xlu0 %2236 }
0x1200   :  { %v2242_v29 = vmul.f32 0.03125, %v2234_v52  ;;  %v2243_v39 = vmul.f32 0.03125, %v2237_v38  ;;  %v2249_v40 = vmul.f32 %v2245_v28, %v2245_v28 }
0x1202   :  { %v2246_v41 = vsub.f32 %v5620_v34, %v2242_v29  ;;  %v2247_v42 = vsub.f32 %v5615_v32, %v2243_v39  ;;  %v2253_v46 = vsel %vm237_vm0, %v2249_v40, 0.0 }
0x1203   :  { %v2240_v47 = vpop.xlane.xlu1 %2239  ;;  %2254 = vadd.xlane.f32.xlu0 %v2253_v46 }
0x1204   :  { %v2244_v48 = vmul.f32 0.03125, %v2240_v47  ;;  %v2250_v49 = vmul.f32 %v2246_v41, %v2246_v41  ;;  %v2251_v50 = vmul.f32 %v2247_v42, %v2247_v42 }
0x1206   :  { %v2248_v51 = vsub.f32 %v5623_v35, %v2244_v48  ;;  %v2256_v53 = vsel %vm237_vm0, %v2250_v49, 0.0  ;;  %v2259_v54 = vsel %vm237_vm0, %v2251_v50, 0.0 }
0x1207   :  { %2257 = vadd.xlane.f32.xlu1 %v2256_v53  ;;  %2260 = vadd.xlane.f32.xlu0 %v2259_v54 }
0x1208   :  { %v2252_v55 = vmul.f32 %v2248_v51, %v2248_v51 }
0x120a   :  { %v2262_v57 = vsel %vm237_vm0, %v2252_v55, 0.0 }
0x120b   :  { %2263 = vadd.xlane.f32.xlu1 %v2262_v57 }
0x128c   :  { %v2255_v45 = vpop.xlane.xlu0 %2254 }
0x128d   :  { %v2265_v60 = vmul.f32 0.03125, %v2255_v45 }
0x128f   :  { %v2269_v61 = vadd.f32 1e-05, %v2265_v60 }
0x1290   :  { %v2258_v63 = vpop.xlane.xlu1 %2257  ;;  %v2261_v0 = vpop.xlane.xlu0 %2260 }
0x1291   :  { %4905 = vrsqrt.f32 %v2269_v61  ;;  %v2266_v1 = vmul.f32 0.03125, %v2258_v63  ;;  %v2267_v4 = vmul.f32 0.03125, %v2261_v0 }
0x1293   :  { %v2270_v6 = vadd.f32 1e-05, %v2266_v1  ;;  %v2271_v8 = vadd.f32 1e-05, %v2267_v4 }
0x1294   :  { %v2264_v10 = vpop.xlane.xlu1 %2263 }
0x1295   :  { %4907 = vrsqrt.f32 %v2270_v6  ;;  %v2268_v12 = vmul.f32 0.03125, %v2264_v10 }
0x1296   :  { %4909 = vrsqrt.f32 %v2271_v8 }
0x1297   :  { %v2272_v43 = vadd.f32 1e-05, %v2268_v12 }
0x1299   :  { %4911 = vrsqrt.f32 %v2272_v43 }
0x129e   :  { %v4906_v14 = vpop.eup %4905 }
0x129f   :  { %v2277_v16 = vmul.f32 %v4906_v14, %v2245_v28 }
0x12a1   :  { %v2287_v24 = vmul.f32 %v4190_v19, %v2277_v16 }
0x12a2   :  { %v4908_v21 = vpop.eup %4907 }
0x12a3   :  { %v4910_v9 = vpop.eup %4909  ;;  %v2278_v7 = vmul.f32 %v4908_v21, %v2246_v41  ;;  %v2297_v27 = vadd.f32 %v4191_v13, %v2287_v24 }
0x12a4   :  { %v2279_v25 = vmul.f32 %v4910_v9, %v2247_v42 }
0x12a5   :  { %v2288_v26 = vmul.f32 %v4190_v19, %v2278_v7 }
0x12a6   :  { %v4912_v11 = vpop.eup %4911  ;;  %v2289_v17 = vmul.f32 %v4190_v19, %v2279_v25 }
0x12a7   :  { %v2280_v2 = vmul.f32 %v4912_v11, %v2248_v51  ;;  %v2298_v15 = vadd.f32 %v4191_v13, %v2288_v26 }
0x12a8   :  { %v2299_v20 = vadd.f32 %v4191_v13, %v2289_v17 }
0x12a9   :  { %v2301_v30 = vpack.c.bf16 %v2298_v15, %v2297_v27  ;;  %v2290_v31 = vmul.f32 %v4190_v19, %v2280_v2 }
0x12ab   :  { %4529 = vmatprep.mubr.msk.bf16.mxu0 %vm237_vm0, %v2301_v30  ;;  %v2300_v23 = vadd.f32 %v4191_v13, %v2290_v31 }
0x12ad   :  { %v2302_v44 = vpack.c.bf16 %v2300_v23, %v2299_v20 }
0x12af   :  { %4530 = vmatmul.mubr.msk.bf16.vlgmr.msra.gmra.mxu0 %vm237_vm0, %v2302_v44 }
0x12b0   :  { %4535 = vmatprep.mubr.msk.bf16.mxu0 %vm5037_vm8, %v5036_v62 }
0x136f   :  { %v4531_v56 = vpop.f32.mrf.mxu0 }
0x1371   :  { %v2360_v33 = vpop.f32.mrf.mxu0 }
0x1373   :  { %v4532_v5 = vpop.f32.mrf.mxu0 }
0x1374   :  { %v5656_v36 = vpack.c.bf16 %v4532_v5, %v4531_v56 }
0x1375   :  { %v2363_v18 = vpop.f32.mrf.mxu0 }
0x1376   :  { %v5658_v3 = vpack.c.bf16 %v2363_v18, %v2360_v33  ;;  %2428 = vrot.lane.b32.xlu1 %v5656_v36, %s5038_s28 }
0x1378   :  { %2378 = vrot.lane.b32.xlu0 %v5658_v3, %s5038_s28  ;;  %s6055_s28 = smov 72  }
0x13e8   :  { %v2429_v52 = vpop.permute.xlu1 %2428 }
0x13e9   :  { %v2434_v38 = vsel %vm795_vm9, %v2429_v52, 0 }
0x13ea   :  { %v2379_v37 = vpop.permute.xlu0 %2378 }
0x13eb   :  { %v2384_v28 = vsel %vm795_vm9, %v2379_v37, 0 }
0x13ec   :  { %4534 = vmatpush3.bf16.xpose.msra.mxu0 %v2384_v28 }
0x13ed   :  { %4539 = vmatprep.subr.bf16.mxu0 %v5036_v62 }
0x13f3   :  { %4536 = vmatmul.mubr.msk.bf16.vlgmr.msra.gmra.mxu0 %vm795_vm9, %v5658_v3 }
0x13f4   :  { %4540 = vmatpush3.bf16.xpose.msra.mxu0 %v2434_v38  ;;  %4541 = vmatprep.mubr.msk.bf16.mxu0 %vm5037_vm8, %v5036_v62 }
0x13f5   :  { %4545 = vmatprep.subr.bf16.mxu0 %v5036_v62 }
0x13fb   :  { %4542 = vmatmul.mubr.msk.bf16.vlgmr.msra.gmra.mxu0 %vm795_vm9, %v5656_v36 }
0x13fc   :  { %4547 = vmatprep.mubr.msk.bf16.mxu0 %vm5037_vm8, %v5036_v62 }
0x14b3   :  { %v2420_v29 = vpop.f32.mrf.mxu0 }
0x14b4   :  { %v2477_v39 = vsel %vm893_vm10, %v2420_v29, -inf }
0x14b5   :  { %2478 = vmax.xlane.f32.xlu1 %v2477_v39  ;;  %v4537_v40 = vpop.f32.mrf.mxu0 }
0x14b7   :  { %v2423_v41 = vpop.f32.mrf.mxu0 }
0x14b8   :  { %v2480_v42 = vsel %vm893_vm10, %v2423_v41, -inf }
0x14b9   :  { %2481 = vmax.xlane.f32.xlu0 %v2480_v42  ;;  %v4538_v46 = vpop.f32.mrf.mxu0 }
0x14bb   :  { %v2470_v47 = vpop.f32.mrf.mxu0 }
0x14bc   :  { %v2483_v48 = vsel %vm893_vm10, %v2470_v47, -inf }
0x14bd   :  { %2484 = vmax.xlane.f32.xlu0 %v2483_v48  ;;  %v4543_v49 = vpop.f32.mrf.mxu0 }
0x14bf   :  { %v2473_v50 = vpop.f32.mrf.mxu0 }
0x14c0   :  { %v2486_v51 = vsel %vm893_vm10, %v2473_v50, -inf }
0x14c1   :  { %2487 = vmax.xlane.f32.xlu1 %v2486_v51  ;;  %v4544_v53 = vpop.f32.mrf.mxu0 }
0x153e   :  { %v2479_v54 = vpop.xlane.xlu1 %2478 }
0x153f   :  { %v2489_v55 = vsub.f32 %v2420_v29, %v2479_v54 }
0x1541   :  { %v2493_v57 = vmul.f32 1.442695, %v2489_v55 }
0x1542   :  { %v2482_v58 = vpop.xlane.xlu0 %2481 }
0x1543   :  { %4913 = vpow2.f32 %v2493_v57  ;;  %v2490_v59 = vsub.f32 %v2423_v41, %v2482_v58 }
0x1545   :  { %v2495_v45 = vmul.f32 1.442695, %v2490_v59 }
0x1546   :  { %v2485_v60 = vpop.xlane.xlu0 %2484 }
0x1547   :  { %4915 = vpow2.f32 %v2495_v45  ;;  %v2491_v61 = vsub.f32 %v2470_v47, %v2485_v60 }
0x1549   :  { %v2497_v63 = vmul.f32 1.442695, %v2491_v61 }
0x154a   :  { %v2488_v12 = vpop.xlane.xlu1 %2487 }
0x154b   :  { %4917 = vpow2.f32 %v2497_v63  ;;  %v2492_v43 = vsub.f32 %v2473_v50, %v2488_v12 }
0x154d   :  { %v2499_v14 = vmul.f32 1.442695, %v2492_v43 }
0x154f   :  { %4919 = vpow2.f32 %v2499_v14 }
0x1550   :  { %v4914_v0 = vpop.eup %4913 }
0x1551   :  { %v2501_v1 = vsel %vm893_vm10, %v4914_v0, 0.0 }
0x1552   :  { %2502 = vadd.xlane.f32.xlu0 %v2501_v1 }
0x1554   :  { %v4916_v4 = vpop.eup %4915 }
0x1555   :  { %v2504_v6 = vsel %vm893_vm10, %v4916_v4, 0.0 }
0x1556   :  { %2505 = vadd.xlane.f32.xlu1 %v2504_v6 }
0x1558   :  { %v4918_v8 = vpop.eup %4917 }
0x1559   :  { %v2507_v10 = vsel %vm893_vm10, %v4918_v8, 0.0 }
0x155a   :  { %2508 = vadd.xlane.f32.xlu0 %v2507_v10 }
0x155c   :  { %v4920_v16 = vpop.eup %4919 }
0x155d   :  { %v2510_v19 = vsel %vm893_vm10, %v4920_v16, 0.0 }
0x1567   :  { %2570 = vrot.lane.b32.xlu1 %v5656_v36, %s5039_s30 }
0x156b   :  { %2619 = vrot.lane.b32.xlu1 %v5658_v3, %s5040_s4 }
0x1570   :  { %2523 = vrot.lane.b32.xlu0 %v5658_v3, %s5039_s30  ;;  %s6056_s30 = smov 104  }
0x1574   :  { %2617 = vrot.lane.b32.xlu0 %v5658_v3, %s5041_s29 }
0x158f   :  { %2511 = vadd.xlane.f32.xlu1 %v2510_v19 }
0x15a0   :  { %2670 = vrot.lane.b32.xlu1 %v5656_v36, %s5040_s4  ;;  %s6057_s4 = smov 40  }
0x15a4   :  { %2668 = vrot.lane.b32.xlu1 %v5656_v36, %s5041_s29  ;;  %s6058_s29 = smov 8  }
0x15db   :  { %v2503_v21 = vpop.xlane.xlu0 %2502 }
0x15dc   :  { %4921 = vrcp.f32 %v2503_v21 }
0x15df   :  { %v2506_v9 = vpop.xlane.xlu1 %2505 }
0x15e0   :  { %4923 = vrcp.f32 %v2506_v9 }
0x15e3   :  { %v2509_v7 = vpop.xlane.xlu0 %2508  ;;  %v2571_v24 = vpop.permute.xlu1 %2570 }
0x15e4   :  { %4552 = vmatpush3.bf16.msra.mxu1 %v2571_v24  ;;  %4925 = vrcp.f32 %v2509_v7 }
0x15e5   :  { %4563 = vmatprep.subr.bf16.mxu1 %v5036_v62 }
0x15e7   :  { %v2524_v25 = vpop.permute.xlu0 %2523  ;;  %v2620_v27 = vpop.permute.xlu1 %2619 }
0x15e8   :  { %4546 = vmatpush3.bf16.msra.mxu0 %v2524_v25  ;;  %v2625_v17 = vsel %vm795_vm9, %v2620_v27, 0 }
0x15e9   :  { %4557 = vmatprep.subr.bf16.mxu0 %v5036_v62  ;;  %v4922_v13 = vpop.eup %4921 }
0x15ea   :  { %v2514_v11 = vmul.f32 %v4922_v13, %v4914_v0 }
0x15eb   :  { %v2618_v30 = vpop.permute.xlu0 %2617 }
0x15ed   :  { %v4924_v26 = vpop.eup %4923 }
0x15ee   :  { %v2516_v2 = vmul.f32 %v4924_v26, %v4916_v4 }
0x15f0   :  { %v2521_v15 = vpack.c.bf16 %v2516_v2, %v2514_v11 }
0x15f1   :  { %v4926_v20 = vpop.eup %4925 }
0x15f2   :  { %4548 = vmatmul.mubr.msk.bf16.vlgmr.msra.gmra.mxu0 %vm893_vm10, %v2521_v15  ;;  %v2518_v44 = vmul.f32 %v4926_v20, %v4918_v8 }
0x15f3   :  { %4558 = vmatpush3.bf16.xpose.msra.mxu0 %v2625_v17  ;;  %4559 = vmatprep.mubr.msk.bf16.mxu0 %vm5037_vm8, %v5036_v62 }
0x15f4   :  { %4569 = vmatprep.subr.bf16.mxu0 %v5036_v62 }
0x15fa   :  { %4560 = vmatmul.mubr.msk.bf16.vlgmr.msra.gmra.mxu0 %vm795_vm9, %v2618_v30 }
0x15fb   :  { %4571 = vmatprep.mubr.msk.bf16.mxu0 %vm5037_vm8, %v5036_v62 }
0x1618   :  { %v2512_v31 = vpop.xlane.xlu1 %2511 }
0x1619   :  { %4927 = vrcp.f32 %v2512_v31 }
0x161c   :  { %v2671_v33 = vpop.permute.xlu1 %2670 }
0x161d   :  { %v2676_v18 = vsel %vm795_vm9, %v2671_v33, 0 }
0x1620   :  { %v2669_v37 = vpop.permute.xlu1 %2668 }
0x1626   :  { %v4928_v23 = vpop.eup %4927 }
0x1627   :  { %v2520_v56 = vmul.f32 %v4928_v23, %v4920_v16 }
0x1629   :  { %v2522_v5 = vpack.c.bf16 %v2520_v56, %v2518_v44 }
0x162b   :  { %4554 = vmatmul.mubr.msk.bf16.vlgmr.msra.gmra.mxu1 %vm893_vm10, %v2522_v5 }
0x162c   :  { %4564 = vmatpush3.bf16.xpose.msra.mxu1 %v2676_v18  ;;  %4565 = vmatprep.mubr.msk.bf16.mxu1 %vm5037_vm8, %v5036_v62 }
0x162d   :  { %4575 = vmatprep.subr.bf16.mxu1 %v5036_v62 }
0x1633   :  { %4566 = vmatmul.mubr.msk.bf16.vlgmr.msra.gmra.mxu1 %vm795_vm9, %v2669_v37 }
0x1634   :  { %4577 = vmatprep.mubr.msk.bf16.mxu1 %vm5037_vm8, %v5036_v62 }
0x16b2   :  { %v5714_v28 = vpop.f32.mrf.mxu0 }
0x16b4   :  { %v4549_v52 = vpop.f32.mrf.mxu0 }
0x16b6   :  { %v5716_v38 = vpop.f32.mrf.mxu0 }
0x16b8   :  { %v4550_v29 = vpop.f32.mrf.mxu0 }
0x16ba   :  { %v2661_v39 = vpop.f32.mrf.mxu0 }
0x16bb   :  { %v2719_v40 = vsel %vm893_vm10, %v2661_v39, -inf }
0x16bc   :  { %2720 = vmax.xlane.f32.xlu0 %v2719_v40  ;;  %v4561_v41 = vpop.f32.mrf.mxu0 }
0x16be   :  { %v2664_v42 = vpop.f32.mrf.mxu0 }
0x16bf   :  { %v2722_v46 = vsel %vm893_vm10, %v2664_v42, -inf }
0x16c0   :  { %2723 = vmax.xlane.f32.xlu1 %v2722_v46  ;;  %v4562_v47 = vpop.f32.mrf.mxu0 }
0x16eb   :  { %v5720_v48 = vpop.f32.mrf.mxu1 }
0x16ed   :  { %v4555_v49 = vpop.f32.mrf.mxu1 }
0x16ef   :  { %v5722_v50 = vpop.f32.mrf.mxu1 }
0x16f1   :  { %v4556_v51 = vpop.f32.mrf.mxu1 }
0x16f3   :  { %v2712_v53 = vpop.f32.mrf.mxu1 }
0x16f4   :  { %v2725_v54 = vsel %vm893_vm10, %v2712_v53, -inf }
0x16f5   :  { %v4567_v55 = vpop.f32.mrf.mxu1  ;;  %2726 = vmax.xlane.f32.xlu0 %v2725_v54 }
0x16f7   :  { %v2715_v57 = vpop.f32.mrf.mxu1 }
0x16f8   :  { %v2728_v58 = vsel %vm893_vm10, %v2715_v57, -inf }
0x16f9   :  { %v4568_v59 = vpop.f32.mrf.mxu1  ;;  %2729 = vmax.xlane.f32.xlu0 %v2728_v58 }
0x1745   :  { %v2721_v45 = vpop.xlane.xlu0 %2720 }
0x1746   :  { %v2731_v60 = vsub.f32 %v2661_v39, %v2721_v45 }
0x1748   :  { %v2735_v61 = vmul.f32 1.442695, %v2731_v60 }
0x1749   :  { %v2724_v63 = vpop.xlane.xlu1 %2723 }
0x174a   :  { %4929 = vpow2.f32 %v2735_v61  ;;  %v2732_v0 = vsub.f32 %v2664_v42, %v2724_v63 }
0x174c   :  { %v2737_v1 = vmul.f32 1.442695, %v2732_v0 }
0x174e   :  { %4931 = vpow2.f32 %v2737_v1 }
0x1757   :  { %v4930_v4 = vpop.eup %4929 }
0x1758   :  { %v2743_v6 = vsel %vm893_vm10, %v4930_v4, 0.0 }
0x1759   :  { %2744 = vadd.xlane.f32.xlu0 %v2743_v6 }
0x175b   :  { %v4932_v8 = vpop.eup %4931 }
0x175c   :  { %v2746_v10 = vsel %vm893_vm10, %v4932_v8, 0.0 }
0x175d   :  { %2747 = vadd.xlane.f32.xlu1 %v2746_v10 }
0x176e   :  { %2812 = vrot.lane.b32.xlu1 %v5656_v36, %s5042_s0 }
0x1772   :  { %2861 = vrot.lane.b32.xlu1 %v5658_v3, %s5043_s21 }
0x177e   :  { %v2727_v12 = vpop.xlane.xlu0 %2726 }
0x177f   :  { %v2733_v43 = vsub.f32 %v2712_v53, %v2727_v12 }
0x1781   :  { %v2739_v14 = vmul.f32 1.442695, %v2733_v43 }
0x1782   :  { %v2730_v16 = vpop.xlane.xlu0 %2729 }
0x1783   :  { %4933 = vpow2.f32 %v2739_v14  ;;  %v2734_v19 = vsub.f32 %v2715_v57, %v2730_v16 }
0x1785   :  { %v2741_v21 = vmul.f32 1.442695, %v2734_v19 }
0x1787   :  { %4935 = vpow2.f32 %v2741_v21 }
0x1790   :  { %v4934_v9 = vpop.eup %4933 }
0x1791   :  { %v2749_v7 = vsel %vm893_vm10, %v4934_v9, 0.0 }
0x1792   :  { %2750 = vadd.xlane.f32.xlu0 %v2749_v7 }
0x1794   :  { %v4936_v24 = vpop.eup %4935 }
0x1795   :  { %v2752_v25 = vsel %vm893_vm10, %v4936_v24, 0.0 }
0x1796   :  { %2753 = vadd.xlane.f32.xlu1 %v2752_v25 }
0x17a7   :  { %2912 = vrot.lane.b32.xlu1 %v5656_v36, %s5043_s21 }
0x17a8   :  { %2765 = vrot.lane.b32.xlu0 %v5658_v3, %s5042_s0  ;;  %s6059_s0 = smov 16  }
0x17ab   :  { %2910 = vrot.lane.b32.xlu1 %v5656_v36, %s6053_s3 }
0x17ac   :  { %2859 = vrot.lane.b32.xlu0 %v5658_v3, %s6053_s3 }
0x17e2   :  { %v2745_v11 = vpop.xlane.xlu0 %2744 }
0x17e6   :  { %v2748_v13 = vpop.xlane.xlu1 %2747 }
0x17e7   :  { %4937 = vrcp.f32 %v2748_v13 }
0x17e8   :  { %4939 = vrcp.f32 %v2745_v11 }
0x17ea   :  { %v2813_v26 = vpop.permute.xlu1 %2812 }
0x17eb   :  { %4576 = vmatpush3.bf16.msra.mxu1 %v2813_v26 }
0x17ec   :  { %4587 = vmatprep.subr.bf16.mxu1 %v5036_v62 }
0x17ee   :  { %v2862_v27 = vpop.permute.xlu1 %2861 }
0x17ef   :  { %v2867_v56 = vsel %vm795_vm9, %v2862_v27, 0 }
0x17f4   :  { %v4938_v2 = vpop.eup %4937 }
0x17f5   :  { %v4940_v17 = vpop.eup %4939  ;;  %v2758_v30 = vmul.f32 %v4938_v2, %v4932_v8 }
0x17f6   :  { %v2756_v23 = vmul.f32 %v4940_v17, %v4930_v4 }
0x17f8   :  { %v2763_v44 = vpack.c.bf16 %v2758_v30, %v2756_v23 }
0x181b   :  { %v2751_v15 = vpop.xlane.xlu0 %2750 }
0x181c   :  { %4941 = vrcp.f32 %v2751_v15 }
0x181f   :  { %v2766_v31 = vpop.permute.xlu0 %2765  ;;  %v2754_v20 = vpop.xlane.xlu1 %2753 }
0x1820   :  { %4943 = vrcp.f32 %v2754_v20  ;;  %4570 = vmatpush3.bf16.msra.mxu0 %v2766_v31 }
0x1821   :  { %4581 = vmatprep.subr.bf16.mxu0 %v5036_v62 }
0x1823   :  { %4572 = vmatmul.mubr.msk.bf16.vlgmr.msra.gmra.mxu0 %vm893_vm10, %v2763_v44  ;;  %v2860_v33 = vpop.permute.xlu0 %2859  ;;  %v2913_v29 = vpop.permute.xlu1 %2912 }
0x1824   :  { %4582 = vmatpush3.bf16.xpose.msra.mxu0 %v2867_v56  ;;  %4583 = vmatprep.mubr.msk.bf16.mxu0 %vm5037_vm8, %v5036_v62  ;;  %v2918_v40 = vsel %vm795_vm9, %v2913_v29, 0 }
0x1825   :  { %4593 = vmatprep.subr.bf16.mxu0 %v5036_v62 }
0x1827   :  { %v2911_v41 = vpop.permute.xlu1 %2910 }
0x1829   :  { %v4942_v5 = vpop.eup %4941 }
0x182a   :  { %v2760_v37 = vmul.f32 %v4942_v5, %v4934_v9 }
0x182b   :  { %4584 = vmatmul.mubr.msk.bf16.vlgmr.msra.gmra.mxu0 %vm795_vm9, %v2860_v33 }
0x182c   :  { %4595 = vmatprep.mubr.msk.bf16.mxu0 %vm5037_vm8, %v5036_v62 }
0x182d   :  { %v4944_v18 = vpop.eup %4943 }
0x182e   :  { %v2762_v52 = vmul.f32 %v4944_v18, %v4936_v24 }
0x1830   :  { %v2764_v39 = vpack.c.bf16 %v2762_v52, %v2760_v37 }
0x1832   :  { %4578 = vmatmul.mubr.msk.bf16.vlgmr.msra.gmra.mxu1 %vm893_vm10, %v2764_v39 }
0x1833   :  { %4588 = vmatpush3.bf16.xpose.msra.mxu1 %v2918_v40  ;;  %4589 = vmatprep.mubr.msk.bf16.mxu1 %vm5037_vm8, %v5036_v62 }
0x1834   :  { %4599 = vmatprep.subr.bf16.mxu1 %v5036_v62 }
0x183a   :  { %4590 = vmatmul.mubr.msk.bf16.vlgmr.msra.gmra.mxu1 %vm795_vm9, %v2911_v41 }
0x183b   :  { %4601 = vmatprep.mubr.msk.bf16.mxu1 %vm5037_vm8, %v5036_v62 }
0x18e3   :  { %v5760_v42 = vpop.f32.mrf.mxu0 }
0x18e5   :  { %v4573_v46 = vpop.f32.mrf.mxu0 }
0x18e7   :  { %v5762_v47 = vpop.f32.mrf.mxu0 }
0x18e8   :  { %v4721_v49 = vpack.i.bf16 %v5762_v47, %v5760_v42 }
0x18e9   :  { %v4574_v51 = vpop.f32.mrf.mxu0 }
0x18eb   :  { %v2903_v53 = vpop.f32.mrf.mxu0 }
0x18ec   :  { %v2961_v54 = vsel %vm893_vm10, %v2903_v53, -inf }
0x18ed   :  { %2962 = vmax.xlane.f32.xlu0 %v2961_v54  ;;  %v4585_v55 = vpop.f32.mrf.mxu0 }
0x18ef   :  { %v2906_v57 = vpop.f32.mrf.mxu0 }
0x18f0   :  { %v2964_v58 = vsel %vm893_vm10, %v2906_v57, -inf }
0x18f1   :  { %2965 = vmax.xlane.f32.xlu1 %v2964_v58  ;;  %v4586_v59 = vpop.f32.mrf.mxu0 }
0x18f2   :  { %v5768_v45 = vpop.f32.mrf.mxu1 }
0x18f4   :  { %v4579_v60 = vpop.f32.mrf.mxu1 }
0x18f6   :  { %v5770_v61 = vpop.f32.mrf.mxu1 }
0x18f7   :  { %v4726_v63 = vpack.i.bf16 %v5770_v61, %v5768_v45 }
0x18f8   :  { %v4580_v0 = vpop.f32.mrf.mxu1 }
0x18fa   :  { %v2954_v1 = vpop.f32.mrf.mxu1 }
0x18fb   :  { %v2967_v4 = vsel %vm893_vm10, %v2954_v1, -inf }
0x18fc   :  { %v4591_v6 = vpop.f32.mrf.mxu1  ;;  %2968 = vmax.xlane.f32.xlu0 %v2967_v4 }
0x18fe   :  { %v2957_v8 = vpop.f32.mrf.mxu1 }
0x18ff   :  { %v2970_v10 = vsel %vm893_vm10, %v2957_v8, -inf }
0x1900   :  { %v4592_v12 = vpop.f32.mrf.mxu1  ;;  %2971 = vmax.xlane.f32.xlu0 %v2970_v10 }
0x1976   :  { %v2963_v43 = vpop.xlane.xlu0 %2962 }
0x1977   :  { %v2973_v14 = vsub.f32 %v2903_v53, %v2963_v43 }
0x1979   :  { %v2977_v16 = vmul.f32 1.442695, %v2973_v14 }
0x197a   :  { %v2966_v19 = vpop.xlane.xlu1 %2965 }
0x197b   :  { %4945 = vpow2.f32 %v2977_v16  ;;  %v2974_v21 = vsub.f32 %v2906_v57, %v2966_v19 }
0x197d   :  { %v2979_v9 = vmul.f32 1.442695, %v2974_v21 }
0x197f   :  { %4947 = vpow2.f32 %v2979_v9 }
0x1985   :  { %v2969_v7 = vpop.xlane.xlu0 %2968 }
0x1986   :  { %v2975_v24 = vsub.f32 %v2954_v1, %v2969_v7 }
0x1988   :  { %v4946_v25 = vpop.eup %4945  ;;  %v2981_v13 = vmul.f32 1.442695, %v2975_v24 }
0x1989   :  { %v2985_v26 = vsel %vm893_vm10, %v4946_v25, 0.0  ;;  %v2972_v17 = vpop.xlane.xlu0 %2971 }
0x198a   :  { %4949 = vpow2.f32 %v2981_v13  ;;  %2986 = vadd.xlane.f32.xlu0 %v2985_v26  ;;  %v2976_v30 = vsub.f32 %v2957_v8, %v2972_v17 }
0x198c   :  { %v4948_v11 = vpop.eup %4947  ;;  %v2983_v31 = vmul.f32 1.442695, %v2976_v30 }
0x198d   :  { %v2988_v2 = vsel %vm893_vm10, %v4948_v11, 0.0 }
0x198e   :  { %2989 = vadd.xlane.f32.xlu1 %v2988_v2  ;;  %4951 = vpow2.f32 %v2983_v31 }
0x1997   :  { %v4950_v27 = vpop.eup %4949 }
0x1998   :  { %v2991_v15 = vsel %vm893_vm10, %v4950_v27, 0.0 }
0x1999   :  { %2992 = vadd.xlane.f32.xlu0 %v2991_v15 }
0x199b   :  { %v4952_v20 = vpop.eup %4951 }
0x199c   :  { %v2994_v23 = vsel %vm893_vm10, %v4952_v20, 0.0 }
0x199f   :  { %3054 = vrot.lane.b32.xlu1 %v5656_v36, %s6054_s17 }
0x19a3   :  { %3103 = vrot.lane.b32.xlu1 %v5658_v3, %s6055_s28 }
0x19af   :  { %3007 = vrot.lane.b32.xlu0 %v5658_v3, %s6054_s17 }
0x19b3   :  { %3101 = vrot.lane.b32.xlu0 %v5658_v3, %s6056_s30 }
0x19c7   :  { %2995 = vadd.xlane.f32.xlu1 %v2994_v23 }
0x19d8   :  { %3154 = vrot.lane.b32.xlu1 %v5656_v36, %s6055_s28 }
0x19dc   :  { %3152 = vrot.lane.b32.xlu1 %v5656_v36, %s6056_s30  ;;  %s5052_s30 = smov [#allocation3]  }
0x1a13   :  { %v2987_v44 = vpop.xlane.xlu0 %2986 }
0x1a14   :  { %4953 = vrcp.f32 %v2987_v44 }
0x1a17   :  { %v2990_v56 = vpop.xlane.xlu1 %2989 }
0x1a18   :  { %4955 = vrcp.f32 %v2990_v56 }
0x1a1b   :  { %v3055_v33 = vpop.permute.xlu1 %3054 }
0x1a1c   :  { %4600 = vmatpush3.bf16.msra.mxu1 %v3055_v33 }
0x1a1d   :  { %4611 = vmatprep.subr.bf16.mxu1 %v5036_v62 }
0x1a1f   :  { %v3104_v40 = vpop.permute.xlu1 %3103 }
0x1a20   :  { %v3109_v46 = vsel %vm795_vm9, %v3104_v40, 0 }
0x1a21   :  { %v4954_v18 = vpop.eup %4953 }
0x1a22   :  { %v2993_v5 = vpop.xlane.xlu0 %2992  ;;  %v2998_v29 = vmul.f32 %v4954_v18, %v4946_v25 }
0x1a23   :  { %4957 = vrcp.f32 %v2993_v5 }
0x1a25   :  { %v4956_v37 = vpop.eup %4955 }
0x1a26   :  { %v3008_v52 = vpop.permute.xlu0 %3007  ;;  %v3000_v39 = vmul.f32 %v4956_v37, %v4948_v11 }
0x1a27   :  { %4594 = vmatpush3.bf16.msra.mxu0 %v3008_v52 }
0x1a28   :  { %4605 = vmatprep.subr.bf16.mxu0 %v5036_v62  ;;  %v3005_v41 = vpack.c.bf16 %v3000_v39, %v2998_v29 }
0x1a2a   :  { %4596 = vmatmul.mubr.msk.bf16.vlgmr.msra.gmra.mxu0 %vm893_vm10, %v3005_v41  ;;  %v3102_v51 = vpop.permute.xlu0 %3101 }
0x1a2b   :  { %4606 = vmatpush3.bf16.xpose.msra.mxu0 %v3109_v46  ;;  %4607 = vmatprep.mubr.msk.bf16.mxu0 %vm5037_vm8, %v5036_v62 }
0x1a2c   :  { %4617 = vmatprep.subr.bf16.mxu0 %v5036_v62 }
0x1a30   :  { %v4958_v54 = vpop.eup %4957 }
0x1a31   :  { %v3002_v57 = vmul.f32 %v4958_v54, %v4950_v27 }
0x1a32   :  { %4608 = vmatmul.mubr.msk.bf16.vlgmr.msra.gmra.mxu0 %vm795_vm9, %v3102_v51 }
0x1a33   :  { %4619 = vmatprep.mubr.msk.bf16.mxu0 %vm5037_vm8, %v5036_v62 }
0x1a50   :  { %v2996_v53 = vpop.xlane.xlu1 %2995 }
0x1a51   :  { %4959 = vrcp.f32 %v2996_v53 }
0x1a54   :  { %v3155_v59 = vpop.permute.xlu1 %3154 }
0x1a55   :  { %v3160_v0 = vsel %vm795_vm9, %v3155_v59, 0 }
0x1a58   :  { %v3153_v1 = vpop.permute.xlu1 %3152 }
0x1a5e   :  { %v4960_v55 = vpop.eup %4959 }
0x1a5f   :  { %v3004_v58 = vmul.f32 %v4960_v55, %v4952_v20 }
0x1a61   :  { %v3006_v60 = vpack.c.bf16 %v3004_v58, %v3002_v57 }
0x1a63   :  { %4602 = vmatmul.mubr.msk.bf16.vlgmr.msra.gmra.mxu1 %vm893_vm10, %v3006_v60 }
0x1a64   :  { %4612 = vmatpush3.bf16.xpose.msra.mxu1 %v3160_v0  ;;  %4613 = vmatprep.mubr.msk.bf16.mxu1 %vm5037_vm8, %v5036_v62 }
0x1a65   :  { %4623 = vmatprep.subr.bf16.mxu1 %v5036_v62 }
0x1a6b   :  { %4614 = vmatmul.mubr.msk.bf16.vlgmr.msra.gmra.mxu1 %vm795_vm9, %v3153_v1 }
0x1a6c   :  { %4625 = vmatprep.mubr.msk.bf16.mxu1 %vm5037_vm8, %v5036_v62 }
0x1aea   :  { %v3047_v4 = vpop.f32.mrf.mxu0 }
0x1aec   :  { %v4597_v6 = vpop.f32.mrf.mxu0 }
0x1aee   :  { %v3050_v8 = vpop.f32.mrf.mxu0 }
0x1aef   :  { %v4731_v10 = vpack.i.bf16 %v3050_v8, %v3047_v4 }
0x1af0   :  { %v4598_v12 = vpop.f32.mrf.mxu0 }
0x1af2   :  { %v3145_v43 = vpop.f32.mrf.mxu0 }
0x1af3   :  { %v3203_v14 = vsel %vm893_vm10, %v3145_v43, -inf }
0x1af4   :  { %3204 = vmax.xlane.f32.xlu0 %v3203_v14  ;;  %v4609_v16 = vpop.f32.mrf.mxu0 }
0x1af6   :  { %v3148_v19 = vpop.f32.mrf.mxu0 }
0x1af7   :  { %v3206_v21 = vsel %vm893_vm10, %v3148_v19, -inf }
0x1af8   :  { %3207 = vmax.xlane.f32.xlu1 %v3206_v21  ;;  %v4610_v9 = vpop.f32.mrf.mxu0  ;;  %v4804_v21 = vld [vmem:[%s6007_s6 + $0x10] sm:$0xff]  }
0x1b23   :  { %v3094_v7 = vpop.f32.mrf.mxu1 }
0x1b25   :  { %v4603_v24 = vpop.f32.mrf.mxu1 }
0x1b27   :  { %v3097_v25 = vpop.f32.mrf.mxu1 }
0x1b28   :  { %v4736_v13 = vpack.i.bf16 %v3097_v25, %v3094_v7 }
0x1b29   :  { %v4604_v26 = vpop.f32.mrf.mxu1 }
0x1b2b   :  { %v3196_v11 = vpop.f32.mrf.mxu1 }
0x1b2c   :  { %v3209_v2 = vsel %vm893_vm10, %v3196_v11, -inf }
0x1b2d   :  { %v4615_v27 = vpop.f32.mrf.mxu1  ;;  %3210 = vmax.xlane.f32.xlu0 %v3209_v2 }
0x1b2f   :  { %v3199_v15 = vpop.f32.mrf.mxu1 }
0x1b30   :  { %v3212_v17 = vsel %vm893_vm10, %v3199_v15, -inf }
0x1b31   :  { %v4616_v30 = vpop.f32.mrf.mxu1  ;;  %3213 = vmax.xlane.f32.xlu0 %v3212_v17 }
0x1b7d   :  { %v3205_v31 = vpop.xlane.xlu0 %3204 }
0x1b7e   :  { %v3215_v20 = vsub.f32 %v3145_v43, %v3205_v31 }
0x1b80   :  { %v3219_v23 = vmul.f32 1.442695, %v3215_v20 }
0x1b81   :  { %v3208_v44 = vpop.xlane.xlu1 %3207 }
0x1b82   :  { %4961 = vpow2.f32 %v3219_v23  ;;  %v3216_v56 = vsub.f32 %v3148_v19, %v3208_v44 }
0x1b84   :  { %v3221_v33 = vmul.f32 1.442695, %v3216_v56 }
0x1b86   :  { %4963 = vpow2.f32 %v3221_v33 }
0x1b8f   :  { %v4962_v5 = vpop.eup %4961 }
0x1b90   :  { %v3227_v18 = vsel %vm893_vm10, %v4962_v5, 0.0 }
0x1b91   :  { %3228 = vadd.xlane.f32.xlu0 %v3227_v18 }
0x1b93   :  { %v4964_v37 = vpop.eup %4963 }
0x1b94   :  { %v3230_v52 = vsel %vm893_vm10, %v4964_v37, 0.0 }
0x1b95   :  { %3231 = vadd.xlane.f32.xlu1 %v3230_v52 }
0x1bb6   :  { %v3211_v29 = vpop.xlane.xlu0 %3210 }
0x1bb7   :  { %v3217_v39 = vsub.f32 %v3196_v11, %v3211_v29 }
0x1bb9   :  { %v3223_v40 = vmul.f32 1.442695, %v3217_v39 }
0x1bba   :  { %v3214_v41 = vpop.xlane.xlu0 %3213 }
0x1bbb   :  { %4965 = vpow2.f32 %v3223_v40  ;;  %v3218_v46 = vsub.f32 %v3199_v15, %v3214_v41 }
0x1bbd   :  { %v3225_v51 = vmul.f32 1.442695, %v3218_v46 }
0x1bbf   :  { %4967 = vpow2.f32 %v3225_v51 }
0x1bc8   :  { %v4966_v53 = vpop.eup %4965 }
0x1bc9   :  { %v3233_v54 = vsel %vm893_vm10, %v4966_v53, 0.0 }
0x1bca   :  { %3234 = vadd.xlane.f32.xlu0 %v3233_v54 }
0x1bcc   :  { %v4968_v55 = vpop.eup %4967 }
0x1bcd   :  { %v3236_v57 = vsel %vm893_vm10, %v4968_v55, 0.0 }
0x1bce   :  { %3237 = vadd.xlane.f32.xlu1 %v3236_v57 }
0x1bdf   :  { %3296 = vrot.lane.b32.xlu1 %v5656_v36, %s6057_s4 }
0x1be0   :  { %3249 = vrot.lane.b32.xlu0 %v5658_v3, %s6057_s4  ;;  %s4103_s4 = sshll.u32 %s5052_s30, 4  ;;  %s4104_s4 = int_to_ptr.vmem [resolvable:$true] %s4103_s4 }
0x1be1   :  { %p5018_p1 = scmp.lt.s32.totalorder %s4104_s4, %s4104_s4 }
0x1be3   :  { %4722 = vrot.lane.b32.xlu1 %v4721_v49, %s6058_s29 }
0x1be4   :  { %4732 = vrot.lane.b32.xlu0 %v4731_v10, %s6059_s0  ;;  %v4803_v10 = vld [vmem:[%s6007_s6 + $0x18] sm:$0xff]  }
0x1be7   :  { %4727 = vrot.lane.b32.xlu1 %v4726_v63, %s6058_s29  ;;  %s5013_s29 = scalar_lea.vmem %s4104_s4, 32 }
0x1be8   :  { %p5014_p0 = scmp.ne.s32.totalorder %s4104_s4, %s5013_s29  ;;  %p5019_p2 = scmp.lt.s32.totalorder %s5013_s29, %s5013_s29 }
0x1bea   :  { %p5020_p3 = por %p5019_p2, %p5018_p1 }
0x1beb   :  { %4737 = vrot.lane.b32.xlu1 %v4736_v13, %s6059_s0 }
0x1bec   :  { %p5021_p4 = pnand %p5020_p3, %p5014_p0 }
0x1c1a   :  { %v3229_v59 = vpop.xlane.xlu0 %3228 }
0x1c1e   :  { %v3232_v58 = vpop.xlane.xlu1 %3231 }
0x1c1f   :  { %4969 = vrcp.f32 %v3232_v58 }
0x1c20   :  { %4971 = vrcp.f32 %v3229_v59 }
0x1c2c   :  { %v4970_v36 = vpop.eup %4969 }
0x1c2d   :  { %v4972_v60 = vpop.eup %4971  ;;  %v3242_v0 = vmul.f32 %v4970_v36, %v4964_v37 }
0x1c2e   :  { %v3240_v49 = vmul.f32 %v4972_v60, %v4962_v5 }
0x1c30   :  { %v3247_v1 = vpack.c.bf16 %v3242_v0, %v3240_v49 }
0x1c53   :  { %v3235_v3 = vpop.xlane.xlu0 %3234 }
0x1c54   :  { %4973 = vrcp.f32 %v3235_v3 }
0x1c57   :  { %v3250_v42 = vpop.permute.xlu0 %3249  ;;  %v3238_v47 = vpop.xlane.xlu1 %3237 }
0x1c58   :  { %4975 = vrcp.f32 %v3238_v47  ;;  %4618 = vmatpush3.bf16.msra.mxu0 %v3250_v42 }
0x1c59   :  { %4629 = vmatprep.subr.bf16.mxu0 %v4803_v10 }
0x1c5b   :  { %4620 = vmatmul.mubr.msk.bf16.vlgmr.msra.gmra.mxu0 %vm893_vm10, %v3247_v1  ;;  %v3297_v45 = vpop.permute.xlu1 %3296  ;;  %v4733_v27 = vpop.permute.xlu0 %4732 }
0x1c5c   :  { %4624 = vmatpush3.bf16.msra.mxu1 %v3297_v45  ;;  %4630 = vmatpush3.bf16.msra.mxu0 %v4803_v10  ;;  %v4735_v30 = vunpack.i.h.bf16 %v4733_v27  ;;  %v4734_v31 = vunpack.i.l.bf16 %v4733_v27 }
0x1c5d   :  { %4631 = vmatprep.subr.bf16.mxu0 %v4804_v21 }
0x1c5f   :  { %v4723_v26 = vpop.permute.xlu1 %4722 }
0x1c60   :  { %4632 = vmatpush3.bf16.msra.mxu0 %v4804_v21  ;;  %v4725_v11 = vunpack.i.h.bf16 %v4723_v26  ;;  %v4724_v2 = vunpack.i.l.bf16 %v4723_v26 }
0x1c61   :  { %v4974_v61 = vpop.eup %4973 }
0x1c62   :  { %v3244_v4 = vmul.f32 %v4974_v61, %v4966_v53  ;;  %v3392_v15 = vsel %vm795_vm9, %v5716_v38, %v4725_v11  ;;  %v3391_v17 = vsel %vm795_vm9, %v5714_v28, %v4724_v2 }
0x1c63   :  { %v3395_v56 = vsel %vm893_vm10, %v3391_v17, %v4734_v31  ;;  %v3396_v33 = vsel %vm893_vm10, %v3392_v15, %v4735_v30  ;;  %v4728_v37 = vpop.permute.xlu1 %4727  ;;  %v4805_v30 = vld [vmem:[%s6011_s10 + $0x18] sm:$0xff]   ;;  %v4806_v31 = vld [vmem:[%s6011_s10 + $0x10] sm:$0xff]  }
0x1c64   :  { %v4730_v29 = vunpack.i.h.bf16 %v4728_v37  ;;  %v4729_v28 = vunpack.i.l.bf16 %v4728_v37  ;;  %4637 = vmatprep.subr.bf16.mxu1 %v4805_v30 }
0x1c65   :  { %v4976_v63 = vpop.eup %4975 }
0x1c66   :  { %v3246_v6 = vmul.f32 %v4976_v63, %v4968_v55  ;;  %v3394_v46 = vsel %vm795_vm9, %v5722_v50, %v4730_v29  ;;  %v3393_v51 = vsel %vm795_vm9, %v5720_v48, %v4729_v28  ;;  %v4225_v48 = vld [vmem:[%s6008_s7 + $0x1] ss:$0 sm:$0xff] }
0x1c67   :  { %v4738_v38 = vpop.permute.xlu1 %4737 }
0x1c68   :  { %v3248_v8 = vpack.c.bf16 %v3246_v6, %v3244_v4  ;;  %v4740_v39 = vunpack.i.h.bf16 %v4738_v38  ;;  %v4739_v40 = vunpack.i.l.bf16 %v4738_v38 }
0x1c6a   :  { %4626 = vmatmul.mubr.msk.bf16.vlgmr.msra.gmra.mxu1 %vm893_vm10, %v3248_v8  ;;  %v3397_v55 = vsel %vm893_vm10, %v3393_v51, %v4739_v40  ;;  %v3398_v57 = vsel %vm893_vm10, %v3394_v46, %v4740_v39 }
0x1c6b   :  { %4638 = vmatpush3.bf16.msra.mxu1 %v4805_v30 }
0x1c6c   :  { %4639 = vmatprep.subr.bf16.mxu1 %v4806_v31 }
0x1c6f   :  { %4640 = vmatpush3.bf16.msra.mxu1 %v4806_v31 }
0x1c70   :  { %4665 = vmatprep.subr.bf16.mxu1 %v5036_v62 }
0x1d1b   :  { %v3289_v12 = vpop.f32.mrf.mxu0 }
0x1d1d   :  { %v4621_v43 = vpop.f32.mrf.mxu0 }
0x1d1f   :  { %v3292_v14 = vpop.f32.mrf.mxu0 }
0x1d20   :  { %v4741_v16 = vpack.i.bf16 %v3292_v14, %v3289_v12 }
0x1d21   :  { %v4622_v19 = vpop.f32.mrf.mxu0 }
0x1d22   :  { %4742 = vrot.lane.b32.xlu0 %v4741_v16, %s6060_s2 }
0x1d2a   :  { %v3336_v9 = vpop.f32.mrf.mxu1 }
0x1d2c   :  { %v4627_v7 = vpop.f32.mrf.mxu1 }
0x1d2e   :  { %v3339_v24 = vpop.f32.mrf.mxu1 }
0x1d2f   :  { %v4746_v25 = vpack.i.bf16 %v3339_v24, %v3336_v9 }
0x1d30   :  { %v4628_v13 = vpop.f32.mrf.mxu1 }
0x1d31   :  { %4747 = vrot.lane.b32.xlu1 %v4746_v25, %s6060_s2 }
0x1d94   :  { %v4743_v20 = vpop.permute.xlu0 %4742 }
0x1d95   :  { %v4745_v23 = vunpack.i.h.bf16 %v4743_v20  ;;  %v4744_v44 = vunpack.i.l.bf16 %v4743_v20 }
0x1d97   :  { %v3400_v5 = vsel %vm1816_vm11, %v3396_v33, %v4745_v23  ;;  %v3399_v18 = vsel %vm1816_vm11, %v3395_v56, %v4744_v44 }
0x1d98   :  { %v3403_v52 = vpack.c.bf16 %v3400_v5, %v3399_v18 }
0x1d9a   :  { %4633 = vmatprep.mubr.msk.bf16.mxu0 %vm237_vm0, %v3403_v52 }
0x1da3   :  { %v4748_v41 = vpop.permute.xlu1 %4747 }
0x1da4   :  { %v4750_v53 = vunpack.i.h.bf16 %v4748_v41  ;;  %v4749_v54 = vunpack.i.l.bf16 %v4748_v41  ;;  %v4228_v41 = vld [vmem:[%s6009_s8 + $0x1] ss:$0 sm:$0xff] }
0x1da6   :  { %v3401_v58 = vsel %vm1816_vm11, %v3397_v55, %v4749_v54  ;;  %v3402_v59 = vsel %vm1816_vm11, %v3398_v57, %v4750_v53  ;;  %v4229_v57 = vld [vmem:[%s6010_s9 + $0x1] ss:$0 sm:$0xff] }
0x1da7   :  { %v3404_v36 = vpack.c.bf16 %v3402_v59, %v3401_v58 }
0x1da9   :  { %4634 = vmatmul.mubr.msk.bf16.vlgmr.msra.gmra.mxu0 %vm237_vm0, %v3404_v36 }
0x1e69   :  { %v4635_v3 = vpop.f32.mrf.mxu0 }
0x1e6a   :  { %v3479_v50 = vadd.f32 %v4635_v3, %v5615_v32 }
0x1e6b   :  { %v3462_v60 = vpop.f32.mrf.mxu0 }
0x1e6c   :  { %v3477_v0 = vadd.f32 %v3462_v60, %v5612_v22  ;;  %v3491_v1 = vadd.f32 %v4225_v48, %v3479_v50 }
0x1e6d   :  { %v4636_v42 = vpop.f32.mrf.mxu0 }
0x1e6e   :  { %v3489_v47 = vadd.f32 %v4225_v48, %v3477_v0  ;;  %v3480_v45 = vadd.f32 %v4636_v42, %v5623_v35  ;;  %v3503_v32 = vsel %vm237_vm0, %v3491_v1, 0.0 }
0x1e6f   :  { %v3465_v49 = vpop.f32.mrf.mxu0 }
0x1e70   :  { %v3478_v61 = vadd.f32 %v3465_v49, %v5620_v34  ;;  %v3497_v63 = vsel %vm237_vm0, %v3489_v47, 0.0  ;;  %v3492_v6 = vadd.f32 %v4225_v48, %v3480_v45  ;;  %v4808_v45 = vld [vmem:[%s6013_s12 + $0x70] sm:$0xff]  }
0x1e71   :  { %3498 = vadd.xlane.f32.xlu0 %v3497_v63  ;;  %v4810_v63 = vld [vmem:[%s6013_s12 + $0x60] sm:$0xff]  }
0x1e72   :  { %v3490_v4 = vadd.f32 %v4225_v48, %v3478_v61  ;;  %v3506_v8 = vsel %vm237_vm0, %v3492_v6, 0.0  ;;  %v4809_v61 = vld [vmem:[%s6013_s12 + $0x68] sm:$0xff]  }
0x1e74   :  { %v3500_v22 = vsel %vm237_vm0, %v3490_v4, 0.0 }
0x1e75   :  { %3504 = vadd.xlane.f32.xlu0 %v3503_v32  ;;  %3501 = vadd.xlane.f32.xlu1 %v3500_v22  ;;  %v4813_v32 = vld [vmem:[%s6013_s12 + $0x48] sm:$0xff]   ;;  %v4814_v22 = vld [vmem:[%s6013_s12 + $0x40] sm:$0xff]  }
0x1e79   :  { %3507 = vadd.xlane.f32.xlu0 %v3506_v8  ;;  %v4235_v8 = vld [vmem:[%s6012_s11 + $0x1] ss:$0 sm:$0xff] }
0x1efa   :  { %v3499_v10 = vpop.xlane.xlu0 %3498 }
0x1efb   :  { %v3509_v12 = vmul.f32 0.03125, %v3499_v10 }
0x1efd   :  { %v3513_v43 = vsub.f32 %v3489_v47, %v3509_v12 }
0x1efe   :  { %v3505_v35 = vpop.xlane.xlu0 %3504  ;;  %v3502_v14 = vpop.xlane.xlu1 %3501 }
0x1eff   :  { %v3511_v34 = vmul.f32 0.03125, %v3505_v35  ;;  %v3510_v16 = vmul.f32 0.03125, %v3502_v14  ;;  %v3517_v19 = vmul.f32 %v3513_v43, %v3513_v43 }
0x1f01   :  { %v3515_v21 = vsub.f32 %v3491_v1, %v3511_v34  ;;  %v3514_v9 = vsub.f32 %v3490_v4, %v3510_v16  ;;  %v3521_v7 = vsel %vm237_vm0, %v3517_v19, 0.0  ;;  %v4807_v1 = vld [vmem:[%s6013_s12 + $0x78] sm:$0xff]  }
0x1f02   :  { %3522 = vadd.xlane.f32.xlu0 %v3521_v7  ;;  %v3508_v24 = vpop.xlane.xlu0 %3507  ;;  %4645 = vmatprep.subr.bf16.mxu0 %v4807_v1  ;;  %v4811_v4 = vld [vmem:[%s6013_s12 + $0x58] sm:$0xff]  }
0x1f03   :  { %v3512_v25 = vmul.f32 0.03125, %v3508_v24  ;;  %v3519_v13 = vmul.f32 %v3515_v21, %v3515_v21  ;;  %v3518_v26 = vmul.f32 %v3514_v9, %v3514_v9  ;;  %4646 = vmatpush3.bf16.msra.mxu0 %v4807_v1 }
0x1f04   :  { %4647 = vmatprep.subr.bf16.mxu0 %v4808_v45 }
0x1f05   :  { %v3516_v11 = vsub.f32 %v3492_v6, %v3512_v25  ;;  %v3527_v2 = vsel %vm237_vm0, %v3519_v13, 0.0  ;;  %v3524_v27 = vsel %vm237_vm0, %v3518_v26, 0.0  ;;  %v4812_v6 = vld [vmem:[%s6013_s12 + $0x50] sm:$0xff]  }
0x1f06   :  { %3528 = vadd.xlane.f32.xlu0 %v3527_v2  ;;  %3525 = vadd.xlane.f32.xlu1 %v3524_v27 }
0x1f07   :  { %v3520_v15 = vmul.f32 %v3516_v11, %v3516_v11  ;;  %4648 = vmatpush3.bf16.msra.mxu0 %v4808_v45 }
0x1f08   :  { %4649 = vmatprep.subr.bf16.mxu0 %v4809_v61 }
0x1f09   :  { %v3530_v17 = vsel %vm237_vm0, %v3520_v15, 0.0 }
0x1f0a   :  { %3531 = vadd.xlane.f32.xlu1 %v3530_v17 }
0x1f0b   :  { %4650 = vmatpush3.bf16.msra.mxu0 %v4809_v61 }
0x1f0c   :  { %4651 = vmatprep.subr.bf16.mxu0 %v4810_v63 }
0x1f0f   :  { %4652 = vmatpush3.bf16.msra.mxu0 %v4810_v63 }
0x1f10   :  { %4653 = vmatprep.subr.bf16.mxu0 %v4811_v4 }
0x1f13   :  { %4654 = vmatpush3.bf16.msra.mxu0 %v4811_v4 }
0x1f14   :  { %4655 = vmatprep.subr.bf16.mxu0 %v4812_v6 }
0x1f17   :  { %4656 = vmatpush3.bf16.msra.mxu0 %v4812_v6 }
0x1f18   :  { %4657 = vmatprep.subr.bf16.mxu0 %v4813_v32 }
0x1f1b   :  { %4658 = vmatpush3.bf16.msra.mxu0 %v4813_v32 }
0x1f1c   :  { %4659 = vmatprep.subr.bf16.mxu0 %v4814_v22 }
0x1f1f   :  { %4660 = vmatpush3.bf16.msra.mxu0 %v4814_v22 }
0x1f8b   :  { %v3523_v20 = vpop.xlane.xlu0 %3522 }
0x1f8c   :  { %v3533_v23 = vmul.f32 0.03125, %v3523_v20 }
0x1f8e   :  { %v3537_v44 = vadd.f32 1e-05, %v3533_v23 }
0x1f8f   :  { %v3529_v56 = vpop.xlane.xlu0 %3528  ;;  %v3526_v33 = vpop.xlane.xlu1 %3525 }
0x1f90   :  { %4977 = vrsqrt.f32 %v3537_v44  ;;  %v3535_v5 = vmul.f32 0.03125, %v3529_v56  ;;  %v3534_v18 = vmul.f32 0.03125, %v3526_v33 }
0x1f92   :  { %v3539_v37 = vadd.f32 1e-05, %v3535_v5  ;;  %v3538_v52 = vadd.f32 1e-05, %v3534_v18 }
0x1f93   :  { %v3532_v38 = vpop.xlane.xlu1 %3531 }
0x1f94   :  { %4979 = vrsqrt.f32 %v3539_v37  ;;  %v3536_v29 = vmul.f32 0.03125, %v3532_v38 }
0x1f95   :  { %4981 = vrsqrt.f32 %v3538_v52 }
0x1f96   :  { %v3540_v28 = vadd.f32 1e-05, %v3536_v29 }
0x1f98   :  { %4983 = vrsqrt.f32 %v3540_v28 }
0x1f9d   :  { %v4978_v39 = vpop.eup %4977 }
0x1f9e   :  { %v3545_v40 = vmul.f32 %v4978_v39, %v3513_v43 }
0x1fa0   :  { %v3555_v55 = vmul.f32 %v4228_v41, %v3545_v40 }
0x1fa1   :  { %v4980_v46 = vpop.eup %4979 }
0x1fa2   :  { %v4982_v51 = vpop.eup %4981  ;;  %v3547_v53 = vmul.f32 %v4980_v46, %v3515_v21  ;;  %v5888_v60 = vadd.f32 %v4229_v57, %v3555_v55 }
0x1fa3   :  { %v3546_v54 = vmul.f32 %v4982_v51, %v3514_v9 }
0x1fa4   :  { %v3557_v3 = vmul.f32 %v4228_v41, %v3547_v53 }
0x1fa5   :  { %v4984_v58 = vpop.eup %4983  ;;  %v3556_v59 = vmul.f32 %v4228_v41, %v3546_v54 }
0x1fa6   :  { %v3548_v36 = vmul.f32 %v4984_v58, %v3516_v11  ;;  %v5894_v42 = vadd.f32 %v4229_v57, %v3557_v3 }
0x1fa7   :  { %v5890_v50 = vadd.f32 %v4229_v57, %v3556_v59 }
0x1fa8   :  { %v3558_v0 = vmul.f32 %v4228_v41, %v3548_v36 }
0x1fa9   :  { %v3569_v48 = vpack.c.bf16 %v5890_v50, %v5888_v60 }
0x1faa   :  { %v5896_v47 = vadd.f32 %v4229_v57, %v3558_v0  ;;  %v4257_v0 = vld [vmem:[%s6014_s13 + $0x1] ss:$0 sm:$0xff] }
0x1fab   :  { %4641 = vmatprep.mubr.msk.bf16.mxu1 %vm237_vm0, %v3569_v48 }
0x1fac   :  { %v3570_v49 = vpack.c.bf16 %v5896_v47, %v5894_v42 }
0x1fae   :  { %4642 = vmatmul.mubr.msk.bf16.vlgmr.msra.gmra.mxu1 %vm237_vm0, %v3570_v49 }
0x1faf   :  { %4669 = vmatprep.mubr.msk.bf16.mxu1 %vm5037_vm8, %v5036_v62 }
0x206e   :  { %v4643_v10 = vpop.f32.mrf.mxu1 }
0x206f   :  { %v3645_v12 = vadd.f32 %v4643_v10, %v4235_v8 }
0x2070   :  { %v3636_v43 = vpop.f32.mrf.mxu1 }
0x2071   :  { %v3657_v35 = vmul.f32 0.044715, %v3645_v12  ;;  %v3637_v14 = vadd.f32 %v4235_v8, %v3636_v43  ;;  %v3653_v53 = vmul.f32 0.5, %v3645_v12 }
0x2072   :  { %v4644_v34 = vpop.f32.mrf.mxu1 }
0x2073   :  { %v3661_v16 = vmul.f32 %v3657_v35, %v3645_v12  ;;  %v3655_v19 = vmul.f32 0.044715, %v3637_v14  ;;  %v3648_v21 = vadd.f32 %v4644_v34, %v4235_v8  ;;  %v3651_v41 = vmul.f32 0.5, %v3637_v14 }
0x2074   :  { %v3639_v9 = vpop.f32.mrf.mxu1 }
0x2075   :  { %v3665_v7 = vmul.f32 %v3661_v16, %v3645_v12  ;;  %v3659_v24 = vmul.f32 %v3655_v19, %v3637_v14  ;;  %v3658_v25 = vmul.f32 0.044715, %v3648_v21  ;;  %v3640_v13 = vadd.f32 %v4235_v8, %v3639_v9 }
0x2076   :  { %v3654_v39 = vmul.f32 0.5, %v3648_v21 }
0x2077   :  { %v3669_v26 = vadd.f32 %v3665_v7, %v3645_v12  ;;  %v3663_v11 = vmul.f32 %v3659_v24, %v3637_v14  ;;  %v3662_v2 = vmul.f32 %v3658_v25, %v3648_v21  ;;  %v3656_v27 = vmul.f32 0.044715, %v3640_v13 }
0x2078   :  { %v3652_v46 = vmul.f32 0.5, %v3640_v13 }
0x2079   :  { %v3666_v15 = vmul.f32 %v3662_v2, %v3648_v21  ;;  %v3660_v17 = vmul.f32 %v3656_v27, %v3640_v13  ;;  %v3667_v30 = vadd.f32 %v3663_v11, %v3637_v14  ;;  %v3673_v31 = vmul.f32 0.7978846, %v3669_v26 }
0x207b   :  { %v3670_v20 = vadd.f32 %v3666_v15, %v3648_v21  ;;  %v3664_v23 = vmul.f32 %v3660_v17, %v3640_v13  ;;  %v3671_v44 = vmul.f32 0.7978846, %v3667_v30 }
0x207d   :  { %v3674_v56 = vmul.f32 0.7978846, %v3670_v20  ;;  %v3668_v33 = vadd.f32 %v3664_v23, %v3640_v13  ;;  %4985 = vtanh.f32 %v3671_v44 }
0x207e   :  { %4987 = vtanh.f32 %v3673_v31 }
0x207f   :  { %4989 = vtanh.f32 %v3674_v56  ;;  %v3672_v5 = vmul.f32 0.7978846, %v3668_v33 }
0x2081   :  { %4991 = vtanh.f32 %v3672_v5 }
0x208a   :  { %v4986_v18 = vpop.eup %4985 }
0x208b   :  { %v4988_v37 = vpop.eup %4987  ;;  %v3679_v38 = vadd.f32 1.0, %v4986_v18 }
0x208c   :  { %v4990_v52 = vpop.eup %4989  ;;  %v3681_v40 = vadd.f32 1.0, %v4988_v37 }
0x208d   :  { %v3682_v29 = vadd.f32 1.0, %v4990_v52  ;;  %v3683_v55 = vmul.f32 %v3679_v38, %v3651_v41 }
0x208e   :  { %v4992_v28 = vpop.eup %4991  ;;  %v3685_v58 = vmul.f32 %v3681_v40, %v3653_v53  ;;  %v4267_v40 = vld [vmem:[%s6016_s15] ss:$0 sm:$0xff] }
0x208f   :  { %v3680_v51 = vadd.f32 1.0, %v4992_v28  ;;  %v3686_v54 = vmul.f32 %v3682_v29, %v3654_v39  ;;  %v4266_v28 = vld [vmem:[%s6015_s14] ss:$0 sm:$0xff] }
0x2091   :  { %v3684_v57 = vmul.f32 %v3680_v51, %v3652_v46  ;;  %v3688_v36 = vpack.c.bf16 %v3686_v54, %v3685_v58  ;;  %v4268_v51 = vld [vmem:[%s6017_s16] ss:$0 sm:$0xff] }
0x2093   :  { %v3687_v59 = vpack.c.bf16 %v3684_v57, %v3683_v55 }
0x2095   :  { %4661 = vmatprep.mubr.bf16.mxu0 %v3687_v59 }
0x2096   :  { %4662 = vmatmul.mubr.bf16.vlgmr.msra.gmra.mxu0 %v3688_v36 }
0x2156   :  { %v4663_v3 = vpop.f32.mrf.mxu0 }
0x2157   :  { %v3805_v49 = vadd.f32 %v4663_v3, %v4257_v0 }
0x2158   :  { %v3796_v48 = vpop.f32.mrf.mxu0 }
0x2159   :  { %v3797_v1 = vadd.f32 %v4257_v0, %v3796_v48  ;;  %v3813_v4 = vadd.f32 %v3805_v49, %v5894_v42 }
0x215a   :  { %v4664_v45 = vpop.f32.mrf.mxu0 }
0x215b   :  { %v3811_v61 = vadd.f32 %v3797_v1, %v5888_v60  ;;  %v3808_v6 = vadd.f32 %v4664_v45, %v4257_v0  ;;  %v3823_v43 = vsel %vm237_vm0, %v3813_v4, 0.0 }
0x215c   :  { %v3799_v63 = vpop.f32.mrf.mxu0 }
0x215d   :  { %v3800_v32 = vadd.f32 %v4257_v0, %v3799_v63  ;;  %v3817_v22 = vsel %vm237_vm0, %v3811_v61, 0.0  ;;  %v3814_v10 = vadd.f32 %v3808_v6, %v5896_v47 }
0x215e   :  { %3818 = vadd.xlane.f32.xlu0 %v3817_v22 }
0x215f   :  { %v3812_v8 = vadd.f32 %v3800_v32, %v5890_v50  ;;  %v3826_v60 = vsel %vm237_vm0, %v3814_v10, 0.0 }
0x2161   :  { %v3820_v12 = vsel %vm237_vm0, %v3812_v8, 0.0 }
0x2162   :  { %3821 = vadd.xlane.f32.xlu1 %v3820_v12  ;;  %3824 = vadd.xlane.f32.xlu0 %v3823_v43 }
0x2166   :  { %3827 = vadd.xlane.f32.xlu1 %v3826_v60 }
0x21e7   :  { %v3819_v35 = vpop.xlane.xlu0 %3818 }
0x21e8   :  { %v3829_v42 = vmul.f32 0.03125, %v3819_v35 }
0x21ea   :  { %v3833_v14 = vsub.f32 %v3811_v61, %v3829_v42 }
0x21eb   :  { %v3822_v34 = vpop.xlane.xlu1 %3821  ;;  %v3825_v16 = vpop.xlane.xlu0 %3824 }
0x21ec   :  { %v3830_v19 = vmul.f32 0.03125, %v3822_v34  ;;  %v3831_v21 = vmul.f32 0.03125, %v3825_v16  ;;  %v3837_v9 = vmul.f32 %v3833_v14, %v3833_v14 }
0x21ee   :  { %v3834_v50 = vsub.f32 %v3812_v8, %v3830_v19  ;;  %v3835_v7 = vsub.f32 %v3813_v4, %v3831_v21  ;;  %v3841_v47 = vsel %vm237_vm0, %v3837_v9, 0.0 }
0x21ef   :  { %v3828_v24 = vpop.xlane.xlu1 %3827  ;;  %3842 = vadd.xlane.f32.xlu0 %v3841_v47 }
0x21f0   :  { %v3832_v25 = vmul.f32 0.03125, %v3828_v24  ;;  %v3838_v13 = vmul.f32 %v3834_v50, %v3834_v50  ;;  %v3839_v26 = vmul.f32 %v3835_v7, %v3835_v7 }
0x21f2   :  { %v3836_v11 = vsub.f32 %v3814_v10, %v3832_v25  ;;  %v3844_v2 = vsel %vm237_vm0, %v3838_v13, 0.0  ;;  %v3847_v27 = vsel %vm237_vm0, %v3839_v26, 0.0  ;;  %v4269_v10 = vld [vmem:[#allocation2] ss:$0 sm:$0xff] }
0x21f3   :  { %3845 = vadd.xlane.f32.xlu1 %v3844_v2  ;;  %3848 = vadd.xlane.f32.xlu0 %v3847_v27 }
0x21f4   :  { %v3840_v15 = vmul.f32 %v3836_v11, %v3836_v11 }
0x21f6   :  { %v3850_v17 = vsel %vm237_vm0, %v3840_v15, 0.0 }
0x21f7   :  { %3851 = vadd.xlane.f32.xlu1 %v3850_v17 }
0x2278   :  { %v3843_v30 = vpop.xlane.xlu0 %3842 }
0x2279   :  { %v3853_v31 = vmul.f32 0.03125, %v3843_v30 }
0x227b   :  { %v3857_v20 = vadd.f32 1e-05, %v3853_v31 }
0x227c   :  { %v3846_v23 = vpop.xlane.xlu1 %3845  ;;  %v3849_v44 = vpop.xlane.xlu0 %3848 }
0x227d   :  { %4993 = vrsqrt.f32 %v3857_v20  ;;  %v3854_v56 = vmul.f32 0.03125, %v3846_v23  ;;  %v3855_v33 = vmul.f32 0.03125, %v3849_v44 }
0x227f   :  { %v3858_v5 = vadd.f32 1e-05, %v3854_v56  ;;  %v3859_v18 = vadd.f32 1e-05, %v3855_v33 }
0x2280   :  { %v3852_v37 = vpop.xlane.xlu1 %3851 }
0x2281   :  { %4995 = vrsqrt.f32 %v3858_v5  ;;  %v3856_v52 = vmul.f32 0.03125, %v3852_v37 }
0x2282   :  { %4997 = vrsqrt.f32 %v3859_v18 }
0x2283   :  { %v3860_v38 = vadd.f32 1e-05, %v3856_v52 }
0x2285   :  { %4999 = vrsqrt.f32 %v3860_v38 }
0x228a   :  { %v4994_v29 = vpop.eup %4993 }
0x228b   :  { %v3865_v39 = vmul.f32 %v4994_v29, %v3833_v14 }
0x228d   :  { %v3875_v41 = vmul.f32 %v4266_v28, %v3865_v39 }
0x228e   :  { %v4996_v46 = vpop.eup %4995 }
0x228f   :  { %v4998_v53 = vpop.eup %4997  ;;  %v5955_v54 = vadd.f32 %v4267_v40, %v3875_v41  ;;  %v3866_v55 = vmul.f32 %v4996_v46, %v3834_v50 }
0x2290   :  { %v3867_v57 = vmul.f32 %v4998_v53, %v3835_v7 }
0x2291   :  { %v3896_v58 = vmul.f32 %v4268_v51, %v5955_v54  ;;  %v3876_v59 = vmul.f32 %v4266_v28, %v3866_v55 }
0x2292   :  { %v5000_v36 = vpop.eup %4999  ;;  %v3877_v3 = vmul.f32 %v4266_v28, %v3867_v57 }
0x2293   :  { %v3900_v0 = vsel %vm237_vm0, %v3896_v58, 0.0  ;;  %v5959_v48 = vadd.f32 %v4267_v40, %v3876_v59  ;;  %v3868_v49 = vmul.f32 %v5000_v36, %v3836_v11 }
0x2294   :  { %3901 = vadd.xlane.f32.xlu0 %v3900_v0  ;;  %v5961_v1 = vadd.f32 %v4267_v40, %v3877_v3 }
0x2295   :  { %v3897_v45 = vmul.f32 %v4268_v51, %v5959_v48  ;;  %v3878_v61 = vmul.f32 %v4266_v28, %v3868_v49 }
0x2296   :  { %v3898_v63 = vmul.f32 %v4268_v51, %v5961_v1 }
0x2297   :  { %v3903_v4 = vsel %vm237_vm0, %v3897_v45, 0.0  ;;  %v5966_v6 = vadd.f32 %v4267_v40, %v3878_v61 }
0x2298   :  { %3904 = vadd.xlane.f32.xlu1 %v3903_v4  ;;  %v3906_v32 = vsel %vm237_vm0, %v3898_v63, 0.0 }
0x2299   :  { %3907 = vadd.xlane.f32.xlu0 %v3906_v32  ;;  %v3899_v22 = vmul.f32 %v4268_v51, %v5966_v6 }
0x229b   :  { %v3909_v8 = vsel %vm237_vm0, %v3899_v22, 0.0 }
0x229c   :  { %3910 = vadd.xlane.f32.xlu1 %v3909_v8 }
0x231d   :  { %v3902_v12 = vpop.xlane.xlu0 %3901 }
0x231e   :  { %v3919_v43 = vadd.f32 %v4269_v10, %v3902_v12 }
0x2320   :  { %v3924_v14 = vsel %vm3923_vm12, %v3919_v43, -inf }
0x2321   :  { %v3905_v60 = vpop.xlane.xlu1 %3904 }
0x2322   :  { %v3920_v35 = vadd.f32 %v4269_v10, %v3905_v60  ;;  %v3908_v42 = vpop.xlane.xlu0 %3907 }
0x2323   :  { %v3921_v16 = vadd.f32 %v4269_v10, %v3908_v42  ;;  %v4816_v42 = vld [vmem:[%s6019_s18] sm:$0xff]  }
0x2324   :  { %v3925_v34 = vsel %vm3923_vm12, %v3920_v35, -inf }
0x2325   :  { %v3926_v19 = vmax.f32 %v3924_v14, %v3925_v34  ;;  %v3911_v21 = vpop.xlane.xlu1 %3910  ;;  %v3933_v7 = vsel %vm3923_vm12, %v3921_v16, -inf }
0x2326   :  { %v3922_v9 = vadd.f32 %v4269_v10, %v3911_v21 }
0x2327   :  { %v3927_v50 = vrot.slane %v3926_v19, 4 }
0x2328   :  { %v3934_v47 = vsel %vm3923_vm12, %v3922_v9, -inf }
0x2329   :  { %v3928_v24 = vmax.f32 %v3926_v19, %v3927_v50  ;;  %v3935_v25 = vmax.f32 %v3933_v7, %v3934_v47 }
0x232b   :  { %v3929_v13 = vrot.slane %v3928_v24, 2  ;;  %v3936_v26 = vrot.slane %v3935_v25, 4 }
0x232d   :  { %v3930_v11 = vmax.f32 %v3928_v24, %v3929_v13  ;;  %v3937_v2 = vmax.f32 %v3935_v25, %v3936_v26 }
0x232f   :  { %v3931_v27 = vrot.slane %v3930_v11, 1  ;;  %v3938_v15 = vrot.slane %v3937_v2, 2 }
0x2331   :  { %v3932_v17 = vmax.f32 %v3930_v11, %v3931_v27  ;;  %v3939_v30 = vmax.f32 %v3937_v2, %v3938_v15 }
0x2333   :  { %v3942_v31 = vsub.f32 %v3919_v43, %v3932_v17  ;;  %v3943_v20 = vsub.f32 %v3920_v35, %v3932_v17  ;;  %v3940_v23 = vrot.slane %v3939_v30, 1  ;;  %v4815_v35 = vld [vmem:[%s6019_s18 + $0x8] sm:$0xff]  }
0x2334   :  { %4666 = vmatpush3.bf16.msra.mxu1 %v4815_v35 }
0x2335   :  { %v3946_v44 = vmul.f32 1.442695, %v3942_v31  ;;  %v3948_v56 = vmul.f32 1.442695, %v3943_v20  ;;  %v3941_v33 = vmax.f32 %v3939_v30, %v3940_v23  ;;  %4667 = vmatprep.subr.bf16.mxu1 %v5036_v62 }
0x2337   :  { %5001 = vpow2.f32 %v3946_v44  ;;  %v3944_v5 = vsub.f32 %v3921_v16, %v3941_v33  ;;  %v3945_v18 = vsub.f32 %v3922_v9, %v3941_v33 }
0x2338   :  { %5003 = vpow2.f32 %v3948_v56  ;;  %4668 = vmatpush3.bf16.msra.mxu1 %v4816_v42 }
0x2339   :  { %v3950_v37 = vmul.f32 1.442695, %v3944_v5  ;;  %v3952_v52 = vmul.f32 1.442695, %v3945_v18 }
0x233b   :  { %5005 = vpow2.f32 %v3950_v37  ;;  %v4270_v37 = vld [vmem:[%s6020_s19] ss:$0 sm:$0xff] }
0x233c   :  { %5007 = vpow2.f32 %v3952_v52 }
0x2344   :  { %v5002_v38 = vpop.eup %5001 }
0x2345   :  { %v5004_v29 = vpop.eup %5003  ;;  %v3954_v28 = vsel %vm3923_vm12, %v5002_v38, 0.0 }
0x2346   :  { %v3955_v39 = vsel %vm3923_vm12, %v5004_v29, 0.0 }
0x2347   :  { %v3956_v40 = vadd.f32 %v3955_v39, %v3954_v28 }
0x2348   :  { %v5006_v41 = vpop.eup %5005 }
0x2349   :  { %v5008_v46 = vpop.eup %5007  ;;  %v3957_v51 = vrot.slane %v3956_v40, 4  ;;  %v3963_v53 = vsel %vm3923_vm12, %v5006_v41, 0.0 }
0x234a   :  { %v3964_v55 = vsel %vm3923_vm12, %v5008_v46, 0.0 }
0x234b   :  { %v3958_v57 = vadd.f32 %v3957_v51, %v3956_v40  ;;  %v3965_v58 = vadd.f32 %v3964_v55, %v3963_v53 }
0x234d   :  { %v3959_v59 = vrot.slane %v3958_v57, 2  ;;  %v3966_v36 = vrot.slane %v3965_v58, 4 }
0x234f   :  { %v3960_v3 = vadd.f32 %v3959_v59, %v3958_v57  ;;  %v3967_v0 = vadd.f32 %v3966_v36, %v3965_v58 }
0x2351   :  { %v3968_v49 = vrot.slane %v3967_v0, 2  ;;  %v3961_v45 = vrot.slane %v3960_v3, 1 }
0x2353   :  { %v3969_v61 = vadd.f32 %v3968_v49, %v3967_v0  ;;  %v3962_v63 = vadd.f32 %v3961_v45, %v3960_v3 }
0x2355   :  { %5009 = vrcp.f32 %v3962_v63  ;;  %v3970_v4 = vrot.slane %v3969_v61, 1 }
0x2357   :  { %v3971_v32 = vadd.f32 %v3970_v4, %v3969_v61 }
0x2359   :  { %5011 = vrcp.f32 %v3971_v32 }
0x2362   :  { %v5010_v22 = vpop.eup %5009 }
0x2363   :  { %v3973_v8 = vmul.f32 %v5010_v22, %v5002_v38  ;;  %v3974_v43 = vmul.f32 %v5010_v22, %v5004_v29 }
0x2365   :  { %3980 = vperm.xlu0 %4751, %v3973_v8  }
0x2366   :  { %v5012_v10 = vpop.eup %5011 }
0x2367   :  { %v3976_v12 = vmul.f32 %v5012_v10, %v5006_v41  ;;  %v3977_v60 = vmul.f32 %v5012_v10, %v5008_v46 }
0x2369   :  { %3990 = vperm.xlu1 %4752, %v3976_v12  }
0x236d   :  { %3985 = vperm.xlu1 %4752, %v3974_v43  }
0x2371   :  { %3995 = vperm.xlu1 %4752, %v3977_v60  }
0x23e0   :  { %v3981_v14 = vpop.permute.xlu0 %3980 }
0x23e1   :  { %v3998_v16 = vmul.f32 %v3981_v14, %v5955_v54 }
0x23e3   :  { %v4002_v9 = vsel %vm237_vm0, %v3998_v16, 0.0 }
0x23e4   :  { %v3991_v34 = vpop.permute.xlu1 %3990 }
0x23e5   :  { %v4000_v50 = vmul.f32 %v3991_v34, %v5961_v1 }
0x23e7   :  { %v4011_v62 = vsel %vm237_vm0, %v4000_v50, 0.0 }
0x23e8   :  { %v3986_v19 = vpop.permute.xlu1 %3985 }
0x23e9   :  { %v3999_v21 = vmul.f32 %v3986_v19, %v5959_v48 }
0x23eb   :  { %v4003_v7 = vsel %vm237_vm0, %v3999_v21, 0.0 }
0x23ec   :  { %v4004_v47 = vadd.f32 %v4003_v7, %v4002_v9  ;;  %v3996_v24 = vpop.permute.xlu1 %3995 }
0x23ed   :  { %v4001_v25 = vmul.f32 %v3996_v24, %v5966_v6 }
0x23ee   :  { %v4005_v13 = vrot.slane %v4004_v47, 4 }
0x23ef   :  { %v4012_v26 = vsel %vm237_vm0, %v4001_v25, 0.0 }
0x23f0   :  { %v4006_v11 = vadd.f32 %v4005_v13, %v4004_v47  ;;  %v4013_v54 = vadd.f32 %v4012_v26, %v4011_v62 }
0x23f2   :  { %v4007_v2 = vrot.slane %v4006_v11, 2  ;;  %v4014_v27 = vrot.slane %v4013_v54, 4 }
0x23f4   :  { %v4008_v48 = vadd.f32 %v4007_v2, %v4006_v11  ;;  %v4015_v15 = vadd.f32 %v4014_v27, %v4013_v54 }
0x23f6   :  { %v4009_v17 = vrot.slane %v4008_v48, 1  ;;  %v4016_v30 = vrot.slane %v4015_v15, 2 }
0x23f8   :  { %v4010_v1 = vadd.f32 %v4009_v17, %v4008_v48  ;;  %v4017_v31 = vadd.f32 %v4016_v30, %v4015_v15 }
0x23fa   :  { %v4018_v20 = vrot.slane %v4017_v31, 1  ;;  %v4020_v23 = vpack.c.bf16 %v4010_v1, %v4010_v1 }
0x23fc   :  { %v4019_v44 = vadd.f32 %v4018_v20, %v4017_v31  ;;  %v4035_v6 = vunpack.c.l.b16 %v4020_v23 }
0x23fe   :  { %v4021_v56 = vpack.c.bf16 %v4019_v44, %v4019_v44 }
0x2400   :  { %v4036_v33 = vunpack.c.l.b16 %v4021_v56 }
0x2402   :  { %v4038_v5 = vsel %vm4037_vm13, %v4036_v33, %v4035_v6 }
0x2403   :  { %v4039_v18 = vpack.c.b16 %v4038_v5, %v4038_v5 }
0x2405   :  { %4670 = vmatmul.mubr.msk.bf16.vlgmr.msra.gmra.mxu1 %vm237_vm0, %v4039_v18 }
0x24c5   :  { %v4089_v52 = vpop.f32.mrf.mxu1 }
0x24c6   :  { %v4090_v38 = vadd.f32 %v4270_v37, %v4089_v52 }
0x24c7   :  { %v4671_v29 = vpop.f32.mrf.mxu1 }
0x24c8   :  { %4096 = vst.msk [vmem:[#allocation3] sm:$0x3] %vm4095_vm14, %v4090_v38 }
0x24c9   :  { %v4092_v28 = vpop.f32.mrf.mxu1 }
0x24ca   :  { %5024 = shalt.err (!%p5021_p4)
}
0x24cb   :  { %4106 = dma.vmem_to_hbm [thread:$0]  %s4104_s4, 32, %s6021_s20, [#allocation4]   ;;  %v4672_v39 = vpop.f32.mrf.mxu1 }
0x24cc   :  { %5033 = dma.done.wait [#allocation4], 32  }
0x24cd   :  { %5034 = vsyncadd [#allocation4], 4294967264 }
0x24ce   :  { %4110 = vsyncpa [#allocation4], 1 }

</bundles_post_ra>
